<compile_context>
chip_gen: v5e
topology: v5e:2x2
jax: 0.10.0
libtpu: 0.0.40
codegen_flags: <defaults>
</compile_context>

<pallas_src>
import math

import jax
import jax.numpy as jnp
from jax.experimental import pallas as pl
from jax.experimental.pallas import tpu as pltpu


def ponder_gru_kernel(xT_ref, u_ref, wxT_ref, bxT_ref, whT_ref, bhnT_ref, bhead_ref,
                      p_ref, y_ref, pm_ref, ym_ref):
    H = bhnT_ref.shape[0]
    N = u_ref.shape[0]            # max_steps
    Bb = xT_ref.shape[1]          # batch tile (lanes)

    whT = whT_ref[...]            # [3H+2, H] bf16: rows = [Whr^T | Whz^T | Whn^T | w_out^T | w_lam^T]
    xT = xT_ref[...].astype(whT.dtype)                       # [E, Bb] bf16 (values in {-1,0,1}: exact)

    # Loop-invariant input projection: one bf16 MXU matmul for all three gates;
    # the r/z hidden biases are folded into bxT (they are additive outside the r* term).
    xi = jnp.dot(wxT_ref[...], xT, preferred_element_type=jnp.float32) + bxT_ref[...]   # [3H, Bb] f32
    xi_r = xi[0:H, :]
    xi_z = xi[H:2 * H, :]
    xi_n = xi[2 * H:3 * H, :]

    # Hoisted broadcasts (done once, not once per unrolled step).
    bhn = jnp.broadcast_to(bhnT_ref[...], (H, Bb))            # candidate-gate hidden bias
    bhead = jnp.broadcast_to(bhead_ref[...], (2, Bb))          # [b_out ; b_lam]

    # Initial GRU step with h == 0: the hidden matmul vanishes and z*h == 0.
    r0 = jax.nn.sigmoid(xi_r)
    z0 = jax.nn.sigmoid(xi_z)
    g0 = jnp.tanh(xi_n + r0 * bhn)
    h = (1.0 - z0) * g0                                        # [H, Bb] f32

    un_halted = jnp.ones((1, Bb), jnp.float32)
    halted = jnp.zeros((1, Bb), jnp.float32)
    p_m = jnp.zeros((1, Bb), jnp.float32)
    y_m = jnp.zeros((1, Bb), jnp.float32)

    for step in range(1, N + 1):
        # One fused MXU matmul per step: GRU gates + output head + lambda head.
        hz = jnp.dot(whT, h.astype(whT.dtype), preferred_element_type=jnp.float32)   # [3H+2, Bb]

        heads = hz[3 * H:3 * H + 2, :] + bhead                 # [2, Bb]
        y_n = heads[0:1, :]                                     # output head (log-prob of parity 1)
        if step == N:
            lam = jnp.ones((1, Bb), jnp.float32)
        else:
            lam = jax.nn.sigmoid(heads[1:2, :])

        p_n = un_halted * lam
        un_halted = un_halted * (1.0 - lam)

        # Bernoulli(lam) halting draw via pre-generated uniforms (see wrapper).
        u_s = u_ref[pl.ds(step - 1, 1), :]                      # [1, Bb]
        halt = (u_s < lam).astype(jnp.float32) * (1.0 - halted)

        # Direct per-step stores into the lane-dense [N, B] trace outputs.
        p_ref[pl.ds(step - 1, 1), :] = p_n
        y_ref[pl.ds(step - 1, 1), :] = y_n

        p_m = p_m * (1.0 - halt) + p_n * halt
        y_m = y_m * (1.0 - halt) + y_n * halt
        halted = halted + halt

        if step < N:   # the GRU update after the final step is never used
            r = jax.nn.sigmoid(xi_r + hz[0:H, :])
            z = jax.nn.sigmoid(xi_z + hz[H:2 * H, :])
            g = jnp.tanh(xi_n + r * (hz[2 * H:3 * H, :] + bhn))
            h = (1.0 - z) * g + z * h
    # TODO(synk): the PyTorch `is_halt` early-break is a data-dependent loop exit with no
    # static-shape equivalent; with is_halt=False (the default) all max_steps run, as here.

    pm_ref[...] = p_m
    ym_ref[...] = y_m


def init_params(key, n_elems: int, n_hidden: int):
    """Deterministic synthetic parameters (uniform in [-1/sqrt(H), 1/sqrt(H)]), GRUCell layout."""
    k = 1.0 / math.sqrt(n_hidden)
    keys = jax.random.split(key, 8)
    u = lambda kk, shape: jax.random.uniform(kk, shape, jnp.float32, -k, k)
    return dict(
        w_ih=u(keys[0], (3, n_elems, n_hidden)),   # gate order r, z, n (torch.nn.GRUCell)
        w_hh=u(keys[1], (3, n_hidden, n_hidden)),
        b_ih=u(keys[2], (3, 1, n_hidden)),
        b_hh=u(keys[3], (3, 1, n_hidden)),
        w_out=u(keys[4], (n_hidden, 1)),
        b_out=u(keys[5], (1, 1)),
        w_lam=u(keys[6], (n_hidden, 1)),
        b_lam=u(keys[7], (1, 1)),
    )


def fuse_params(p, matmul_dtype=jnp.bfloat16):
    """Fuse GRU / output / lambda weights into the transposed (batch-on-lanes) layout.

    NOTE: matmul operands are bf16 (native MXU dtype); the ~3-digit weight error compounds
    over max_steps through the recurrence — pass matmul_dtype=jnp.float32 if tight numerical
    parity with an f32 reference is required.
    """
    wx = jnp.concatenate([p["w_ih"][0], p["w_ih"][1], p["w_ih"][2]], axis=1)      # [E, 3H]
    bx = jnp.concatenate([p["b_ih"][0] + p["b_hh"][0],
                          p["b_ih"][1] + p["b_hh"][1],
                          p["b_ih"][2]], axis=1)                                  # [1, 3H]
    wh = jnp.concatenate([p["w_hh"][0], p["w_hh"][1], p["w_hh"][2],
                          p["w_out"], p["w_lam"]], axis=1)                        # [H, 3H+2]
    bhead = jnp.concatenate([p["b_out"], p["b_lam"]], axis=1)                     # [1, 2]
    return dict(
        wx_t=wx.T.astype(matmul_dtype),               # [3H, E]
        bx_t=bx.T.astype(jnp.float32),                # [3H, 1]
        wh_t=wh.T.astype(matmul_dtype),               # [3H+2, H]
        bhn_t=p["b_hh"][2].T.astype(jnp.float32),     # [H, 1] candidate-gate hidden bias
        bhead=bhead.T.astype(jnp.float32),            # [2, 1]  [b_out; b_lam]
    )


def parity_ponder_gru(x, fused, max_steps: int, halt_key):
    """Returns (p [N, B], y_hat [N, B], p_m [B], y_hat_m [B]) like the PyTorch module."""
    B, E = x.shape
    N = max_steps
    H = fused["bhn_t"].shape[0]
    assert H % 8 == 0, "n_hidden must be a multiple of 8 (sublane-aligned gate slices)"

    # Uniform draws for the Bernoulli halting decisions (replaces torch.bernoulli);
    # generated batch-on-lanes so the kernel slices them as [1, Bb] rows.
    u = jax.random.uniform(halt_key, (N, B), jnp.float32)

    # Inputs in batch-on-lanes layout (tiny one-time transpose of [B, n_elems]).
    x_t = jnp.transpose(x.astype(jnp.float32))                                    # [E, B]

    # Batch tile: multiples of 128 keep the HBM output stores lane-dense; prefer a grid
    # with >= 2 steps so the v7x megacore can shard the "parallel" axis; 256-wide tiles
    # amortize per-step overhead on v6e/v7x. Small batches use a single full block.
    if B % 256 == 0 and B >= 512:
        block_b = 256
    elif B % 128 == 0 and B >= 256:
        block_b = 128
    else:
        block_b = B
    assert B % block_b == 0
    grid = (B // block_b,)

    def weight_spec(arr):
        return pl.BlockSpec(arr.shape, lambda i: (0, 0))

    out_shape = (
        jax.ShapeDtypeStruct((N, B), jnp.float32),   # p   (lane-dense, no wrapper transpose)
        jax.ShapeDtypeStruct((N, B), jnp.float32),   # y_hat
        jax.ShapeDtypeStruct((1, B), jnp.float32),   # p_m
        jax.ShapeDtypeStruct((1, B), jnp.float32),   # y_hat_m
    )

    fn = pl.pallas_call(
        ponder_gru_kernel,
        out_shape=out_shape,
        grid=grid,
        in_specs=[
            pl.BlockSpec((E, block_b), lambda i: (0, i)),     # x^T
            pl.BlockSpec((N, block_b), lambda i: (0, i)),     # halting uniforms
            weight_spec(fused["wx_t"]), weight_spec(fused["bx_t"]),
            weight_spec(fused["wh_t"]), weight_spec(fused["bhn_t"]),
            weight_spec(fused["bhead"]),
        ],
        out_specs=(
            pl.BlockSpec((N, block_b), lambda i: (0, i)),
            pl.BlockSpec((N, block_b), lambda i: (0, i)),
            pl.BlockSpec((1, block_b), lambda i: (0, i)),
            pl.BlockSpec((1, block_b), lambda i: (0, i)),
        ),
        # At toy sizes the default VMEM budget is ample; when scaling H / block_b up,
        # re-derive against 64 MiB physical on v7x and set vmem_limit_bytes explicitly.
        compiler_params=pltpu.CompilerParams(dimension_semantics=("parallel",)),
    )

    p, y, p_m, y_m = fn(x_t, u, fused["wx_t"], fused["bx_t"], fused["wh_t"],
                        fused["bhn_t"], fused["bhead"])
    return p, y, p_m[0], y_m[0]


if __name__ == "__main__":
    n_elems = 8
    n_hidden = 32
    max_steps = 8
    batch = 8

    key = jax.random.PRNGKey(0)
    k_param, k_x, k_halt = jax.random.split(key, 3)

    params = init_params(k_param, n_elems, n_hidden)
    fused = fuse_params(params)

    # Parity task inputs: elements in {-1, 0, 1}.
    x = jax.random.randint(k_x, (batch, n_elems), -1, 2).astype(jnp.float32)

    p, y_hat, p_m, y_m = parity_ponder_gru(x, fused, max_steps, k_halt)
    jax.block_until_ready((p, y_hat, p_m, y_m))

    assert p.shape == (max_steps, batch)
    assert y_hat.shape == (max_steps, batch)
    assert p_m.shape == (batch,)
    assert y_m.shape == (batch,)
    # The halting probabilities p_1..p_N sum to 1 per batch element (since lambda_N == 1).
    assert jnp.allclose(p.sum(axis=0), jnp.ones((batch,)), atol=1e-5)

    print("KERNEL_OK")
</pallas_src>

<mosaic_0001>
module attributes {stable_mosaic.version = 11 : i64} {
  func.func @ponder_gru_kernel(%arg0: i32, %arg1: memref<8x8xf32, #tpu.memory_space<vmem>>, %arg2: memref<8x8xf32, #tpu.memory_space<vmem>>, %arg3: memref<96x8xbf16, #tpu.memory_space<vmem>>, %arg4: memref<96x1xf32, #tpu.memory_space<vmem>>, %arg5: memref<98x32xbf16, #tpu.memory_space<vmem>>, %arg6: memref<32x1xf32, #tpu.memory_space<vmem>>, %arg7: memref<2x1xf32, #tpu.memory_space<vmem>>, %arg8: memref<8x8xf32, #tpu.memory_space<vmem>>, %arg9: memref<8x8xf32, #tpu.memory_space<vmem>>, %arg10: memref<1x8xf32, #tpu.memory_space<vmem>>, %arg11: memref<1x8xf32, #tpu.memory_space<vmem>>) attributes {dimension_semantics = [#tpu.dimension_semantics<parallel>], iteration_bounds = array<i64: 1>, scalar_prefetch = 0 : i64, scratch_operands = 0 : i64, tpu.core_type = #tpu.core_type<tc>, window_params = [{transform_indices = @transform_0, window_bounds = array<i64: 8, 8>}, {transform_indices = @transform_1, window_bounds = array<i64: 8, 8>}, {pipeline_mode = #tpu.pipeline_mode<synchronous>, transform_indices = @transform_2, window_bounds = array<i64: 96, 8>}, {pipeline_mode = #tpu.pipeline_mode<synchronous>, transform_indices = @transform_3, window_bounds = array<i64: 96, 1>}, {pipeline_mode = #tpu.pipeline_mode<synchronous>, transform_indices = @transform_4, window_bounds = array<i64: 98, 32>}, {pipeline_mode = #tpu.pipeline_mode<synchronous>, transform_indices = @transform_5, window_bounds = array<i64: 32, 1>}, {pipeline_mode = #tpu.pipeline_mode<synchronous>, transform_indices = @transform_6, window_bounds = array<i64: 2, 1>}, {transform_indices = @transform_7, window_bounds = array<i64: 8, 8>}, {transform_indices = @transform_8, window_bounds = array<i64: 8, 8>}, {transform_indices = @transform_9, window_bounds = array<i64: 1, 8>}, {transform_indices = @transform_10, window_bounds = array<i64: 1, 8>}]} {
    %c0 = arith.constant 0 : index
    %c0_0 = arith.constant 0 : index
    %0 = vector.load %arg5[%c0, %c0_0] : memref<98x32xbf16, #tpu.memory_space<vmem>>, vector<98x32xbf16>
    %c0_1 = arith.constant 0 : index
    %c0_2 = arith.constant 0 : index
    %1 = vector.load %arg1[%c0_1, %c0_2] : memref<8x8xf32, #tpu.memory_space<vmem>>, vector<8x8xf32>
    %2 = arith.truncf %1 : vector<8x8xf32> to vector<8x8xbf16>
    %c0_3 = arith.constant 0 : index
    %c0_4 = arith.constant 0 : index
    %3 = vector.load %arg3[%c0_3, %c0_4] : memref<96x8xbf16, #tpu.memory_space<vmem>>, vector<96x8xbf16>
    %cst = arith.constant dense<0.000000e+00> : vector<96x8xf32>
    %4 = tpu.matmul %3, %2, %cst {dimension_numbers = #tpu.dot_dimension_numbers<[1], [0], [0], [1], [0, 0, 1, 1], [], []>} : vector<96x8xbf16>, vector<8x8xbf16>, vector<96x8xf32> -> vector<96x8xf32>
    %c0_5 = arith.constant 0 : index
    %c0_6 = arith.constant 0 : index
    %5 = vector.load %arg4[%c0_5, %c0_6] : memref<96x1xf32, #tpu.memory_space<vmem>>, vector<96x1xf32>
    %6 = vector.broadcast %5 : vector<96x1xf32> to vector<96x8xf32>
    %7 = arith.addf %4, %6 : vector<96x8xf32>
    %8 = vector.extract_strided_slice %7 {offsets = [0, 0], sizes = [32, 8], strides = [1, 1]} : vector<96x8xf32> to vector<32x8xf32>
    %9 = vector.extract_strided_slice %7 {offsets = [32, 0], sizes = [32, 8], strides = [1, 1]} : vector<96x8xf32> to vector<32x8xf32>
    %10 = vector.extract_strided_slice %7 {offsets = [64, 0], sizes = [32, 8], strides = [1, 1]} : vector<96x8xf32> to vector<32x8xf32>
    %c0_7 = arith.constant 0 : index
    %c0_8 = arith.constant 0 : index
    %11 = vector.load %arg6[%c0_7, %c0_8] : memref<32x1xf32, #tpu.memory_space<vmem>>, vector<32x1xf32>
    %12 = vector.shape_cast %11 : vector<32x1xf32> to vector<32x1xf32>
    %13 = vector.broadcast %12 : vector<32x1xf32> to vector<32x8xf32>
    %c0_9 = arith.constant 0 : index
    %c0_10 = arith.constant 0 : index
    %14 = vector.load %arg7[%c0_9, %c0_10] : memref<2x1xf32, #tpu.memory_space<vmem>>, vector<2x1xf32>
    %15 = vector.shape_cast %14 : vector<2x1xf32> to vector<2x1xf32>
    %16 = vector.broadcast %15 : vector<2x1xf32> to vector<2x8xf32>
    %17 = arith.negf %8 : vector<32x8xf32>
    %18 = math.exp %17 : vector<32x8xf32>
    %cst_11 = arith.constant 1.000000e+00 : f32
    %19 = vector.broadcast %cst_11 : f32 to vector<32x8xf32>
    %20 = arith.addf %19, %18 : vector<32x8xf32>
    %21 = arith.divf %19, %20 : vector<32x8xf32>
    %22 = arith.negf %9 : vector<32x8xf32>
    %23 = math.exp %22 : vector<32x8xf32>
    %cst_12 = arith.constant 1.000000e+00 : f32
    %24 = vector.broadcast %cst_12 : f32 to vector<32x8xf32>
    %25 = arith.addf %24, %23 : vector<32x8xf32>
    %26 = arith.divf %24, %25 : vector<32x8xf32>
    %27 = arith.mulf %21, %13 : vector<32x8xf32>
    %28 = arith.addf %10, %27 : vector<32x8xf32>
    %29 = math.tanh %28 : vector<32x8xf32>
    %cst_13 = arith.constant 1.000000e+00 : f32
    %30 = vector.broadcast %cst_13 : f32 to vector<32x8xf32>
    %31 = arith.subf %30, %26 : vector<32x8xf32>
    %32 = arith.mulf %31, %29 : vector<32x8xf32>
    %cst_14 = arith.constant 1.000000e+00 : f32
    %33 = vector.broadcast %cst_14 : f32 to vector<1x8xf32>
    %cst_15 = arith.constant 0.000000e+00 : f32
    %34 = vector.broadcast %cst_15 : f32 to vector<1x8xf32>
    %cst_16 = arith.constant 0.000000e+00 : f32
    %35 = vector.broadcast %cst_16 : f32 to vector<1x8xf32>
    %cst_17 = arith.constant 0.000000e+00 : f32
    %36 = vector.broadcast %cst_17 : f32 to vector<1x8xf32>
    %37 = arith.truncf %32 : vector<32x8xf32> to vector<32x8xbf16>
    %cst_18 = arith.constant dense<0.000000e+00> : vector<98x8xf32>
    %38 = tpu.matmul %0, %37, %cst_18 {dimension_numbers = #tpu.dot_dimension_numbers<[1], [0], [0], [1], [0, 0, 1, 1], [], []>} : vector<98x32xbf16>, vector<32x8xbf16>, vector<98x8xf32> -> vector<98x8xf32>
    %39 = vector.extract_strided_slice %38 {offsets = [96, 0], sizes = [2, 8], strides = [1, 1]} : vector<98x8xf32> to vector<2x8xf32>
    %40 = arith.addf %39, %16 : vector<2x8xf32>
    %41 = vector.extract_strided_slice %40 {offsets = [0, 0], sizes = [1, 8], strides = [1, 1]} : vector<2x8xf32> to vector<1x8xf32>
    %42 = vector.extract_strided_slice %40 {offsets = [1, 0], sizes = [1, 8], strides = [1, 1]} : vector<2x8xf32> to vector<1x8xf32>
    %43 = arith.negf %42 : vector<1x8xf32>
    %44 = math.exp %43 : vector<1x8xf32>
    %cst_19 = arith.constant 1.000000e+00 : f32
    %45 = vector.broadcast %cst_19 : f32 to vector<1x8xf32>
    %46 = arith.addf %45, %44 : vector<1x8xf32>
    %47 = arith.divf %45, %46 : vector<1x8xf32>
    %48 = arith.mulf %33, %47 : vector<1x8xf32>
    %cst_20 = arith.constant 1.000000e+00 : f32
    %49 = vector.broadcast %cst_20 : f32 to vector<1x8xf32>
    %50 = arith.subf %49, %47 : vector<1x8xf32>
    %51 = arith.mulf %33, %50 : vector<1x8xf32>
    %c0_21 = arith.constant 0 : index
    %c0_22 = arith.constant 0 : index
    %52 = vector.load %arg2[%c0_21, %c0_22] : memref<8x8xf32, #tpu.memory_space<vmem>>, vector<1x8xf32>
    %53 = arith.cmpf olt, %52, %47 : vector<1x8xf32>
    %54 = arith.extui %53 : vector<1x8xi1> to vector<1x8xi32>
    %55 = arith.sitofp %54 : vector<1x8xi32> to vector<1x8xf32>
    %cst_23 = arith.constant 1.000000e+00 : f32
    %56 = vector.broadcast %cst_23 : f32 to vector<1x8xf32>
    %57 = arith.subf %56, %34 : vector<1x8xf32>
    %58 = arith.mulf %55, %57 : vector<1x8xf32>
    %c0_24 = arith.constant 0 : index
    %c0_25 = arith.constant 0 : index
    %59 = vector.load %arg8[%c0_24, %c0_25] : memref<8x8xf32, #tpu.memory_space<vmem>>, vector<1x8xf32>
    tpu.vector_store %arg8[%c0_24, %c0_25], %48 {strides = array<i32>} : memref<8x8xf32, #tpu.memory_space<vmem>>, vector<1x8xf32>,
    %c0_26 = arith.constant 0 : index
    %c0_27 = arith.constant 0 : index
    %60 = vector.load %arg9[%c0_26, %c0_27] : memref<8x8xf32, #tpu.memory_space<vmem>>, vector<1x8xf32>
    tpu.vector_store %arg9[%c0_26, %c0_27], %41 {strides = array<i32>} : memref<8x8xf32, #tpu.memory_space<vmem>>, vector<1x8xf32>,
    %cst_28 = arith.constant 1.000000e+00 : f32
    %61 = vector.broadcast %cst_28 : f32 to vector<1x8xf32>
    %62 = arith.subf %61, %58 : vector<1x8xf32>
    %63 = arith.mulf %35, %62 : vector<1x8xf32>
    %64 = arith.mulf %48, %58 : vector<1x8xf32>
    %65 = arith.addf %63, %64 : vector<1x8xf32>
    %cst_29 = arith.constant 1.000000e+00 : f32
    %66 = vector.broadcast %cst_29 : f32 to vector<1x8xf32>
    %67 = arith.subf %66, %58 : vector<1x8xf32>
    %68 = arith.mulf %36, %67 : vector<1x8xf32>
    %69 = arith.mulf %41, %58 : vector<1x8xf32>
    %70 = arith.addf %68, %69 : vector<1x8xf32>
    %71 = arith.addf %34, %58 : vector<1x8xf32>
    %72 = vector.extract_strided_slice %38 {offsets = [0, 0], sizes = [32, 8], strides = [1, 1]} : vector<98x8xf32> to vector<32x8xf32>
    %73 = arith.addf %8, %72 : vector<32x8xf32>
    %74 = arith.negf %73 : vector<32x8xf32>
    %75 = math.exp %74 : vector<32x8xf32>
    %cst_30 = arith.constant 1.000000e+00 : f32
    %76 = vector.broadcast %cst_30 : f32 to vector<32x8xf32>
    %77 = arith.addf %76, %75 : vector<32x8xf32>
    %78 = arith.divf %76, %77 : vector<32x8xf32>
    %79 = vector.extract_strided_slice %38 {offsets = [32, 0], sizes = [32, 8], strides = [1, 1]} : vector<98x8xf32> to vector<32x8xf32>
    %80 = arith.addf %9, %79 : vector<32x8xf32>
    %81 = arith.negf %80 : vector<32x8xf32>
    %82 = math.exp %81 : vector<32x8xf32>
    %cst_31 = arith.constant 1.000000e+00 : f32
    %83 = vector.broadcast %cst_31 : f32 to vector<32x8xf32>
    %84 = arith.addf %83, %82 : vector<32x8xf32>
    %85 = arith.divf %83, %84 : vector<32x8xf32>
    %86 = vector.extract_strided_slice %38 {offsets = [64, 0], sizes = [32, 8], strides = [1, 1]} : vector<98x8xf32> to vector<32x8xf32>
    %87 = arith.addf %86, %13 : vector<32x8xf32>
    %88 = arith.mulf %78, %87 : vector<32x8xf32>
    %89 = arith.addf %10, %88 : vector<32x8xf32>
    %90 = math.tanh %89 : vector<32x8xf32>
    %cst_32 = arith.constant 1.000000e+00 : f32
    %91 = vector.broadcast %cst_32 : f32 to vector<32x8xf32>
    %92 = arith.subf %91, %85 : vector<32x8xf32>
    %93 = arith.mulf %92, %90 : vector<32x8xf32>
    %94 = arith.mulf %85, %32 : vector<32x8xf32>
    %95 = arith.addf %93, %94 : vector<32x8xf32>
    %96 = arith.truncf %95 : vector<32x8xf32> to vector<32x8xbf16>
    %cst_33 = arith.constant dense<0.000000e+00> : vector<98x8xf32>
    %97 = tpu.matmul %0, %96, %cst_33 {dimension_numbers = #tpu.dot_dimension_numbers<[1], [0], [0], [1], [0, 0, 1, 1], [], []>} : vector<98x32xbf16>, vector<32x8xbf16>, vector<98x8xf32> -> vector<98x8xf32>
    %98 = vector.extract_strided_slice %97 {offsets = [96, 0], sizes = [2, 8], strides = [1, 1]} : vector<98x8xf32> to vector<2x8xf32>
    %99 = arith.addf %98, %16 : vector<2x8xf32>
    %100 = vector.extract_strided_slice %99 {offsets = [0, 0], sizes = [1, 8], strides = [1, 1]} : vector<2x8xf32> to vector<1x8xf32>
    %101 = vector.extract_strided_slice %99 {offsets = [1, 0], sizes = [1, 8], strides = [1, 1]} : vector<2x8xf32> to vector<1x8xf32>
    %102 = arith.negf %101 : vector<1x8xf32>
    %103 = math.exp %102 : vector<1x8xf32>
    %cst_34 = arith.constant 1.000000e+00 : f32
    %104 = vector.broadcast %cst_34 : f32 to vector<1x8xf32>
    %105 = arith.addf %104, %103 : vector<1x8xf32>
    %106 = arith.divf %104, %105 : vector<1x8xf32>
    %107 = arith.mulf %51, %106 : vector<1x8xf32>
    %cst_35 = arith.constant 1.000000e+00 : f32
    %108 = vector.broadcast %cst_35 : f32 to vector<1x8xf32>
    %109 = arith.subf %108, %106 : vector<1x8xf32>
    %110 = arith.mulf %51, %109 : vector<1x8xf32>
    %c1 = arith.constant 1 : index
    %c0_36 = arith.constant 0 : index
    %111 = vector.load %arg2[%c1, %c0_36] : memref<8x8xf32, #tpu.memory_space<vmem>>, vector<1x8xf32>
    %112 = arith.cmpf olt, %111, %106 : vector<1x8xf32>
    %113 = arith.extui %112 : vector<1x8xi1> to vector<1x8xi32>
    %114 = arith.sitofp %113 : vector<1x8xi32> to vector<1x8xf32>
    %cst_37 = arith.constant 1.000000e+00 : f32
    %115 = vector.broadcast %cst_37 : f32 to vector<1x8xf32>
    %116 = arith.subf %115, %71 : vector<1x8xf32>
    %117 = arith.mulf %114, %116 : vector<1x8xf32>
    %c1_38 = arith.constant 1 : index
    %c0_39 = arith.constant 0 : index
    %118 = vector.load %arg8[%c1_38, %c0_39] : memref<8x8xf32, #tpu.memory_space<vmem>>, vector<1x8xf32>
    tpu.vector_store %arg8[%c1_38, %c0_39], %107 {strides = array<i32>} : memref<8x8xf32, #tpu.memory_space<vmem>>, vector<1x8xf32>,
    %c1_40 = arith.constant 1 : index
    %c0_41 = arith.constant 0 : index
    %119 = vector.load %arg9[%c1_40, %c0_41] : memref<8x8xf32, #tpu.memory_space<vmem>>, vector<1x8xf32>
    tpu.vector_store %arg9[%c1_40, %c0_41], %100 {strides = array<i32>} : memref<8x8xf32, #tpu.memory_space<vmem>>, vector<1x8xf32>,
    %cst_42 = arith.constant 1.000000e+00 : f32
    %120 = vector.broadcast %cst_42 : f32 to vector<1x8xf32>
    %121 = arith.subf %120, %117 : vector<1x8xf32>
    %122 = arith.mulf %65, %121 : vector<1x8xf32>
    %123 = arith.mulf %107, %117 : vector<1x8xf32>
    %124 = arith.addf %122, %123 : vector<1x8xf32>
    %cst_43 = arith.constant 1.000000e+00 : f32
    %125 = vector.broadcast %cst_43 : f32 to vector<1x8xf32>
    %126 = arith.subf %125, %117 : vector<1x8xf32>
    %127 = arith.mulf %70, %126 : vector<1x8xf32>
    %128 = arith.mulf %100, %117 : vector<1x8xf32>
    %129 = arith.addf %127, %128 : vector<1x8xf32>
    %130 = arith.addf %71, %117 : vector<1x8xf32>
    %131 = vector.extract_strided_slice %97 {offsets = [0, 0], sizes = [32, 8], strides = [1, 1]} : vector<98x8xf32> to vector<32x8xf32>
    %132 = arith.addf %8, %131 : vector<32x8xf32>
    %133 = arith.negf %132 : vector<32x8xf32>
    %134 = math.exp %133 : vector<32x8xf32>
    %cst_44 = arith.constant 1.000000e+00 : f32
    %135 = vector.broadcast %cst_44 : f32 to vector<32x8xf32>
    %136 = arith.addf %135, %134 : vector<32x8xf32>
    %137 = arith.divf %135, %136 : vector<32x8xf32>
    %138 = vector.extract_strided_slice %97 {offsets = [32, 0], sizes = [32, 8], strides = [1, 1]} : vector<98x8xf32> to vector<32x8xf32>
    %139 = arith.addf %9, %138 : vector<32x8xf32>
    %140 = arith.negf %139 : vector<32x8xf32>
    %141 = math.exp %140 : vector<32x8xf32>
    %cst_45 = arith.constant 1.000000e+00 : f32
    %142 = vector.broadcast %cst_45 : f32 to vector<32x8xf32>
    %143 = arith.addf %142, %141 : vector<32x8xf32>
    %144 = arith.divf %142, %143 : vector<32x8xf32>
    %145 = vector.extract_strided_slice %97 {offsets = [64, 0], sizes = [32, 8], strides = [1, 1]} : vector<98x8xf32> to vector<32x8xf32>
    %146 = arith.addf %145, %13 : vector<32x8xf32>
    %147 = arith.mulf %137, %146 : vector<32x8xf32>
    %148 = arith.addf %10, %147 : vector<32x8xf32>
    %149 = math.tanh %148 : vector<32x8xf32>
    %cst_46 = arith.constant 1.000000e+00 : f32
    %150 = vector.broadcast %cst_46 : f32 to vector<32x8xf32>
    %151 = arith.subf %150, %144 : vector<32x8xf32>
    %152 = arith.mulf %151, %149 : vector<32x8xf32>
    %153 = arith.mulf %144, %95 : vector<32x8xf32>
    %154 = arith.addf %152, %153 : vector<32x8xf32>
    %155 = arith.truncf %154 : vector<32x8xf32> to vector<32x8xbf16>
    %cst_47 = arith.constant dense<0.000000e+00> : vector<98x8xf32>
    %156 = tpu.matmul %0, %155, %cst_47 {dimension_numbers = #tpu.dot_dimension_numbers<[1], [0], [0], [1], [0, 0, 1, 1], [], []>} : vector<98x32xbf16>, vector<32x8xbf16>, vector<98x8xf32> -> vector<98x8xf32>
    %157 = vector.extract_strided_slice %156 {offsets = [96, 0], sizes = [2, 8], strides = [1, 1]} : vector<98x8xf32> to vector<2x8xf32>
    %158 = arith.addf %157, %16 : vector<2x8xf32>
    %159 = vector.extract_strided_slice %158 {offsets = [0, 0], sizes = [1, 8], strides = [1, 1]} : vector<2x8xf32> to vector<1x8xf32>
    %160 = vector.extract_strided_slice %158 {offsets = [1, 0], sizes = [1, 8], strides = [1, 1]} : vector<2x8xf32> to vector<1x8xf32>
    %161 = arith.negf %160 : vector<1x8xf32>
    %162 = math.exp %161 : vector<1x8xf32>
    %cst_48 = arith.constant 1.000000e+00 : f32
    %163 = vector.broadcast %cst_48 : f32 to vector<1x8xf32>
    %164 = arith.addf %163, %162 : vector<1x8xf32>
    %165 = arith.divf %163, %164 : vector<1x8xf32>
    %166 = arith.mulf %110, %165 : vector<1x8xf32>
    %cst_49 = arith.constant 1.000000e+00 : f32
    %167 = vector.broadcast %cst_49 : f32 to vector<1x8xf32>
    %168 = arith.subf %167, %165 : vector<1x8xf32>
    %169 = arith.mulf %110, %168 : vector<1x8xf32>
    %c2 = arith.constant 2 : index
    %c0_50 = arith.constant 0 : index
    %170 = vector.load %arg2[%c2, %c0_50] : memref<8x8xf32, #tpu.memory_space<vmem>>, vector<1x8xf32>
    %171 = arith.cmpf olt, %170, %165 : vector<1x8xf32>
    %172 = arith.extui %171 : vector<1x8xi1> to vector<1x8xi32>
    %173 = arith.sitofp %172 : vector<1x8xi32> to vector<1x8xf32>
    %cst_51 = arith.constant 1.000000e+00 : f32
    %174 = vector.broadcast %cst_51 : f32 to vector<1x8xf32>
    %175 = arith.subf %174, %130 : vector<1x8xf32>
    %176 = arith.mulf %173, %175 : vector<1x8xf32>
    %c2_52 = arith.constant 2 : index
    %c0_53 = arith.constant 0 : index
    %177 = vector.load %arg8[%c2_52, %c0_53] : memref<8x8xf32, #tpu.memory_space<vmem>>, vector<1x8xf32>
    tpu.vector_store %arg8[%c2_52, %c0_53], %166 {strides = array<i32>} : memref<8x8xf32, #tpu.memory_space<vmem>>, vector<1x8xf32>,
    %c2_54 = arith.constant 2 : index
    %c0_55 = arith.constant 0 : index
    %178 = vector.load %arg9[%c2_54, %c0_55] : memref<8x8xf32, #tpu.memory_space<vmem>>, vector<1x8xf32>
    tpu.vector_store %arg9[%c2_54, %c0_55], %159 {strides = array<i32>} : memref<8x8xf32, #tpu.memory_space<vmem>>, vector<1x8xf32>,
    %cst_56 = arith.constant 1.000000e+00 : f32
    %179 = vector.broadcast %cst_56 : f32 to vector<1x8xf32>
    %180 = arith.subf %179, %176 : vector<1x8xf32>
    %181 = arith.mulf %124, %180 : vector<1x8xf32>
    %182 = arith.mulf %166, %176 : vector<1x8xf32>
    %183 = arith.addf %181, %182 : vector<1x8xf32>
    %cst_57 = arith.constant 1.000000e+00 : f32
    %184 = vector.broadcast %cst_57 : f32 to vector<1x8xf32>
    %185 = arith.subf %184, %176 : vector<1x8xf32>
    %186 = arith.mulf %129, %185 : vector<1x8xf32>
    %187 = arith.mulf %159, %176 : vector<1x8xf32>
    %188 = arith.addf %186, %187 : vector<1x8xf32>
    %189 = arith.addf %130, %176 : vector<1x8xf32>
    %190 = vector.extract_strided_slice %156 {offsets = [0, 0], sizes = [32, 8], strides = [1, 1]} : vector<98x8xf32> to vector<32x8xf32>
    %191 = arith.addf %8, %190 : vector<32x8xf32>
    %192 = arith.negf %191 : vector<32x8xf32>
    %193 = math.exp %192 : vector<32x8xf32>
    %cst_58 = arith.constant 1.000000e+00 : f32
    %194 = vector.broadcast %cst_58 : f32 to vector<32x8xf32>
    %195 = arith.addf %194, %193 : vector<32x8xf32>
    %196 = arith.divf %194, %195 : vector<32x8xf32>
    %197 = vector.extract_strided_slice %156 {offsets = [32, 0], sizes = [32, 8], strides = [1, 1]} : vector<98x8xf32> to vector<32x8xf32>
    %198 = arith.addf %9, %197 : vector<32x8xf32>
    %199 = arith.negf %198 : vector<32x8xf32>
    %200 = math.exp %199 : vector<32x8xf32>
    %cst_59 = arith.constant 1.000000e+00 : f32
    %201 = vector.broadcast %cst_59 : f32 to vector<32x8xf32>
    %202 = arith.addf %201, %200 : vector<32x8xf32>
    %203 = arith.divf %201, %202 : vector<32x8xf32>
    %204 = vector.extract_strided_slice %156 {offsets = [64, 0], sizes = [32, 8], strides = [1, 1]} : vector<98x8xf32> to vector<32x8xf32>
    %205 = arith.addf %204, %13 : vector<32x8xf32>
    %206 = arith.mulf %196, %205 : vector<32x8xf32>
    %207 = arith.addf %10, %206 : vector<32x8xf32>
    %208 = math.tanh %207 : vector<32x8xf32>
    %cst_60 = arith.constant 1.000000e+00 : f32
    %209 = vector.broadcast %cst_60 : f32 to vector<32x8xf32>
    %210 = arith.subf %209, %203 : vector<32x8xf32>
    %211 = arith.mulf %210, %208 : vector<32x8xf32>
    %212 = arith.mulf %203, %154 : vector<32x8xf32>
    %213 = arith.addf %211, %212 : vector<32x8xf32>
    %214 = arith.truncf %213 : vector<32x8xf32> to vector<32x8xbf16>
    %cst_61 = arith.constant dense<0.000000e+00> : vector<98x8xf32>
    %215 = tpu.matmul %0, %214, %cst_61 {dimension_numbers = #tpu.dot_dimension_numbers<[1], [0], [0], [1], [0, 0, 1, 1], [], []>} : vector<98x32xbf16>, vector<32x8xbf16>, vector<98x8xf32> -> vector<98x8xf32>
    %216 = vector.extract_strided_slice %215 {offsets = [96, 0], sizes = [2, 8], strides = [1, 1]} : vector<98x8xf32> to vector<2x8xf32>
    %217 = arith.addf %216, %16 : vector<2x8xf32>
    %218 = vector.extract_strided_slice %217 {offsets = [0, 0], sizes = [1, 8], strides = [1, 1]} : vector<2x8xf32> to vector<1x8xf32>
    %219 = vector.extract_strided_slice %217 {offsets = [1, 0], sizes = [1, 8], strides = [1, 1]} : vector<2x8xf32> to vector<1x8xf32>
    %220 = arith.negf %219 : vector<1x8xf32>
    %221 = math.exp %220 : vector<1x8xf32>
    %cst_62 = arith.constant 1.000000e+00 : f32
    %222 = vector.broadcast %cst_62 : f32 to vector<1x8xf32>
    %223 = arith.addf %222, %221 : vector<1x8xf32>
    %224 = arith.divf %222, %223 : vector<1x8xf32>
    %225 = arith.mulf %169, %224 : vector<1x8xf32>
    %cst_63 = arith.constant 1.000000e+00 : f32
    %226 = vector.broadcast %cst_63 : f32 to vector<1x8xf32>
    %227 = arith.subf %226, %224 : vector<1x8xf32>
    %228 = arith.mulf %169, %227 : vector<1x8xf32>
    %c3 = arith.constant 3 : index
    %c0_64 = arith.constant 0 : index
    %229 = vector.load %arg2[%c3, %c0_64] : memref<8x8xf32, #tpu.memory_space<vmem>>, vector<1x8xf32>
    %230 = arith.cmpf olt, %229, %224 : vector<1x8xf32>
    %231 = arith.extui %230 : vector<1x8xi1> to vector<1x8xi32>
    %232 = arith.sitofp %231 : vector<1x8xi32> to vector<1x8xf32>
    %cst_65 = arith.constant 1.000000e+00 : f32
    %233 = vector.broadcast %cst_65 : f32 to vector<1x8xf32>
    %234 = arith.subf %233, %189 : vector<1x8xf32>
    %235 = arith.mulf %232, %234 : vector<1x8xf32>
    %c3_66 = arith.constant 3 : index
    %c0_67 = arith.constant 0 : index
    %236 = vector.load %arg8[%c3_66, %c0_67] : memref<8x8xf32, #tpu.memory_space<vmem>>, vector<1x8xf32>
    tpu.vector_store %arg8[%c3_66, %c0_67], %225 {strides = array<i32>} : memref<8x8xf32, #tpu.memory_space<vmem>>, vector<1x8xf32>,
    %c3_68 = arith.constant 3 : index
    %c0_69 = arith.constant 0 : index
    %237 = vector.load %arg9[%c3_68, %c0_69] : memref<8x8xf32, #tpu.memory_space<vmem>>, vector<1x8xf32>
    tpu.vector_store %arg9[%c3_68, %c0_69], %218 {strides = array<i32>} : memref<8x8xf32, #tpu.memory_space<vmem>>, vector<1x8xf32>,
    %cst_70 = arith.constant 1.000000e+00 : f32
    %238 = vector.broadcast %cst_70 : f32 to vector<1x8xf32>
    %239 = arith.subf %238, %235 : vector<1x8xf32>
    %240 = arith.mulf %183, %239 : vector<1x8xf32>
    %241 = arith.mulf %225, %235 : vector<1x8xf32>
    %242 = arith.addf %240, %241 : vector<1x8xf32>
    %cst_71 = arith.constant 1.000000e+00 : f32
    %243 = vector.broadcast %cst_71 : f32 to vector<1x8xf32>
    %244 = arith.subf %243, %235 : vector<1x8xf32>
    %245 = arith.mulf %188, %244 : vector<1x8xf32>
    %246 = arith.mulf %218, %235 : vector<1x8xf32>
    %247 = arith.addf %245, %246 : vector<1x8xf32>
    %248 = arith.addf %189, %235 : vector<1x8xf32>
    %249 = vector.extract_strided_slice %215 {offsets = [0, 0], sizes = [32, 8], strides = [1, 1]} : vector<98x8xf32> to vector<32x8xf32>
    %250 = arith.addf %8, %249 : vector<32x8xf32>
    %251 = arith.negf %250 : vector<32x8xf32>
    %252 = math.exp %251 : vector<32x8xf32>
    %cst_72 = arith.constant 1.000000e+00 : f32
    %253 = vector.broadcast %cst_72 : f32 to vector<32x8xf32>
    %254 = arith.addf %253, %252 : vector<32x8xf32>
    %255 = arith.divf %253, %254 : vector<32x8xf32>
    %256 = vector.extract_strided_slice %215 {offsets = [32, 0], sizes = [32, 8], strides = [1, 1]} : vector<98x8xf32> to vector<32x8xf32>
    %257 = arith.addf %9, %256 : vector<32x8xf32>
    %258 = arith.negf %257 : vector<32x8xf32>
    %259 = math.exp %258 : vector<32x8xf32>
    %cst_73 = arith.constant 1.000000e+00 : f32
    %260 = vector.broadcast %cst_73 : f32 to vector<32x8xf32>
    %261 = arith.addf %260, %259 : vector<32x8xf32>
    %262 = arith.divf %260, %261 : vector<32x8xf32>
    %263 = vector.extract_strided_slice %215 {offsets = [64, 0], sizes = [32, 8], strides = [1, 1]} : vector<98x8xf32> to vector<32x8xf32>
    %264 = arith.addf %263, %13 : vector<32x8xf32>
    %265 = arith.mulf %255, %264 : vector<32x8xf32>
    %266 = arith.addf %10, %265 : vector<32x8xf32>
    %267 = math.tanh %266 : vector<32x8xf32>
    %cst_74 = arith.constant 1.000000e+00 : f32
    %268 = vector.broadcast %cst_74 : f32 to vector<32x8xf32>
    %269 = arith.subf %268, %262 : vector<32x8xf32>
    %270 = arith.mulf %269, %267 : vector<32x8xf32>
    %271 = arith.mulf %262, %213 : vector<32x8xf32>
    %272 = arith.addf %270, %271 : vector<32x8xf32>
    %273 = arith.truncf %272 : vector<32x8xf32> to vector<32x8xbf16>
    %cst_75 = arith.constant dense<0.000000e+00> : vector<98x8xf32>
    %274 = tpu.matmul %0, %273, %cst_75 {dimension_numbers = #tpu.dot_dimension_numbers<[1], [0], [0], [1], [0, 0, 1, 1], [], []>} : vector<98x32xbf16>, vector<32x8xbf16>, vector<98x8xf32> -> vector<98x8xf32>
    %275 = vector.extract_strided_slice %274 {offsets = [96, 0], sizes = [2, 8], strides = [1, 1]} : vector<98x8xf32> to vector<2x8xf32>
    %276 = arith.addf %275, %16 : vector<2x8xf32>
    %277 = vector.extract_strided_slice %276 {offsets = [0, 0], sizes = [1, 8], strides = [1, 1]} : vector<2x8xf32> to vector<1x8xf32>
    %278 = vector.extract_strided_slice %276 {offsets = [1, 0], sizes = [1, 8], strides = [1, 1]} : vector<2x8xf32> to vector<1x8xf32>
    %279 = arith.negf %278 : vector<1x8xf32>
    %280 = math.exp %279 : vector<1x8xf32>
    %cst_76 = arith.constant 1.000000e+00 : f32
    %281 = vector.broadcast %cst_76 : f32 to vector<1x8xf32>
    %282 = arith.addf %281, %280 : vector<1x8xf32>
    %283 = arith.divf %281, %282 : vector<1x8xf32>
    %284 = arith.mulf %228, %283 : vector<1x8xf32>
    %cst_77 = arith.constant 1.000000e+00 : f32
    %285 = vector.broadcast %cst_77 : f32 to vector<1x8xf32>
    %286 = arith.subf %285, %283 : vector<1x8xf32>
    %287 = arith.mulf %228, %286 : vector<1x8xf32>
    %c4 = arith.constant 4 : index
    %c0_78 = arith.constant 0 : index
    %288 = vector.load %arg2[%c4, %c0_78] : memref<8x8xf32, #tpu.memory_space<vmem>>, vector<1x8xf32>
    %289 = arith.cmpf olt, %288, %283 : vector<1x8xf32>
    %290 = arith.extui %289 : vector<1x8xi1> to vector<1x8xi32>
    %291 = arith.sitofp %290 : vector<1x8xi32> to vector<1x8xf32>
    %cst_79 = arith.constant 1.000000e+00 : f32
    %292 = vector.broadcast %cst_79 : f32 to vector<1x8xf32>
    %293 = arith.subf %292, %248 : vector<1x8xf32>
    %294 = arith.mulf %291, %293 : vector<1x8xf32>
    %c4_80 = arith.constant 4 : index
    %c0_81 = arith.constant 0 : index
    %295 = vector.load %arg8[%c4_80, %c0_81] : memref<8x8xf32, #tpu.memory_space<vmem>>, vector<1x8xf32>
    tpu.vector_store %arg8[%c4_80, %c0_81], %284 {strides = array<i32>} : memref<8x8xf32, #tpu.memory_space<vmem>>, vector<1x8xf32>,
    %c4_82 = arith.constant 4 : index
    %c0_83 = arith.constant 0 : index
    %296 = vector.load %arg9[%c4_82, %c0_83] : memref<8x8xf32, #tpu.memory_space<vmem>>, vector<1x8xf32>
    tpu.vector_store %arg9[%c4_82, %c0_83], %277 {strides = array<i32>} : memref<8x8xf32, #tpu.memory_space<vmem>>, vector<1x8xf32>,
    %cst_84 = arith.constant 1.000000e+00 : f32
    %297 = vector.broadcast %cst_84 : f32 to vector<1x8xf32>
    %298 = arith.subf %297, %294 : vector<1x8xf32>
    %299 = arith.mulf %242, %298 : vector<1x8xf32>
    %300 = arith.mulf %284, %294 : vector<1x8xf32>
    %301 = arith.addf %299, %300 : vector<1x8xf32>
    %cst_85 = arith.constant 1.000000e+00 : f32
    %302 = vector.broadcast %cst_85 : f32 to vector<1x8xf32>
    %303 = arith.subf %302, %294 : vector<1x8xf32>
    %304 = arith.mulf %247, %303 : vector<1x8xf32>
    %305 = arith.mulf %277, %294 : vector<1x8xf32>
    %306 = arith.addf %304, %305 : vector<1x8xf32>
    %307 = arith.addf %248, %294 : vector<1x8xf32>
    %308 = vector.extract_strided_slice %274 {offsets = [0, 0], sizes = [32, 8], strides = [1, 1]} : vector<98x8xf32> to vector<32x8xf32>
    %309 = arith.addf %8, %308 : vector<32x8xf32>
    %310 = arith.negf %309 : vector<32x8xf32>
    %311 = math.exp %310 : vector<32x8xf32>
    %cst_86 = arith.constant 1.000000e+00 : f32
    %312 = vector.broadcast %cst_86 : f32 to vector<32x8xf32>
    %313 = arith.addf %312, %311 : vector<32x8xf32>
    %314 = arith.divf %312, %313 : vector<32x8xf32>
    %315 = vector.extract_strided_slice %274 {offsets = [32, 0], sizes = [32, 8], strides = [1, 1]} : vector<98x8xf32> to vector<32x8xf32>
    %316 = arith.addf %9, %315 : vector<32x8xf32>
    %317 = arith.negf %316 : vector<32x8xf32>
    %318 = math.exp %317 : vector<32x8xf32>
    %cst_87 = arith.constant 1.000000e+00 : f32
    %319 = vector.broadcast %cst_87 : f32 to vector<32x8xf32>
    %320 = arith.addf %319, %318 : vector<32x8xf32>
    %321 = arith.divf %319, %320 : vector<32x8xf32>
    %322 = vector.extract_strided_slice %274 {offsets = [64, 0], sizes = [32, 8], strides = [1, 1]} : vector<98x8xf32> to vector<32x8xf32>
    %323 = arith.addf %322, %13 : vector<32x8xf32>
    %324 = arith.mulf %314, %323 : vector<32x8xf32>
    %325 = arith.addf %10, %324 : vector<32x8xf32>
    %326 = math.tanh %325 : vector<32x8xf32>
    %cst_88 = arith.constant 1.000000e+00 : f32
    %327 = vector.broadcast %cst_88 : f32 to vector<32x8xf32>
    %328 = arith.subf %327, %321 : vector<32x8xf32>
    %329 = arith.mulf %328, %326 : vector<32x8xf32>
    %330 = arith.mulf %321, %272 : vector<32x8xf32>
    %331 = arith.addf %329, %330 : vector<32x8xf32>
    %332 = arith.truncf %331 : vector<32x8xf32> to vector<32x8xbf16>
    %cst_89 = arith.constant dense<0.000000e+00> : vector<98x8xf32>
    %333 = tpu.matmul %0, %332, %cst_89 {dimension_numbers = #tpu.dot_dimension_numbers<[1], [0], [0], [1], [0, 0, 1, 1], [], []>} : vector<98x32xbf16>, vector<32x8xbf16>, vector<98x8xf32> -> vector<98x8xf32>
    %334 = vector.extract_strided_slice %333 {offsets = [96, 0], sizes = [2, 8], strides = [1, 1]} : vector<98x8xf32> to vector<2x8xf32>
    %335 = arith.addf %334, %16 : vector<2x8xf32>
    %336 = vector.extract_strided_slice %335 {offsets = [0, 0], sizes = [1, 8], strides = [1, 1]} : vector<2x8xf32> to vector<1x8xf32>
    %337 = vector.extract_strided_slice %335 {offsets = [1, 0], sizes = [1, 8], strides = [1, 1]} : vector<2x8xf32> to vector<1x8xf32>
    %338 = arith.negf %337 : vector<1x8xf32>
    %339 = math.exp %338 : vector<1x8xf32>
    %cst_90 = arith.constant 1.000000e+00 : f32
    %340 = vector.broadcast %cst_90 : f32 to vector<1x8xf32>
    %341 = arith.addf %340, %339 : vector<1x8xf32>
    %342 = arith.divf %340, %341 : vector<1x8xf32>
    %343 = arith.mulf %287, %342 : vector<1x8xf32>
    %cst_91 = arith.constant 1.000000e+00 : f32
    %344 = vector.broadcast %cst_91 : f32 to vector<1x8xf32>
    %345 = arith.subf %344, %342 : vector<1x8xf32>
    %346 = arith.mulf %287, %345 : vector<1x8xf32>
    %c5 = arith.constant 5 : index
    %c0_92 = arith.constant 0 : index
    %347 = vector.load %arg2[%c5, %c0_92] : memref<8x8xf32, #tpu.memory_space<vmem>>, vector<1x8xf32>
    %348 = arith.cmpf olt, %347, %342 : vector<1x8xf32>
    %349 = arith.extui %348 : vector<1x8xi1> to vector<1x8xi32>
    %350 = arith.sitofp %349 : vector<1x8xi32> to vector<1x8xf32>
    %cst_93 = arith.constant 1.000000e+00 : f32
    %351 = vector.broadcast %cst_93 : f32 to vector<1x8xf32>
    %352 = arith.subf %351, %307 : vector<1x8xf32>
    %353 = arith.mulf %350, %352 : vector<1x8xf32>
    %c5_94 = arith.constant 5 : index
    %c0_95 = arith.constant 0 : index
    %354 = vector.load %arg8[%c5_94, %c0_95] : memref<8x8xf32, #tpu.memory_space<vmem>>, vector<1x8xf32>
    tpu.vector_store %arg8[%c5_94, %c0_95], %343 {strides = array<i32>} : memref<8x8xf32, #tpu.memory_space<vmem>>, vector<1x8xf32>,
    %c5_96 = arith.constant 5 : index
    %c0_97 = arith.constant 0 : index
    %355 = vector.load %arg9[%c5_96, %c0_97] : memref<8x8xf32, #tpu.memory_space<vmem>>, vector<1x8xf32>
    tpu.vector_store %arg9[%c5_96, %c0_97], %336 {strides = array<i32>} : memref<8x8xf32, #tpu.memory_space<vmem>>, vector<1x8xf32>,
    %cst_98 = arith.constant 1.000000e+00 : f32
    %356 = vector.broadcast %cst_98 : f32 to vector<1x8xf32>
    %357 = arith.subf %356, %353 : vector<1x8xf32>
    %358 = arith.mulf %301, %357 : vector<1x8xf32>
    %359 = arith.mulf %343, %353 : vector<1x8xf32>
    %360 = arith.addf %358, %359 : vector<1x8xf32>
    %cst_99 = arith.constant 1.000000e+00 : f32
    %361 = vector.broadcast %cst_99 : f32 to vector<1x8xf32>
    %362 = arith.subf %361, %353 : vector<1x8xf32>
    %363 = arith.mulf %306, %362 : vector<1x8xf32>
    %364 = arith.mulf %336, %353 : vector<1x8xf32>
    %365 = arith.addf %363, %364 : vector<1x8xf32>
    %366 = arith.addf %307, %353 : vector<1x8xf32>
    %367 = vector.extract_strided_slice %333 {offsets = [0, 0], sizes = [32, 8], strides = [1, 1]} : vector<98x8xf32> to vector<32x8xf32>
    %368 = arith.addf %8, %367 : vector<32x8xf32>
    %369 = arith.negf %368 : vector<32x8xf32>
    %370 = math.exp %369 : vector<32x8xf32>
    %cst_100 = arith.constant 1.000000e+00 : f32
    %371 = vector.broadcast %cst_100 : f32 to vector<32x8xf32>
    %372 = arith.addf %371, %370 : vector<32x8xf32>
    %373 = arith.divf %371, %372 : vector<32x8xf32>
    %374 = vector.extract_strided_slice %333 {offsets = [32, 0], sizes = [32, 8], strides = [1, 1]} : vector<98x8xf32> to vector<32x8xf32>
    %375 = arith.addf %9, %374 : vector<32x8xf32>
    %376 = arith.negf %375 : vector<32x8xf32>
    %377 = math.exp %376 : vector<32x8xf32>
    %cst_101 = arith.constant 1.000000e+00 : f32
    %378 = vector.broadcast %cst_101 : f32 to vector<32x8xf32>
    %379 = arith.addf %378, %377 : vector<32x8xf32>
    %380 = arith.divf %378, %379 : vector<32x8xf32>
    %381 = vector.extract_strided_slice %333 {offsets = [64, 0], sizes = [32, 8], strides = [1, 1]} : vector<98x8xf32> to vector<32x8xf32>
    %382 = arith.addf %381, %13 : vector<32x8xf32>
    %383 = arith.mulf %373, %382 : vector<32x8xf32>
    %384 = arith.addf %10, %383 : vector<32x8xf32>
    %385 = math.tanh %384 : vector<32x8xf32>
    %cst_102 = arith.constant 1.000000e+00 : f32
    %386 = vector.broadcast %cst_102 : f32 to vector<32x8xf32>
    %387 = arith.subf %386, %380 : vector<32x8xf32>
    %388 = arith.mulf %387, %385 : vector<32x8xf32>
    %389 = arith.mulf %380, %331 : vector<32x8xf32>
    %390 = arith.addf %388, %389 : vector<32x8xf32>
    %391 = arith.truncf %390 : vector<32x8xf32> to vector<32x8xbf16>
    %cst_103 = arith.constant dense<0.000000e+00> : vector<98x8xf32>
    %392 = tpu.matmul %0, %391, %cst_103 {dimension_numbers = #tpu.dot_dimension_numbers<[1], [0], [0], [1], [0, 0, 1, 1], [], []>} : vector<98x32xbf16>, vector<32x8xbf16>, vector<98x8xf32> -> vector<98x8xf32>
    %393 = vector.extract_strided_slice %392 {offsets = [96, 0], sizes = [2, 8], strides = [1, 1]} : vector<98x8xf32> to vector<2x8xf32>
    %394 = arith.addf %393, %16 : vector<2x8xf32>
    %395 = vector.extract_strided_slice %394 {offsets = [0, 0], sizes = [1, 8], strides = [1, 1]} : vector<2x8xf32> to vector<1x8xf32>
    %396 = vector.extract_strided_slice %394 {offsets = [1, 0], sizes = [1, 8], strides = [1, 1]} : vector<2x8xf32> to vector<1x8xf32>
    %397 = arith.negf %396 : vector<1x8xf32>
    %398 = math.exp %397 : vector<1x8xf32>
    %cst_104 = arith.constant 1.000000e+00 : f32
    %399 = vector.broadcast %cst_104 : f32 to vector<1x8xf32>
    %400 = arith.addf %399, %398 : vector<1x8xf32>
    %401 = arith.divf %399, %400 : vector<1x8xf32>
    %402 = arith.mulf %346, %401 : vector<1x8xf32>
    %cst_105 = arith.constant 1.000000e+00 : f32
    %403 = vector.broadcast %cst_105 : f32 to vector<1x8xf32>
    %404 = arith.subf %403, %401 : vector<1x8xf32>
    %405 = arith.mulf %346, %404 : vector<1x8xf32>
    %c6 = arith.constant 6 : index
    %c0_106 = arith.constant 0 : index
    %406 = vector.load %arg2[%c6, %c0_106] : memref<8x8xf32, #tpu.memory_space<vmem>>, vector<1x8xf32>
    %407 = arith.cmpf olt, %406, %401 : vector<1x8xf32>
    %408 = arith.extui %407 : vector<1x8xi1> to vector<1x8xi32>
    %409 = arith.sitofp %408 : vector<1x8xi32> to vector<1x8xf32>
    %cst_107 = arith.constant 1.000000e+00 : f32
    %410 = vector.broadcast %cst_107 : f32 to vector<1x8xf32>
    %411 = arith.subf %410, %366 : vector<1x8xf32>
    %412 = arith.mulf %409, %411 : vector<1x8xf32>
    %c6_108 = arith.constant 6 : index
    %c0_109 = arith.constant 0 : index
    %413 = vector.load %arg8[%c6_108, %c0_109] : memref<8x8xf32, #tpu.memory_space<vmem>>, vector<1x8xf32>
    tpu.vector_store %arg8[%c6_108, %c0_109], %402 {strides = array<i32>} : memref<8x8xf32, #tpu.memory_space<vmem>>, vector<1x8xf32>,
    %c6_110 = arith.constant 6 : index
    %c0_111 = arith.constant 0 : index
    %414 = vector.load %arg9[%c6_110, %c0_111] : memref<8x8xf32, #tpu.memory_space<vmem>>, vector<1x8xf32>
    tpu.vector_store %arg9[%c6_110, %c0_111], %395 {strides = array<i32>} : memref<8x8xf32, #tpu.memory_space<vmem>>, vector<1x8xf32>,
    %cst_112 = arith.constant 1.000000e+00 : f32
    %415 = vector.broadcast %cst_112 : f32 to vector<1x8xf32>
    %416 = arith.subf %415, %412 : vector<1x8xf32>
    %417 = arith.mulf %360, %416 : vector<1x8xf32>
    %418 = arith.mulf %402, %412 : vector<1x8xf32>
    %419 = arith.addf %417, %418 : vector<1x8xf32>
    %cst_113 = arith.constant 1.000000e+00 : f32
    %420 = vector.broadcast %cst_113 : f32 to vector<1x8xf32>
    %421 = arith.subf %420, %412 : vector<1x8xf32>
    %422 = arith.mulf %365, %421 : vector<1x8xf32>
    %423 = arith.mulf %395, %412 : vector<1x8xf32>
    %424 = arith.addf %422, %423 : vector<1x8xf32>
    %425 = arith.addf %366, %412 : vector<1x8xf32>
    %426 = vector.extract_strided_slice %392 {offsets = [0, 0], sizes = [32, 8], strides = [1, 1]} : vector<98x8xf32> to vector<32x8xf32>
    %427 = arith.addf %8, %426 : vector<32x8xf32>
    %428 = arith.negf %427 : vector<32x8xf32>
    %429 = math.exp %428 : vector<32x8xf32>
    %cst_114 = arith.constant 1.000000e+00 : f32
    %430 = vector.broadcast %cst_114 : f32 to vector<32x8xf32>
    %431 = arith.addf %430, %429 : vector<32x8xf32>
    %432 = arith.divf %430, %431 : vector<32x8xf32>
    %433 = vector.extract_strided_slice %392 {offsets = [32, 0], sizes = [32, 8], strides = [1, 1]} : vector<98x8xf32> to vector<32x8xf32>
    %434 = arith.addf %9, %433 : vector<32x8xf32>
    %435 = arith.negf %434 : vector<32x8xf32>
    %436 = math.exp %435 : vector<32x8xf32>
    %cst_115 = arith.constant 1.000000e+00 : f32
    %437 = vector.broadcast %cst_115 : f32 to vector<32x8xf32>
    %438 = arith.addf %437, %436 : vector<32x8xf32>
    %439 = arith.divf %437, %438 : vector<32x8xf32>
    %440 = vector.extract_strided_slice %392 {offsets = [64, 0], sizes = [32, 8], strides = [1, 1]} : vector<98x8xf32> to vector<32x8xf32>
    %441 = arith.addf %440, %13 : vector<32x8xf32>
    %442 = arith.mulf %432, %441 : vector<32x8xf32>
    %443 = arith.addf %10, %442 : vector<32x8xf32>
    %444 = math.tanh %443 : vector<32x8xf32>
    %cst_116 = arith.constant 1.000000e+00 : f32
    %445 = vector.broadcast %cst_116 : f32 to vector<32x8xf32>
    %446 = arith.subf %445, %439 : vector<32x8xf32>
    %447 = arith.mulf %446, %444 : vector<32x8xf32>
    %448 = arith.mulf %439, %390 : vector<32x8xf32>
    %449 = arith.addf %447, %448 : vector<32x8xf32>
    %450 = arith.truncf %449 : vector<32x8xf32> to vector<32x8xbf16>
    %cst_117 = arith.constant dense<0.000000e+00> : vector<98x8xf32>
    %451 = tpu.matmul %0, %450, %cst_117 {dimension_numbers = #tpu.dot_dimension_numbers<[1], [0], [0], [1], [0, 0, 1, 1], [], []>} : vector<98x32xbf16>, vector<32x8xbf16>, vector<98x8xf32> -> vector<98x8xf32>
    %452 = vector.extract_strided_slice %451 {offsets = [96, 0], sizes = [2, 8], strides = [1, 1]} : vector<98x8xf32> to vector<2x8xf32>
    %453 = arith.addf %452, %16 : vector<2x8xf32>
    %454 = vector.extract_strided_slice %453 {offsets = [0, 0], sizes = [1, 8], strides = [1, 1]} : vector<2x8xf32> to vector<1x8xf32>
    %cst_118 = arith.constant 1.000000e+00 : f32
    %455 = vector.broadcast %cst_118 : f32 to vector<1x8xf32>
    %456 = arith.mulf %405, %455 : vector<1x8xf32>
    %c7 = arith.constant 7 : index
    %c0_119 = arith.constant 0 : index
    %457 = vector.load %arg2[%c7, %c0_119] : memref<8x8xf32, #tpu.memory_space<vmem>>, vector<1x8xf32>
    %458 = arith.cmpf olt, %457, %455 : vector<1x8xf32>
    %459 = arith.extui %458 : vector<1x8xi1> to vector<1x8xi32>
    %460 = arith.sitofp %459 : vector<1x8xi32> to vector<1x8xf32>
    %cst_120 = arith.constant 1.000000e+00 : f32
    %461 = vector.broadcast %cst_120 : f32 to vector<1x8xf32>
    %462 = arith.subf %461, %425 : vector<1x8xf32>
    %463 = arith.mulf %460, %462 : vector<1x8xf32>
    %c7_121 = arith.constant 7 : index
    %c0_122 = arith.constant 0 : index
    %464 = vector.load %arg8[%c7_121, %c0_122] : memref<8x8xf32, #tpu.memory_space<vmem>>, vector<1x8xf32>
    tpu.vector_store %arg8[%c7_121, %c0_122], %456 {strides = array<i32>} : memref<8x8xf32, #tpu.memory_space<vmem>>, vector<1x8xf32>,
    %c7_123 = arith.constant 7 : index
    %c0_124 = arith.constant 0 : index
    %465 = vector.load %arg9[%c7_123, %c0_124] : memref<8x8xf32, #tpu.memory_space<vmem>>, vector<1x8xf32>
    tpu.vector_store %arg9[%c7_123, %c0_124], %454 {strides = array<i32>} : memref<8x8xf32, #tpu.memory_space<vmem>>, vector<1x8xf32>,
    %cst_125 = arith.constant 1.000000e+00 : f32
    %466 = vector.broadcast %cst_125 : f32 to vector<1x8xf32>
    %467 = arith.subf %466, %463 : vector<1x8xf32>
    %468 = arith.mulf %419, %467 : vector<1x8xf32>
    %469 = arith.mulf %456, %463 : vector<1x8xf32>
    %470 = arith.addf %468, %469 : vector<1x8xf32>
    %cst_126 = arith.constant 1.000000e+00 : f32
    %471 = vector.broadcast %cst_126 : f32 to vector<1x8xf32>
    %472 = arith.subf %471, %463 : vector<1x8xf32>
    %473 = arith.mulf %424, %472 : vector<1x8xf32>
    %474 = arith.mulf %454, %463 : vector<1x8xf32>
    %475 = arith.addf %473, %474 : vector<1x8xf32>
    %c0_127 = arith.constant 0 : index
    %c0_128 = arith.constant 0 : index
    %476 = vector.load %arg10[%c0_127, %c0_128] : memref<1x8xf32, #tpu.memory_space<vmem>>, vector<1x8xf32>
    tpu.vector_store %arg10[%c0_127, %c0_128], %470 {strides = array<i32>} : memref<1x8xf32, #tpu.memory_space<vmem>>, vector<1x8xf32>,
    %c0_129 = arith.constant 0 : index
    %c0_130 = arith.constant 0 : index
    %477 = vector.load %arg11[%c0_129, %c0_130] : memref<1x8xf32, #tpu.memory_space<vmem>>, vector<1x8xf32>
    tpu.vector_store %arg11[%c0_129, %c0_130], %475 {strides = array<i32>} : memref<1x8xf32, #tpu.memory_space<vmem>>, vector<1x8xf32>,
    return
  }
  func.func @transform_0(%arg0: i32) -> (i32, i32) {
    %c0_i32 = arith.constant 0 : i32
    %c0_i32_0 = arith.constant 0 : i32
    return %c0_i32, %arg0 : i32, i32
  }
  func.func @transform_1(%arg0: i32) -> (i32, i32) {
    %c0_i32 = arith.constant 0 : i32
    %c0_i32_0 = arith.constant 0 : i32
    return %c0_i32, %arg0 : i32, i32
  }
  func.func @transform_2(%arg0: i32) -> (i32, i32) {
    %c0_i32 = arith.constant 0 : i32
    %c0_i32_0 = arith.constant 0 : i32
    %c0_i32_1 = arith.constant 0 : i32
    return %c0_i32, %c0_i32_0 : i32, i32
  }
  func.func @transform_3(%arg0: i32) -> (i32, i32) {
    %c0_i32 = arith.constant 0 : i32
    %c0_i32_0 = arith.constant 0 : i32
    %c0_i32_1 = arith.constant 0 : i32
    return %c0_i32, %c0_i32_0 : i32, i32
  }
  func.func @transform_4(%arg0: i32) -> (i32, i32) {
    %c0_i32 = arith.constant 0 : i32
    %c0_i32_0 = arith.constant 0 : i32
    %c0_i32_1 = arith.constant 0 : i32
    return %c0_i32, %c0_i32_0 : i32, i32
  }
  func.func @transform_5(%arg0: i32) -> (i32, i32) {
    %c0_i32 = arith.constant 0 : i32
    %c0_i32_0 = arith.constant 0 : i32
    %c0_i32_1 = arith.constant 0 : i32
    return %c0_i32, %c0_i32_0 : i32, i32
  }
  func.func @transform_6(%arg0: i32) -> (i32, i32) {
    %c0_i32 = arith.constant 0 : i32
    %c0_i32_0 = arith.constant 0 : i32
    %c0_i32_1 = arith.constant 0 : i32
    return %c0_i32, %c0_i32_0 : i32, i32
  }
  func.func @transform_7(%arg0: i32) -> (i32, i32) {
    %c0_i32 = arith.constant 0 : i32
    %c0_i32_0 = arith.constant 0 : i32
    return %c0_i32, %arg0 : i32, i32
  }
  func.func @transform_8(%arg0: i32) -> (i32, i32) {
    %c0_i32 = arith.constant 0 : i32
    %c0_i32_0 = arith.constant 0 : i32
    return %c0_i32, %arg0 : i32, i32
  }
  func.func @transform_9(%arg0: i32) -> (i32, i32) {
    %c0_i32 = arith.constant 0 : i32
    %c0_i32_0 = arith.constant 0 : i32
    return %c0_i32, %arg0 : i32, i32
  }
  func.func @transform_10(%arg0: i32) -> (i32, i32) {
    %c0_i32 = arith.constant 0 : i32
    %c0_i32_0 = arith.constant 0 : i32
    return %c0_i32, %arg0 : i32, i32
  }
}

</mosaic_0001>

<bundles_post_ra>
// kernel: tpu_custom_call.1
= control target key start
LH: loop header
LB: loop body
LE: loop exit
PB: predicated region body
PF: predicated region fallthrough
CT: control target
= control target key end

     0   :  { %16 = vsyncpa [#allocation3], 0  ;;  %s5630_s0 = inlined_call_operand.vmem [shape: f32[8,8], index: 0, kind: input, shape index: {}]   ;;  %s5631_s1 = inlined_call_operand.vmem [shape: f32[8,8], index: 1, kind: input, shape index: {}]   ;;  %s5632_s2 = inlined_call_operand.vmem [shape: bf16[96,8], index: 2, kind: input, shape index: {}]   ;;  %s5633_s3 = inlined_call_operand.vmem [shape: f32[96,1], index: 3, kind: input, shape index: {}]   ;;  %s5634_s4 = inlined_call_operand.vmem [shape: bf16[98,32], index: 4, kind: input, shape index: {}]   ;;  %s5635_s5 = inlined_call_operand.vmem [shape: f32[32,1], index: 5, kind: input, shape index: {}]   ;;  %s5636_s6 = inlined_call_operand.vmem [shape: f32[2,1], index: 6, kind: input, shape index: {}]   ;;  %s5637_s7 = inlined_call_operand.hbm [shape: f32[8,8], index: 7, kind: output, shape index: {0}]   ;;  %s5638_s8 = inlined_call_operand.hbm [shape: f32[8,8], index: 8, kind: output, shape index: {1}]   ;;  %s5639_s9 = inlined_call_operand.hbm [shape: f32[1,8], index: 9, kind: output, shape index: {2}]   ;;  %s5640_s10 = inlined_call_operand.hbm [shape: f32[1,8], index: 10, kind: output, shape index: {3}]  }
   0x1   :  { %17 = vsyncpa [#allocation5], 0  ;;  %v63_v0 = vld [vmem:[%s5633_s3 + $0x10] sm:$0xff]  ;;  %v61_v1 = vld [vmem:[%s5633_s3] sm:$0xff]  ;;  %vm182_vm0 = vcmask 1043456   ;;  %v3275_v3 = vmov 0  }
   0x2   :  { %v47_v2 = vld [vmem:[%s5630_s0] sm:$0xff]  ;;  %2805 = vset.pattern.permute.xlu1 %v3275_v3  ;;  %2804 = vset.pattern.permute.xlu0 %v3275_v3  ;;  %v2790_v7 = vld [vmem:[%s5632_s2 + $0x8] sm:$0xff]  ;;  %v67_v8 = vld [vmem:[%s5633_s3 + $0x30] sm:$0xff]  ;;  %vm163_vm1 = vcmask 64512  }
   0x3   :  { %v48_v4 = vpack.c.bf16 %v47_v2, %v47_v2  ;;  %85 = vperm.xlu0 %2804, %v63_v0   ;;  %75 = vperm.xlu1 %2805, %v61_v1   ;;  %v2789_v6 = vld [vmem:[%s5632_s2] sm:$0xff]  ;;  %v2792_v9 = vld [vmem:[%s5632_s2 + $0x18] sm:$0xff]  ;;  %v2794_v10 = vld [vmem:[%s5632_s2 + $0x28] sm:$0xff] }
   0x4   :  { %2806 = vset.pattern.permute.xlu2 %v3275_v3  ;;  %v64_v11 = vld [vmem:[%s5633_s3 + $0x18] sm:$0xff]  ;;  %v62_v12 = vld [vmem:[%s5633_s3 + $0x8] sm:$0xff] }
   0x5   :  { %v184_v5 = vsel %vm182_vm0, %v48_v4, 0  ;;  %105 = vperm.xlu2 %2806, %v67_v8  }
   0x6   :  { %193 = vmatpush.bf16.msra.mxu0 %v184_v5  ;;  %2795 = vmatpush.bf16.msra.mxu1 %v184_v5 }
   0x7   :  { %2796 = vmatpush.bf16.msra.mxu2 %v184_v5  ;;  %2797 = vmatpush.bf16.msra.mxu3 %v184_v5 }
   0x9   :  { %2618 = vmatmul.msk.bf16.vlgmr.msra.gmra.mxu0 %vm163_vm1, %v2789_v6  ;;  %2619 = vmatmul.msk.bf16.vlgmr.msra.gmra.mxu1 %vm163_vm1, %v2790_v7 }
   0xa   :  { %18 = vsyncpa [#allocation8], 0  ;;  %2621 = vmatmul.msk.bf16.vlgmr.msra.gmra.mxu2 %vm163_vm1, %v2792_v9  ;;  %2623 = vmatmul.msk.bf16.vlgmr.msra.gmra.mxu3 %vm163_vm1, %v2794_v10  ;;  %v68_v13 = vld [vmem:[%s5633_s3 + $0x38] sm:$0xff]  ;;  %v65_v14 = vld [vmem:[%s5633_s3 + $0x20] sm:$0xff]  ;;  %s2538_s11 = sshll.u32 %s5637_s7, 4  ;;  %s3278_s12 = smov [#allocation4]   ;;  %s2539_s11 = int_to_ptr.hbm [resolvable:$true] %s2538_s11 }
   0xb   :  { %90 = vperm.xlu0 %2804, %v64_v11   ;;  %80 = vperm.xlu1 %2805, %v62_v12   ;;  %v66_v15 = vld [vmem:[%s5633_s3 + $0x28] sm:$0xff]  ;;  %v2791_v16 = vld [vmem:[%s5632_s2 + $0x10] sm:$0xff]  ;;  %v2793_v18 = vld [vmem:[%s5632_s2 + $0x20] sm:$0xff]  ;;  %s2547_s13 = sshll.u32 %s3278_s12, 4  ;;  %s2549_s7 = sshll.u32 %s5638_s8, 4  ;;  %s2548_s13 = int_to_ptr.vmem [resolvable:$true] %s2547_s13  ;;  %s2550_s7 = int_to_ptr.hbm [resolvable:$true] %s2549_s7 }
   0xc   :  { %v71_v17 = vld [vmem:[%s5633_s3 + $0x50] sm:$0xff]  ;;  %v72_v19 = vld [vmem:[%s5633_s3 + $0x58] sm:$0xff]  ;;  %v69_v22 = vld [vmem:[%s5633_s3 + $0x40] sm:$0xff]  ;;  %s3279_s16 = smov [#allocation6]   ;;  %s3280_s18 = smov [#allocation7]  }
   0xd   :  { %110 = vperm.xlu2 %2806, %v68_v13   ;;  %v227_v20 = vld [vmem:[%s5635_s5 + $0x10] sm:$0xff]  ;;  %v228_v21 = vld [vmem:[%s5635_s5 + $0x18] sm:$0xff]  ;;  %v70_v23 = vld [vmem:[%s5633_s3 + $0x48] sm:$0xff]  ;;  %s2558_s17 = sshll.u32 %s3279_s16, 4  ;;  %s2569_s19 = sshll.u32 %s3280_s18, 4  ;;  %s2559_s17 = int_to_ptr.vmem [resolvable:$true] %s2558_s17  ;;  %s2570_s19 = int_to_ptr.vmem [resolvable:$true] %s2569_s19 }
   0xe   :  { %v225_v24 = vld [vmem:[%s5635_s5] sm:$0xff]  ;;  %v226_v25 = vld [vmem:[%s5635_s5 + $0x8] sm:$0xff]  ;;  %s2571_s22 = sshll.u32 %s5640_s10, 4  ;;  %s2572_s22 = int_to_ptr.hbm [resolvable:$true] %s2571_s22 }
   0xf   :  { %v249_v26 = vld [vmem:[%s5636_s6] sm:$0x3]  ;;  %s2560_s6 = sshll.u32 %s5639_s9, 4  ;;  %s2561_s6 = int_to_ptr.hbm [resolvable:$true] %s2560_s6 }
  0x13   :  { %95 = vperm.xlu0 %2804, %v65_v14   ;;  %100 = vperm.xlu1 %2805, %v66_v15  }
  0x15   :  { %125 = vperm.xlu2 %2806, %v71_v17  }
  0x19   :  { %2620 = vmatmul.msk.bf16.gmra.mxu1 %vm163_vm1, %v2791_v16 }
  0x1a   :  { %2622 = vmatmul.msk.bf16.gmra.mxu2 %vm163_vm1, %v2793_v18 }
  0x1b   :  { %130 = vperm.xlu0 %2804, %v72_v19   ;;  %241 = vperm.xlu1 %2805, %v227_v20  }
  0x1d   :  { %246 = vperm.xlu2 %2806, %v228_v21  }
  0x23   :  { %115 = vperm.xlu0 %2804, %v69_v22   ;;  %120 = vperm.xlu1 %2805, %v70_v23  }
  0x25   :  { %231 = vperm.xlu2 %2806, %v225_v24  }
  0x2b   :  { %236 = vperm.xlu0 %2804, %v226_v25   ;;  %252 = vperm.xlu1 %2805, %v249_v26  }
  0x5f   :  { %v106_v33 = vpop.permute.xlu2 %105 }
  0x67   :  { %v111_v51 = vpop.permute.xlu2 %110 }
  0x6f   :  { %v126_v6 = vpop.permute.xlu2 %125 }
  0x75   :  { %v86_v27 = vpop.permute.xlu0 %85  ;;  %v76_v28 = vpop.permute.xlu1 %75 }
  0x7d   :  { %v91_v36 = vpop.permute.xlu0 %90  ;;  %v81_v38 = vpop.permute.xlu1 %80 }
  0x85   :  { %v96_v53 = vpop.permute.xlu0 %95  ;;  %v101_v3 = vpop.permute.xlu1 %100 }
  0x86   :  { %v195_v29 = vpop.f32.mrf.mxu0  ;;  %v200_v30 = vpop.f32.mrf.mxu1 }
  0x87   :  { %v3414_v31 = vadd.f32 %v195_v29, %v76_v28  ;;  %v3416_v32 = vadd.f32 %v200_v30, %v86_v27 }
  0x89   :  { %5664 = vst [vmem:[#allocation12_spill] sm:$0xff] %v3414_v31  ;;  %v2626_v34 = vmul.f32 -1.442695, %v3416_v32  ;;  %v2624_v35 = vmul.f32 -1.442695, %v3414_v31 }
  0x8a   :  { %5665 = vst [vmem:[#allocation13_spill] sm:$0xff] %v3416_v32 }
  0x8b   :  { %2807 = vpow2.f32 %v2626_v34 }
  0x8c   :  { %2809 = vpow2.f32 %v2624_v35 }
  0x8d   :  { %v210_v37 = vpop.f32.mrf.mxu2  ;;  %v220_v49 = vpop.f32.mrf.mxu3 }
  0x8e   :  { %v3420_v39 = vadd.f32 %v210_v37, %v106_v33  ;;  %v197_v40 = vpop.f32.mrf.mxu0  ;;  %v202_v41 = vpop.f32.mrf.mxu1  ;;  %v3446_v9 = vadd.f32 %v220_v49, %v126_v6 }
  0x8f   :  { %v3422_v42 = vadd.f32 %v197_v40, %v81_v38  ;;  %v3424_v43 = vadd.f32 %v202_v41, %v91_v36  ;;  %v131_v10 = vpop.permute.xlu0 %130 }
  0x90   :  { %5666 = vst [vmem:[#allocation14_spill] sm:$0xff] %v3420_v39  ;;  %v2630_v44 = vmul.f32 -1.442695, %v3420_v39 }
  0x91   :  { %5667 = vst [vmem:[#allocation15_spill] sm:$0xff] %v3422_v42  ;;  %v2808_v45 = vpop.eup %2807  ;;  %v2627_v46 = vmul.f32 -1.442695, %v3424_v43  ;;  %v2625_v47 = vmul.f32 -1.442695, %v3422_v42 }
  0x92   :  { %5668 = vst [vmem:[#allocation16_spill] sm:$0xff] %v3424_v43  ;;  %2811 = vpow2.f32 %v2630_v44  ;;  %v2810_v48 = vpop.eup %2809  ;;  %v269_v50 = vadd.f32 1.0, %v2808_v45  ;;  %v3479_v44 = vpop.permute.xlu1 %241 }
  0x93   :  { %2813 = vpow2.f32 %v2627_v46  ;;  %v3429_v52 = vadd.f32 1.0, %v2810_v48 }
  0x94   :  { %2815 = vrcp.f32 %v269_v50  ;;  %v312_v5 = vand.u32 2147483648, %v269_v50  ;;  %vm306_vm2 = vweird.f32 %v269_v50  ;;  %v310_v17 = vand.u32 2147483647, %v269_v50 }
  0x95   :  { %v212_v54 = vpop.f32.mrf.mxu2  ;;  %2817 = vpow2.f32 %v2625_v47  ;;  %v222_v4 = vpop.f32.mrf.mxu3  ;;  %v282_v21 = vand.u32 2147483648, %v3429_v52  ;;  %vm276_vm5 = vweird.f32 %v3429_v52  ;;  %v280_v33 = vand.u32 2147483647, %v3429_v52 }
  0x96   :  { %v3431_v55 = vadd.f32 %v212_v54, %v111_v51  ;;  %v205_v56 = vpop.f32.mrf.mxu1  ;;  %2819 = vrcp.f32 %v3429_v52  ;;  %v3452_v14 = vadd.f32 %v222_v4, %v131_v10  ;;  %v313_v19 = vor.u32 1.1754944e-38, %v312_v5 }
  0x97   :  { %v3437_v61 = vadd.f32 %v205_v56, %v96_v53  ;;  %vm311_vm6 = vcmp.eq.f32.partialorder %v310_v17, 8.507059e+37  ;;  %v3472_v36 = vor.u32 1.1754944e-38, %v282_v21  ;;  %vm3495_vm14 = vcmp.eq.f32.partialorder %v280_v33, 8.507059e+37 }
  0x98   :  { %5669 = vst [vmem:[#allocation17_spill] sm:$0xff] %v3431_v55  ;;  %v2812_v57 = vpop.eup %2811  ;;  %v2631_v58 = vmul.f32 -1.442695, %v3431_v55 }
  0x99   :  { %v3435_v59 = vadd.f32 1.0, %v2812_v57  ;;  %v2814_v60 = vpop.eup %2813  ;;  %5670 = vst [vmem:[#allocation18_spill] sm:$0xff] %v3437_v61  ;;  %v2628_v8 = vmul.f32 -1.442695, %v3437_v61 }
  0x9a   :  { %2821 = vpow2.f32 %v2631_v58  ;;  %v2816_v62 = vpop.eup %2815  ;;  %v3439_v63 = vadd.f32 1.0, %v2814_v60 }
  0x9b   :  { %2823 = vrcp.f32 %v3435_v59  ;;  %v2818_v0 = vpop.eup %2817  ;;  %v302_v1 = vmul.f32 %v2816_v62, %v269_v50  ;;  %vm307_vm3 = vweird.f32 %v2816_v62  ;;  %vm382_vm7 = vweird.f32 %v3435_v59 }
  0x9c   :  { %v3442_v2 = vpop.eup %2819  ;;  %2825 = vrcp.f32 %v3439_v63  ;;  %v3448_v11 = vadd.f32 1.0, %v2818_v0  ;;  %v325_v23 = vand.u32 2147483647, %v3439_v63  ;;  %vm308_vm4 = vmor %vm306_vm2, %vm307_vm3  ;;  %v327_v27 = vand.u32 2147483648, %v3439_v63  ;;  %v3500_v0 = vpop.permute.xlu2 %246 }
  0x9d   :  { %v303_v7 = vsub.f32 1.0, %v302_v1  ;;  %v272_v12 = vmul.f32 %v3442_v2, %v3429_v52  ;;  %vm321_vm8 = vweird.f32 %v3439_v63  ;;  %v386_v38 = vand.u32 2147483647, %v3435_v59  ;;  %v215_v1 = vpop.f32.mrf.mxu2 }
  0x9e   :  { %v207_v15 = vpop.f32.mrf.mxu1  ;;  %2827 = vrcp.f32 %v3448_v11  ;;  %v388_v40 = vand.u32 2147483648, %v3435_v59  ;;  %vm3481_vm9 = vcmp.eq.f32.partialorder %v325_v23, 8.507059e+37  ;;  %v328_v46 = vor.u32 1.1754944e-38, %v327_v27 }
  0x9f   :  { %v304_v16 = vmul.f32 %v2816_v62, %v303_v7  ;;  %2829 = vpow2.f32 %v2628_v8  ;;  %v3463_v26 = vadd.f32 %v207_v15, %v101_v3  ;;  %v273_v28 = vsub.f32 1.0, %v272_v12  ;;  %v116_v7 = vpop.permute.xlu0 %115 }
  0xa0   :  { %v2822_v13 = vpop.eup %2821  ;;  %vm277_vm11 = vweird.f32 %v3442_v2  ;;  %vm291_vm12 = vweird.f32 %v3448_v11  ;;  %v297_v6 = vand.u32 2147483648, %v3448_v11 }
  0xa1   :  { %v3454_v18 = vpop.eup %2823  ;;  %v3456_v20 = vadd.f32 1.0, %v2822_v13  ;;  %v305_v22 = vadd.f32 %v2816_v62, %v304_v16  ;;  %5671 = vst [vmem:[#allocation19_spill] sm:$0xff] %v3463_v26  ;;  %v274_v47 = vmul.f32 %v3442_v2, %v273_v28  ;;  %v2629_v48 = vmul.f32 -1.442695, %v3463_v26  ;;  %vm3521_vm2 = vmor %vm276_vm5, %vm277_vm11 }
  0xa2   :  { %v378_v24 = vmul.f32 %v3454_v18, %v3435_v59  ;;  %v2826_v25 = vpop.eup %2825  ;;  %vm383_vm13 = vweird.f32 %v3454_v18 }
  0xa3   :  { %2831 = vrcp.f32 %v3456_v20  ;;  %v309_v29 = vsel %vm308_vm4, %v2816_v62, %v305_v22  ;;  %v317_v30 = vmul.f32 %v2826_v25, %v3439_v63  ;;  %vm322_vm10 = vweird.f32 %v2826_v25  ;;  %vm3530_vm3 = vmor %vm382_vm7, %vm383_vm13 }
  0xa4   :  { %v314_v34 = vsel %vm311_vm6, %v313_v19, %v309_v29  ;;  %v379_v35 = vsub.f32 1.0, %v378_v24  ;;  %v3477_v41 = vpop.eup %2827  ;;  %2833 = vpow2.f32 %v2629_v48  ;;  %v295_v62 = vand.u32 2147483647, %v3448_v11  ;;  %vm323_vm15 = vmor %vm321_vm8, %vm322_vm10  ;;  %v3562_v45 = vpop.permute.xlu2 %231 }
  0xa5   :  { %v318_v37 = vsub.f32 1.0, %v317_v30  ;;  %v2830_v49 = vpop.eup %2829  ;;  %v409_v51 = vmul.f32 %v314_v34, %v3479_v44  ;;  %v287_v53 = vmul.f32 %v3477_v41, %v3448_v11  ;;  %v403_v3 = vand.u32 2147483648, %v3456_v20 }
  0xa6   :  { %v380_v56 = vmul.f32 %v3454_v18, %v379_v35  ;;  %v275_v4 = vadd.f32 %v3442_v2, %v274_v47  ;;  %v3509_v13 = vadd.f32 1.0, %v2830_v49  ;;  %vm292_vm0 = vweird.f32 %v3477_v41 }
  0xa7   :  { %v319_v50 = vmul.f32 %v2826_v25, %v318_v37  ;;  %v288_v5 = vsub.f32 1.0, %v287_v53  ;;  %v413_v12 = vadd.f32 %v409_v51, %v3446_v9  ;;  %vm397_vm4 = vweird.f32 %v3456_v20  ;;  %vm3545_vm5 = vmor %vm291_vm12, %vm292_vm0  ;;  %v3565_v48 = vpop.permute.xlu0 %236 }
  0xa8   :  { %v381_v63 = vadd.f32 %v3454_v18, %v380_v56  ;;  %2835 = vrcp.f32 %v3509_v13  ;;  %v401_v24 = vand.u32 2147483647, %v3456_v20  ;;  %v279_v52 = vsel %vm3521_vm2, %v3442_v2, %v275_v4 }
  0xa9   :  { %v2832_v54 = vpop.eup %2831  ;;  %v320_v57 = vadd.f32 %v2826_v25, %v319_v50  ;;  %v289_v16 = vmul.f32 %v3477_v41, %v288_v5  ;;  %2837 = vtanh.f32 %v413_v12  ;;  %vm387_vm6 = vcmp.eq.f32.partialorder %v386_v38, 8.507059e+37  ;;  %v121_v50 = vpop.permute.xlu1 %120 }
  0xaa   :  { %v393_v58 = vmul.f32 %v2832_v54, %v3456_v20  ;;  %vm398_vm1 = vweird.f32 %v2832_v54  ;;  %v2834_v22 = vpop.eup %2833  ;;  %v385_v2 = vsel %vm3530_vm3, %v3454_v18, %v381_v63  ;;  %v389_v20 = vor.u32 1.1754944e-38, %v388_v40 }
  0xab   :  { %v324_v8 = vsel %vm323_vm15, %v2826_v25, %v320_v57  ;;  %v290_v25 = vadd.f32 %v3477_v41, %v289_v16  ;;  %v3549_v29 = vadd.f32 1.0, %v2834_v22  ;;  %vm399_vm7 = vmor %vm397_vm4, %vm398_vm1  ;;  %v404_v11 = vor.u32 1.1754944e-38, %v403_v3 }
  0xac   :  { %v394_v10 = vsub.f32 1.0, %v393_v58  ;;  %v329_v15 = vsel %vm3481_vm9, %v328_v46, %v324_v8  ;;  %v298_v34 = vor.u32 1.1754944e-38, %v297_v6  ;;  %vm402_vm8 = vcmp.eq.f32.partialorder %v401_v24, 8.507059e+37  ;;  %v217_v46 = vpop.f32.mrf.mxu2 }
  0xad   :  { %v410_v19 = vmul.f32 %v329_v15, %v3500_v0  ;;  %v294_v30 = vsel %vm3545_vm5, %v3477_v41, %v290_v25  ;;  %v284_v35 = vsel %vm3495_vm14, %v3472_v36, %v279_v52  ;;  %vm296_vm9 = vcmp.eq.f32.partialorder %v295_v62, 8.507059e+37 }
  0xae   :  { %v395_v17 = vmul.f32 %v2832_v54, %v394_v10  ;;  %v2836_v18 = vpop.eup %2835  ;;  %v390_v37 = vsel %vm387_vm6, %v389_v20, %v385_v2  ;;  %v299_v40 = vsel %vm296_vm9, %v298_v34, %v294_v30  ;;  %v407_v49 = vmul.f32 %v284_v35, %v3562_v45  ;;  %v3618_v34 = vld [vmem:[%s5634_s4 + $0x18] sm:$0xff]  ;;  %v3625_v35 = vld [vmem:[%s5634_s4 + $0x20] sm:$0xff] }
  0xaf   :  { %v414_v28 = vadd.f32 %v410_v19, %v3452_v14  ;;  %v348_v41 = vmul.f32 %v2836_v18, %v3509_v13  ;;  %v2838_v47 = vpop.eup %2837  ;;  %v421_v51 = vsub.f32 1.0, %v390_v37  ;;  %v3569_v57 = vadd.f32 %v215_v1, %v116_v7  ;;  %v46_v37 = vld [vmem:[%s5634_s4 + $0x30] sm:$0x1] }
  0xb0   :  { %v396_v27 = vadd.f32 %v2832_v54, %v395_v17  ;;  %v3571_v58 = vadd.f32 %v217_v46, %v121_v50  ;;  %v356_v60 = vand.u32 2147483647, %v3509_v13  ;;  %v358_v62 = vand.u32 2147483648, %v3509_v13 }
  0xb1   :  { %2839 = vtanh.f32 %v414_v28  ;;  %v349_v53 = vsub.f32 1.0, %v348_v41  ;;  %v3575_v4 = vmul.f32 %v2838_v47, %v421_v51  ;;  %vm353_vm10 = vweird.f32 %v2836_v18 }
  0xb2   :  { %v400_v33 = vsel %vm399_vm7, %v2832_v54, %v396_v27  ;;  %2841 = vrcp.f32 %v3549_v29  ;;  %v408_v54 = vmul.f32 %v299_v40, %v3565_v48  ;;  %v411_v10 = vadd.f32 %v407_v49, %v3569_v57 }
  0xb3   :  { %v405_v38 = vsel %vm402_vm8, %v404_v11, %v400_v33  ;;  %v350_v6 = vmul.f32 %v2836_v18, %v349_v53  ;;  %vm352_vm11 = vweird.f32 %v3509_v13  ;;  %vm357_vm13 = vcmp.eq.f32.partialorder %v356_v60, 8.507059e+37  ;;  %v3604_v33 = vld [vmem:[%s5634_s4 + $0x8] sm:$0xff]  ;;  %v3611_v11 = vld [vmem:[%s5634_s4 + $0x10] sm:$0xff] }
  0xb4   :  { %v422_v36 = vsub.f32 1.0, %v405_v38  ;;  %v412_v12 = vadd.f32 %v408_v54, %v3571_v58  ;;  %vm354_vm12 = vmor %vm352_vm11, %vm353_vm10  ;;  %v359_v16 = vor.u32 1.1754944e-38, %v358_v62  ;;  %v373_v17 = vand.u32 2147483648, %v3549_v29 }
  0xb5   :  { %v351_v7 = vadd.f32 %v2836_v18, %v350_v6  ;;  %v371_v21 = vand.u32 2147483647, %v3549_v29  ;;  %2843 = vtanh.f32 %v411_v10  ;;  %vm367_vm15 = vweird.f32 %v3549_v29 }
  0xb6   :  { %2845 = vtanh.f32 %v412_v12  ;;  %v374_v13 = vor.u32 1.1754944e-38, %v373_v17  ;;  %vm462_vm2 = vcmask 261120   ;;  %v454_v38 = vunpack.c.l.b16 %v46_v37 }
  0xb7   :  { %v2840_v56 = vpop.eup %2839  ;;  %v355_v63 = vsel %vm354_vm12, %v2836_v18, %v351_v7  ;;  %vm372_vm1 = vcmp.eq.f32.partialorder %v371_v21, 8.507059e+37  ;;  %v3632_v18 = vld [vmem:[%s5634_s4 + $0x28] sm:$0xff] }
  0xb8   :  { %v2842_v3 = vpop.eup %2841  ;;  %v3577_v5 = vmul.f32 %v2840_v56, %v422_v36  ;;  %v360_v22 = vsel %vm357_vm13, %v359_v16, %v355_v63  ;;  %v3639_v40 = vpack.c.b16 %v454_v38, %v454_v38 }
  0xb9   :  { %v363_v8 = vmul.f32 %v2842_v3, %v3549_v29  ;;  %vm368_vm14 = vweird.f32 %v2842_v3  ;;  %v419_v52 = vsub.f32 1.0, %v360_v22  ;;  %v3597_v29 = vld [vmem:[%s5634_s4] sm:$0xff] }
  0xba   :  { %v428_v1 = vpack.c.bf16 %v3577_v5, %v3575_v4  ;;  %vm369_vm0 = vmor %vm367_vm15, %vm368_vm14 }
  0xbb   :  { %v364_v15 = vsub.f32 1.0, %v363_v8  ;;  %v2844_v27 = vpop.eup %2843 }
  0xbc   :  { %490 = vmatpush.bf16.msrb.mxu1 %v428_v1  ;;  %v2846_v59 = vpop.eup %2845  ;;  %v3588_v2 = vmul.f32 %v2844_v27, %v419_v52 }
  0xbd   :  { %v365_v19 = vmul.f32 %v2842_v3, %v364_v15 }
  0xbf   :  { %v366_v23 = vadd.f32 %v2842_v3, %v365_v19 }
  0xc1   :  { %v370_v24 = vsel %vm369_vm0, %v2842_v3, %v366_v23 }
  0xc2   :  { %v375_v25 = vsel %vm372_vm1, %v374_v13, %v370_v24 }
  0xc3   :  { %v420_v28 = vsub.f32 1.0, %v375_v25 }
  0xc5   :  { %v3590_v20 = vmul.f32 %v2846_v59, %v420_v28 }
  0xc7   :  { %v427_v30 = vpack.c.bf16 %v3590_v20, %v3588_v2 }
  0xc9   :  { %491 = vmatpush.bf16.msrb.mxu1 %v427_v30 }
  0xcc   :  { %2656 = vmatmul.msk.bf16.vlgmr.msrb.gmra.mxu1 %vm462_vm2, %v3597_v29 }
  0xdc   :  { %2657 = vmatmul.msk.bf16.gmra.mxu1 %vm462_vm2, %v3604_v33 }
  0xec   :  { %2658 = vmatmul.msk.bf16.gmra.mxu1 %vm462_vm2, %v3611_v11 }
  0xfc   :  { %2659 = vmatmul.msk.bf16.gmra.mxu1 %vm462_vm2, %v3618_v34 }
 0x10c   :  { %2660 = vmatmul.msk.bf16.gmra.mxu1 %vm462_vm2, %v3625_v35 }
 0x11c   :  { %2661 = vmatmul.msk.bf16.gmra.mxu1 %vm462_vm2, %v3632_v18 }
 0x12c   :  { %2662 = vmatmul.msk.bf16.gmra.mxu1 %vm462_vm2, %v3639_v40 }
 0x149   :  { %v493_v46 = vpop.f32.mrf.mxu1 }
 0x14a   :  { %v572_v50 = vadd.f32 %v493_v46, %v3414_v31 }
 0x14c   :  { %v2665_v54 = vmul.f32 -1.442695, %v572_v50 }
 0x14e   :  { %2847 = vpow2.f32 %v2665_v54 }
 0x151   :  { %v495_v41 = vpop.f32.mrf.mxu1 }
 0x152   :  { %v573_v51 = vadd.f32 %v495_v41, %v3422_v42 }
 0x154   :  { %v2666_v56 = vmul.f32 -1.442695, %v573_v51  ;;  %v2848_v8 = vpop.eup %2847 }
 0x155   :  { %v3647_v7 = vadd.f32 1.0, %v2848_v8 }
 0x156   :  { %2849 = vpow2.f32 %v2666_v56 }
 0x157   :  { %vm597_vm3 = vweird.f32 %v3647_v7 }
 0x159   :  { %v498_v47 = vpop.f32.mrf.mxu1 }
 0x15a   :  { %v574_v36 = vadd.f32 %v498_v47, %v3416_v32 }
 0x15c   :  { %v2667_v60 = vmul.f32 -1.442695, %v574_v36  ;;  %v2850_v10 = vpop.eup %2849 }
 0x15d   :  { %v3650_v15 = vadd.f32 1.0, %v2850_v10 }
 0x15e   :  { %2851 = vpow2.f32 %v2667_v60 }
 0x15f   :  { %vm612_vm7 = vweird.f32 %v3650_v15 }
 0x161   :  { %v500_v49 = vpop.f32.mrf.mxu1 }
 0x162   :  { %v575_v62 = vadd.f32 %v500_v49, %v3424_v43 }
 0x164   :  { %v2668_v6 = vmul.f32 -1.442695, %v575_v62  ;;  %v2852_v1 = vpop.eup %2851 }
 0x165   :  { %v3653_v17 = vadd.f32 1.0, %v2852_v1  ;;  %v601_v1 = vand.u32 2147483647, %v3647_v7 }
 0x166   :  { %2853 = vpow2.f32 %v2668_v6 }
 0x167   :  { %2855 = vrcp.f32 %v3647_v7  ;;  %vm3707_vm5 = vcmp.eq.f32.partialorder %v601_v1, 8.507059e+37  ;;  %vm627_vm11 = vweird.f32 %v3653_v17 }
 0x168   :  { %2857 = vrcp.f32 %v3650_v15 }
 0x169   :  { %v503_v53 = vpop.f32.mrf.mxu1  ;;  %2859 = vrcp.f32 %v3653_v17 }
 0x16a   :  { %v652_v12 = vadd.f32 %v503_v53, %v3437_v61 }
 0x16c   :  { %v2854_v21 = vpop.eup %2853  ;;  %v2669_v22 = vmul.f32 -1.442695, %v652_v12  ;;  %v603_v12 = vand.u32 2147483648, %v3647_v7 }
 0x16d   :  { %v3659_v24 = vadd.f32 1.0, %v2854_v21  ;;  %v3661_v25 = vpop.eup %2855  ;;  %v616_v21 = vand.u32 2147483647, %v3650_v15 }
 0x16e   :  { %v3664_v28 = vpop.eup %2857  ;;  %v593_v41 = vmul.f32 %v3661_v25, %v3647_v7  ;;  %vm598_vm4 = vweird.f32 %v3661_v25 }
 0x16f   :  { %v3667_v59 = vpop.eup %2859  ;;  %v608_v54 = vmul.f32 %v3664_v28, %v3650_v15  ;;  %vm3722_vm8 = vcmp.eq.f32.partialorder %v616_v21, 8.507059e+37  ;;  %vm3729_vm9 = vmor %vm597_vm3, %vm598_vm4  ;;  %vm613_vm10 = vweird.f32 %v3664_v28  ;;  %vm642_vm0 = vweird.f32 %v3659_v24 }
 0x170   :  { %v623_v49 = vmul.f32 %v3667_v59, %v3653_v17  ;;  %v594_v56 = vsub.f32 1.0, %v593_v41  ;;  %vm628_vm6 = vweird.f32 %v3667_v59  ;;  %vm3762_vm15 = vmor %vm612_vm7, %vm613_vm10 }
 0x171   :  { %v505_v3 = vpop.f32.mrf.mxu1  ;;  %v609_v8 = vsub.f32 1.0, %v608_v54  ;;  %vm3745_vm12 = vmor %vm627_vm11, %vm628_vm6 }
 0x172   :  { %v653_v63 = vadd.f32 %v505_v3, %v3463_v26  ;;  %v624_v62 = vsub.f32 1.0, %v623_v49  ;;  %v595_v10 = vmul.f32 %v3661_v25, %v594_v56 }
 0x174   :  { %v2670_v13 = vmul.f32 -1.442695, %v653_v63  ;;  %v625_v63 = vmul.f32 %v3667_v59, %v624_v62  ;;  %v633_v62 = vand.u32 2147483648, %v3653_v17 }
 0x176   :  { %v626_v41 = vadd.f32 %v3667_v59, %v625_v63 }
 0x178   :  { %v630_v21 = vsel %vm3745_vm12, %v3667_v59, %v626_v41 }
 0x179   :  { %v508_v16 = vpop.f32.mrf.mxu1 }
 0x17a   :  { %v654_v19 = vadd.f32 %v508_v16, %v3420_v39 }
 0x17c   :  { %v2671_v23 = vmul.f32 -1.442695, %v654_v19 }
 0x17e   :  { %2861 = vpow2.f32 %v2671_v23  ;;  %v610_v23 = vmul.f32 %v3664_v28, %v609_v8 }
 0x17f   :  { %2863 = vpow2.f32 %v2669_v22 }
 0x180   :  { %2865 = vpow2.f32 %v2670_v13  ;;  %v618_v13 = vand.u32 2147483648, %v3650_v15  ;;  %v611_v8 = vadd.f32 %v3664_v28, %v610_v23 }
 0x181   :  { %v510_v52 = vpop.f32.mrf.mxu1  ;;  %2867 = vrcp.f32 %v3659_v24 }
 0x182   :  { %v655_v27 = vadd.f32 %v510_v52, %v3431_v55  ;;  %v648_v55 = vand.u32 2147483648, %v3659_v24  ;;  %v615_v59 = vsel %vm3762_vm15, %v3664_v28, %v611_v8 }
 0x184   :  { %v2672_v30 = vmul.f32 -1.442695, %v655_v27  ;;  %v2862_v37 = vpop.eup %2861  ;;  %v596_v27 = vadd.f32 %v3661_v25, %v595_v10  ;;  %v619_v10 = vor.u32 1.1754944e-38, %v618_v13 }
 0x185   :  { %v2864_v38 = vpop.eup %2863  ;;  %v3671_v47 = vadd.f32 1.0, %v2862_v37  ;;  %v631_v37 = vand.u32 2147483647, %v3653_v17 }
 0x186   :  { %2869 = vpow2.f32 %v2672_v30  ;;  %v2866_v46 = vpop.eup %2865  ;;  %v3677_v51 = vadd.f32 1.0, %v2864_v38  ;;  %v600_v7 = vsel %vm3729_vm9, %v3661_v25, %v596_v27 }
 0x187   :  { %v3675_v50 = vpop.eup %2867  ;;  %v3681_v53 = vadd.f32 1.0, %v2866_v46  ;;  %2871 = vrcp.f32 %v3671_v47  ;;  %v604_v46 = vor.u32 1.1754944e-38, %v603_v12  ;;  %vm3749_vm13 = vcmp.eq.f32.partialorder %v631_v37, 8.507059e+37 }
 0x188   :  { %v638_v3 = vmul.f32 %v3675_v50, %v3659_v24  ;;  %2873 = vrcp.f32 %v3677_v51  ;;  %vm643_vm14 = vweird.f32 %v3675_v50  ;;  %v634_v37 = vor.u32 1.1754944e-38, %v633_v62 }
 0x189   :  { %v3679_v36 = vpop.f32.mrf.mxu1  ;;  %2875 = vrcp.f32 %v3681_v53  ;;  %vm3780_vm1 = vmor %vm642_vm0, %vm643_vm14  ;;  %vm677_vm4 = vweird.f32 %v3677_v51  ;;  %v681_v30 = vand.u32 2147483647, %v3677_v51  ;;  %vm707_vm7 = vweird.f32 %v3671_v47 }
 0x18a   :  { %v639_v16 = vsub.f32 1.0, %v638_v3  ;;  %v646_v3 = vand.u32 2147483647, %v3659_v24  ;;  %v732_v63 = vadd.f32 %v3679_v36, %v3562_v45  ;;  %v635_v62 = vsel %vm3749_vm13, %v634_v37, %v630_v21 }
 0x18b   :  { %v620_v36 = vsel %vm3722_vm8, %v619_v10, %v615_v59  ;;  %v698_v10 = vand.u32 2147483648, %v3681_v53  ;;  %v713_v37 = vand.u32 2147483648, %v3671_v47 }
 0x18c   :  { %v2870_v60 = vpop.eup %2869  ;;  %v640_v49 = vmul.f32 %v3675_v50, %v639_v16  ;;  %vm647_vm3 = vcmp.eq.f32.partialorder %v646_v3, 8.507059e+37 }
 0x18d   :  { %v3689_v6 = vadd.f32 1.0, %v2870_v60  ;;  %v3698_v22 = vpop.eup %2871 }
 0x18e   :  { %v3703_v52 = vpop.eup %2873  ;;  %v703_v56 = vmul.f32 %v3698_v22, %v3671_v47  ;;  %v641_v23 = vadd.f32 %v3675_v50, %v640_v49  ;;  %vm708_vm8 = vweird.f32 %v3698_v22 }
 0x18f   :  { %2877 = vrcp.f32 %v3689_v6  ;;  %v3712_v38 = vpop.eup %2875  ;;  %v673_v17 = vmul.f32 %v3703_v52, %v3677_v51  ;;  %vm678_vm6 = vweird.f32 %v3703_v52  ;;  %vm3814_vm11 = vmor %vm707_vm7, %vm708_vm8  ;;  %vm722_vm12 = vweird.f32 %v3689_v6 }
 0x190   :  { %v688_v1 = vmul.f32 %v3712_v38, %v3681_v53  ;;  %v704_v25 = vsub.f32 1.0, %v703_v56  ;;  %v645_v24 = vsel %vm3780_vm1, %v3675_v50, %v641_v23  ;;  %vm693_vm9 = vweird.f32 %v3712_v38  ;;  %vm3848_vm0 = vmor %vm677_vm4, %vm678_vm6 }
 0x191   :  { %v515_v19 = vpop.f32.mrf.mxu1  ;;  %v674_v28 = vsub.f32 1.0, %v673_v17  ;;  %vm557_vm1 = vcmask 57344   ;;  %vm682_vm6 = vcmp.eq.f32.partialorder %v681_v30, 8.507059e+37 }
 0x192   :  { %v733_v41 = vadd.f32 %v515_v19, %v3565_v48  ;;  %v689_v15 = vsub.f32 1.0, %v688_v1  ;;  %v605_v19 = vsel %vm3707_vm5, %v604_v46, %v600_v7  ;;  %v649_v1 = vor.u32 1.1754944e-38, %v648_v55 }
 0x193   :  { %v683_v46 = vand.u32 2147483648, %v3677_v51  ;;  %v736_v7 = vmul.f32 %v732_v63, %v605_v19  ;;  %v675_v55 = vmul.f32 %v3703_v52, %v674_v28  ;;  %vm692_vm5 = vweird.f32 %v3681_v53 }
 0x194   :  { %v737_v16 = vmul.f32 %v733_v41, %v620_v36  ;;  %v650_v17 = vsel %vm647_vm3, %v649_v1, %v645_v24  ;;  %v690_v50 = vmul.f32 %v3712_v38, %v689_v15  ;;  %vm3829_vm13 = vmor %vm692_vm5, %vm693_vm9  ;;  %v696_v19 = vand.u32 2147483647, %v3681_v53 }
 0x195   :  { %v3717_v54 = vpop.eup %2877  ;;  %v740_v3 = vadd.f32 %v736_v7, %v3569_v57  ;;  %v676_v63 = vadd.f32 %v3703_v52, %v675_v55  ;;  %v714_v24 = vor.u32 1.1754944e-38, %v713_v37  ;;  %v684_v51 = vor.u32 1.1754944e-38, %v683_v46 }
 0x196   :  { %v718_v12 = vmul.f32 %v3717_v54, %v3689_v6  ;;  %vm723_vm10 = vweird.f32 %v3717_v54  ;;  %v691_v41 = vadd.f32 %v3712_v38, %v690_v50  ;;  %vm697_vm4 = vcmp.eq.f32.partialorder %v696_v19, 8.507059e+37 }
 0x197   :  { %vm3837_vm14 = vmor %vm722_vm12, %vm723_vm10  ;;  %v680_v7 = vsel %vm3848_vm0, %v3703_v52, %v676_v63  ;;  %vm555_vm9 = vcmask 58369  }
 0x198   :  { %v719_v56 = vsub.f32 1.0, %v718_v12  ;;  %v705_v12 = vmul.f32 %v3698_v22, %v704_v25  ;;  %v741_v25 = vadd.f32 %v737_v16, %v3571_v58  ;;  %v695_v1 = vsel %vm3829_vm13, %v3712_v38, %v691_v41 }
 0x199   :  { %v518_v27 = vpop.f32.mrf.mxu1 }
 0x19a   :  { %v734_v49 = vadd.f32 %v518_v27, %v3479_v44  ;;  %v720_v39 = vmul.f32 %v3717_v54, %v719_v56  ;;  %v706_v23 = vadd.f32 %v3698_v22, %v705_v12  ;;  %v711_v27 = vand.u32 2147483647, %v3671_v47 }
 0x19b   :  { %v728_v56 = vand.u32 2147483648, %v3689_v6 }
 0x19c   :  { %v738_v8 = vmul.f32 %v734_v49, %v635_v62  ;;  %v721_v59 = vadd.f32 %v3717_v54, %v720_v39  ;;  %v710_v47 = vsel %vm3814_vm11, %v3698_v22, %v706_v23  ;;  %v726_v62 = vand.u32 2147483647, %v3689_v6 }
 0x19d   :  { %v699_v6 = vor.u32 1.1754944e-38, %v698_v10  ;;  %vm712_vm15 = vcmp.eq.f32.partialorder %v711_v27, 8.507059e+37  ;;  %v729_v16 = vor.u32 1.1754944e-38, %v728_v56  ;;  %v685_v10 = vsel %vm682_vm6, %v684_v51, %v680_v7 }
 0x19e   :  { %v742_v60 = vadd.f32 %v738_v8, %v3446_v9  ;;  %v725_v36 = vsel %vm3837_vm14, %v3717_v54, %v721_v59  ;;  %v715_v12 = vsel %vm712_vm15, %v714_v24, %v710_v47  ;;  %v3858_v54 = vpop.permute.xlu1 %252  ;;  %vm727_vm3 = vcmp.eq.f32.partialorder %v726_v62, 8.507059e+37 }
 0x19f   :  { %v700_v38 = vsel %vm697_vm4, %v699_v6, %v695_v1  ;;  %v750_v55 = vsub.f32 1.0, %v715_v12  ;;  %v748_v46 = vsub.f32 1.0, %v685_v10  ;;  %v758_v59 = vmul.f32 %v715_v12, %v3575_v4 }
 0x1a0   :  { %2879 = vtanh.f32 %v742_v60  ;;  %v730_v60 = vsel %vm727_vm3, %v729_v16, %v725_v36  ;;  %v749_v27 = vsub.f32 1.0, %v700_v38  ;;  %v757_v63 = vmul.f32 %v700_v38, %v3590_v20 }
 0x1a1   :  { %v520_v21 = vpop.f32.mrf.mxu1  ;;  %2881 = vtanh.f32 %v741_v25  ;;  %v751_v25 = vsub.f32 1.0, %v730_v60  ;;  %v759_v41 = vmul.f32 %v730_v60, %v3577_v5  ;;  %v756_v28 = vmul.f32 %v685_v10, %v3588_v2 }
 0x1a2   :  { %v735_v13 = vadd.f32 %v520_v21, %v3500_v0  ;;  %2883 = vtanh.f32 %v740_v3 }
 0x1a4   :  { %v739_v49 = vmul.f32 %v735_v13, %v650_v17 }
 0x1a6   :  { %v743_v8 = vadd.f32 %v739_v49, %v3452_v14  ;;  %v2880_v39 = vpop.eup %2879 }
 0x1a7   :  { %v2882_v21 = vpop.eup %2881  ;;  %v754_v13 = vmul.f32 %v2880_v39, %v750_v55  ;;  %v5646_v39 = vmov 0.0  }
 0x1a8   :  { %2885 = vtanh.f32 %v743_v8  ;;  %v2884_v52 = vpop.eup %2883  ;;  %v753_v30 = vmul.f32 %v2882_v21, %v749_v27 }
 0x1a9   :  { %v523_v17 = vpop.f32.mrf.mxu1  ;;  %v3864_v49 = vadd.f32 %v758_v59, %v754_v13  ;;  %v752_v56 = vmul.f32 %v2884_v52, %v748_v46 }
 0x1aa   :  { %v527_v50 = vadd.f32 %v523_v17, %v3858_v54  ;;  %v3872_v19 = vadd.f32 %v757_v63, %v753_v30  ;;  %v548_v17 = vld [vmem:[%s5631_s1] sm:$0x1] }
 0x1ab   :  { %v3874_v5 = vadd.f32 %v756_v28, %v752_v56 }
 0x1ac   :  { %v2663_v23 = vmul.f32 -1.442695, %v527_v50  ;;  %558 = vst.msk [vmem:[#allocation4] sm:$0x1] %vm557_vm1, %v527_v50 }
 0x1ad   :  { %v764_v24 = vpack.c.bf16 %v3872_v19, %v3874_v5 }
 0x1ae   :  { %v2886_v37 = vpop.eup %2885  ;;  %2887 = vpow2.f32 %v2663_v23 }
 0x1af   :  { %v755_v3 = vmul.f32 %v2886_v37, %v751_v25 }
 0x1b1   :  { %v3866_v15 = vadd.f32 %v759_v41, %v755_v3  ;;  %v525_v47 = vpop.f32.mrf.mxu1 }
 0x1b3   :  { %v765_v62 = vpack.c.bf16 %v3866_v15, %v3864_v49 }
 0x1b4   :  { %v2888_v8 = vpop.eup %2887 }
 0x1b5   :  { %v531_v4 = vadd.f32 1.0, %v2888_v8  ;;  %772 = vmatpush.bf16.msrb.mxu2 %v765_v62 }
 0x1b7   :  { %2889 = vrcp.f32 %v531_v4  ;;  %v543_v36 = vand.u32 2147483648, %v531_v4  ;;  %v541_v53 = vand.u32 2147483647, %v531_v4  ;;  %vm537_vm7 = vweird.f32 %v531_v4 }
 0x1b9   :  { %773 = vmatpush.bf16.msrb.mxu2 %v764_v24  ;;  %v544_v12 = vor.u32 1.1754944e-38, %v543_v36  ;;  %vm542_vm10 = vcmp.eq.f32.partialorder %v541_v53, 8.507059e+37 }
 0x1bc   :  { %2673 = vmatmul.msk.bf16.vlgmr.msrb.gmra.mxu2 %vm462_vm2, %v3597_v29 }
 0x1bd   :  { %v2890_v20 = vpop.eup %2889 }
 0x1be   :  { %v533_v22 = vmul.f32 %v2890_v20, %v531_v4  ;;  %vm538_vm5 = vweird.f32 %v2890_v20  ;;  %v5704_v4 = vld [vmem:[#allocation14_spill] sm:$0xff] }
 0x1bf   :  { %vm539_vm8 = vmor %vm537_vm7, %vm538_vm5 }
 0x1c0   :  { %v534_v6 = vsub.f32 1.0, %v533_v22 }
 0x1c2   :  { %v535_v2 = vmul.f32 %v2890_v20, %v534_v6 }
 0x1c4   :  { %v536_v1 = vadd.f32 %v2890_v20, %v535_v2 }
 0x1c6   :  { %v540_v16 = vsel %vm539_vm8, %v2890_v20, %v536_v1 }
 0x1c7   :  { %v3880_v7 = vsel %vm542_vm10, %v544_v12, %v540_v16  ;;  %v5705_v12 = vld [vmem:[#allocation17_spill] sm:$0xff] }
 0x1c8   :  { %v550_v51 = vrot.slane %v3880_v7, 1  ;;  %556 = vst.msk [vmem:[#allocation2 - $0x1] sm:$0x2] %vm555_vm9, %v3880_v7 }
 0x1ca   :  { %vm552_vm11 = vcmp.lt.f32.partialorder %v548_v17, %v550_v51 }
 0x1cb   :  { %v3889_v60 = vsel %vm552_vm11, 1.0, %v5646_v39 }
 0x1cc   :  { %v5645_v38 = vsub.f32 1.0, %v3889_v60  ;;  %2674 = vmatmul.msk.bf16.gmra.mxu2 %vm462_vm2, %v3604_v33  ;;  %v569_v10 = vmul.f32 %v3889_v60, %v527_v50 }
 0x1ce   :  { %v3896_v55 = vmul.f32 0.0, %v5645_v38 }
 0x1d0   :  { %v3900_v21 = vadd.f32 %v569_v10, %v3896_v55 }
 0x1dc   :  { %2675 = vmatmul.msk.bf16.gmra.mxu2 %vm462_vm2, %v3611_v11 }
 0x1ec   :  { %2676 = vmatmul.msk.bf16.gmra.mxu2 %vm462_vm2, %v3618_v34 }
 0x1fc   :  { %2677 = vmatmul.msk.bf16.gmra.mxu2 %vm462_vm2, %v3625_v35 }
 0x20c   :  { %2678 = vmatmul.msk.bf16.gmra.mxu2 %vm462_vm2, %v3632_v18 }
 0x21c   :  { %2679 = vmatmul.msk.bf16.gmra.mxu2 %vm462_vm2, %v3639_v40 }
 0x23f   :  { %v775_v33 = vpop.f32.mrf.mxu2 }
 0x240   :  { %v857_v25 = vadd.f32 %v775_v33, %v3414_v31 }
 0x242   :  { %v2682_v27 = vmul.f32 -1.442695, %v857_v25 }
 0x244   :  { %2891 = vpow2.f32 %v2682_v27 }
 0x247   :  { %v777_v50 = vpop.f32.mrf.mxu2 }
 0x248   :  { %v858_v11 = vadd.f32 %v777_v50, %v3422_v42 }
 0x24a   :  { %v2683_v37 = vmul.f32 -1.442695, %v858_v11  ;;  %v2892_v59 = vpop.eup %2891 }
 0x24b   :  { %v3916_v56 = vadd.f32 1.0, %v2892_v59 }
 0x24c   :  { %2893 = vpow2.f32 %v2683_v37 }
 0x24d   :  { %vm882_vm12 = vweird.f32 %v3916_v56 }
 0x24f   :  { %v780_v23 = vpop.f32.mrf.mxu2 }
 0x250   :  { %v859_v13 = vadd.f32 %v780_v23, %v3416_v32 }
 0x252   :  { %v2684_v35 = vmul.f32 -1.442695, %v859_v13  ;;  %v2894_v41 = vpop.eup %2893 }
 0x253   :  { %v3919_v47 = vadd.f32 1.0, %v2894_v41 }
 0x254   :  { %2895 = vpow2.f32 %v2684_v35 }
 0x255   :  { %vm897_vm0 = vweird.f32 %v3919_v47 }
 0x257   :  { %v782_v52 = vpop.f32.mrf.mxu2 }
 0x258   :  { %v860_v46 = vadd.f32 %v782_v52, %v3424_v43 }
 0x25a   :  { %v2685_v3 = vmul.f32 -1.442695, %v860_v46  ;;  %v2896_v30 = vpop.eup %2895 }
 0x25b   :  { %v3922_v8 = vadd.f32 1.0, %v2896_v30 }
 0x25c   :  { %2897 = vpow2.f32 %v2685_v3 }
 0x25d   :  { %2899 = vrcp.f32 %v3916_v56  ;;  %vm912_vm5 = vweird.f32 %v3922_v8 }
 0x25e   :  { %2901 = vrcp.f32 %v3919_v47 }
 0x25f   :  { %v785_v34 = vpop.f32.mrf.mxu2  ;;  %2903 = vrcp.f32 %v3922_v8 }
 0x260   :  { %v937_v63 = vadd.f32 %v785_v34, %v3437_v61 }
 0x262   :  { %v2898_v20 = vpop.eup %2897  ;;  %v2686_v22 = vmul.f32 -1.442695, %v937_v63 }
 0x263   :  { %v3928_v2 = vadd.f32 1.0, %v2898_v20  ;;  %v3930_v1 = vpop.eup %2899 }
 0x264   :  { %v3933_v17 = vpop.eup %2901  ;;  %v878_v52 = vmul.f32 %v3930_v1, %v3916_v56  ;;  %vm883_vm13 = vweird.f32 %v3930_v1 }
 0x265   :  { %v3936_v51 = vpop.eup %2903  ;;  %v893_v35 = vmul.f32 %v3933_v17, %v3919_v47  ;;  %vm3998_vm4 = vmor %vm882_vm12, %vm883_vm13  ;;  %vm898_vm6 = vweird.f32 %v3933_v17  ;;  %v931_v39 = vand.u32 2147483647, %v3928_v2  ;;  %vm927_vm12 = vweird.f32 %v3928_v2 }
 0x266   :  { %v908_v11 = vmul.f32 %v3936_v51, %v3922_v8  ;;  %v879_v46 = vsub.f32 1.0, %v878_v52  ;;  %vm913_vm15 = vweird.f32 %v3936_v51  ;;  %vm4031_vm11 = vmor %vm897_vm0, %vm898_vm6 }
 0x267   :  { %v787_v18 = vpop.f32.mrf.mxu2  ;;  %v894_v30 = vsub.f32 1.0, %v893_v35  ;;  %vm4014_vm7 = vmor %vm912_vm5, %vm913_vm15  ;;  %vm932_vm15 = vcmp.eq.f32.partialorder %v931_v39, 8.507059e+37 }
 0x268   :  { %v938_v62 = vadd.f32 %v787_v18, %v3463_v26  ;;  %v909_v3 = vsub.f32 1.0, %v908_v11  ;;  %v880_v63 = vmul.f32 %v3930_v1, %v879_v46 }
 0x26a   :  { %v2687_v36 = vmul.f32 -1.442695, %v938_v62  ;;  %v886_v62 = vand.u32 2147483647, %v3916_v56 }
 0x26c   :  { %vm3976_vm14 = vcmp.eq.f32.partialorder %v886_v62, 8.507059e+37 }
 0x26f   :  { %v790_v28 = vpop.f32.mrf.mxu2 }
 0x270   :  { %v939_v24 = vadd.f32 %v790_v28, %v5704_v4  ;;  %v888_v28 = vand.u32 2147483648, %v3916_v56 }
 0x272   :  { %v2688_v6 = vmul.f32 -1.442695, %v939_v24  ;;  %v910_v24 = vmul.f32 %v3936_v51, %v909_v3  ;;  %v889_v11 = vor.u32 1.1754944e-38, %v888_v28 }
 0x274   :  { %2905 = vpow2.f32 %v2688_v6  ;;  %v901_v6 = vand.u32 2147483647, %v3919_v47  ;;  %v911_v35 = vadd.f32 %v3936_v51, %v910_v24 }
 0x275   :  { %2907 = vpow2.f32 %v2686_v22 }
 0x276   :  { %2909 = vpow2.f32 %v2687_v36  ;;  %vm3991_vm3 = vcmp.eq.f32.partialorder %v901_v6, 8.507059e+37 }
 0x277   :  { %v792_v53 = vpop.f32.mrf.mxu2  ;;  %2911 = vrcp.f32 %v3928_v2 }
 0x278   :  { %v940_v16 = vadd.f32 %v792_v53, %v5705_v12  ;;  %v895_v53 = vmul.f32 %v3933_v17, %v894_v30  ;;  %v918_v30 = vand.u32 2147483648, %v3922_v8  ;;  %v933_v12 = vand.u32 2147483648, %v3928_v2 }
 0x27a   :  { %v2689_v10 = vmul.f32 -1.442695, %v940_v16  ;;  %v2906_v33 = vpop.eup %2905  ;;  %v903_v16 = vand.u32 2147483648, %v3919_v47  ;;  %v896_v62 = vadd.f32 %v3933_v17, %v895_v53  ;;  %v919_v38 = vor.u32 1.1754944e-38, %v918_v30 }
 0x27b   :  { %v2908_v50 = vpop.eup %2907  ;;  %v3940_v25 = vadd.f32 1.0, %v2906_v33  ;;  %v881_v33 = vadd.f32 %v3930_v1, %v880_v63 }
 0x27c   :  { %2913 = vpow2.f32 %v2689_v10  ;;  %v2910_v23 = vpop.eup %2909  ;;  %v3946_v34 = vadd.f32 1.0, %v2908_v50  ;;  %v904_v28 = vor.u32 1.1754944e-38, %v903_v16  ;;  %v915_v16 = vsel %vm4014_vm7, %v3936_v51, %v911_v35 }
 0x27d   :  { %v3944_v13 = vpop.eup %2911  ;;  %v3950_v37 = vadd.f32 1.0, %v2910_v23  ;;  %2915 = vrcp.f32 %v3940_v25  ;;  %v916_v23 = vand.u32 2147483647, %v3922_v8  ;;  %v885_v56 = vsel %vm3998_vm4, %v3930_v1, %v881_v33 }
 0x27e   :  { %v923_v59 = vmul.f32 %v3944_v13, %v3928_v2  ;;  %2917 = vrcp.f32 %v3946_v34  ;;  %vm928_vm10 = vweird.f32 %v3944_v13  ;;  %v900_v51 = vsel %vm4031_vm11, %v3933_v17, %v896_v62 }
 0x27f   :  { %v3948_v27 = vpop.f32.mrf.mxu2  ;;  %2919 = vrcp.f32 %v3950_v37  ;;  %vm4018_vm8 = vcmp.eq.f32.partialorder %v916_v23, 8.507059e+37  ;;  %vm4049_vm13 = vmor %vm927_vm12, %vm928_vm10  ;;  %vm962_vm0 = vweird.f32 %v3946_v34  ;;  %v966_v50 = vand.u32 2147483647, %v3946_v34 }
 0x280   :  { %v924_v20 = vsub.f32 1.0, %v923_v59  ;;  %v1017_v6 = vadd.f32 %v3948_v27, %v3562_v45  ;;  %v920_v30 = vsel %vm4018_vm8, %v919_v38, %v915_v16  ;;  %v905_v27 = vsel %vm3991_vm3, %v904_v28, %v900_v51 }
 0x281   :  { %v934_v38 = vor.u32 1.1754944e-38, %v933_v12  ;;  %v983_v59 = vand.u32 2147483648, %v3950_v37  ;;  %vm992_vm3 = vweird.f32 %v3940_v25  ;;  %v998_v33 = vand.u32 2147483648, %v3940_v25 }
 0x282   :  { %v2914_v18 = vpop.eup %2913  ;;  %v925_v46 = vmul.f32 %v3944_v13, %v924_v20 }
 0x283   :  { %v3958_v41 = vadd.f32 1.0, %v2914_v18  ;;  %v3967_v36 = vpop.eup %2915 }
 0x284   :  { %v3972_v10 = vpop.eup %2917  ;;  %v988_v3 = vmul.f32 %v3967_v36, %v3940_v25  ;;  %v926_v63 = vadd.f32 %v3944_v13, %v925_v46  ;;  %vm993_vm6 = vweird.f32 %v3967_v36 }
 0x285   :  { %2921 = vrcp.f32 %v3958_v41  ;;  %v3981_v52 = vpop.eup %2919  ;;  %v958_v8 = vmul.f32 %v3972_v10, %v3946_v34  ;;  %vm963_vm4 = vweird.f32 %v3972_v10  ;;  %vm4083_vm8 = vmor %vm992_vm3, %vm993_vm6  ;;  %vm1007_vm10 = vweird.f32 %v3958_v41 }
 0x286   :  { %v973_v24 = vmul.f32 %v3981_v52, %v3950_v37  ;;  %v989_v1 = vsub.f32 1.0, %v988_v3  ;;  %v930_v2 = vsel %vm4049_vm13, %v3944_v13, %v926_v63  ;;  %vm978_vm5 = vweird.f32 %v3981_v52 }
 0x287   :  { %v797_v22 = vpop.f32.mrf.mxu2  ;;  %v959_v17 = vsub.f32 1.0, %v958_v8  ;;  %v935_v53 = vsel %vm932_vm15, %v934_v38, %v930_v2  ;;  %v999_v2 = vor.u32 1.1754944e-38, %v998_v33  ;;  %vm4117_vm15 = vmor %vm962_vm0, %vm963_vm4  ;;  %vm967_vm0 = vcmp.eq.f32.partialorder %v966_v50, 8.507059e+37 }
 0x288   :  { %v1018_v35 = vadd.f32 %v797_v22, %v3565_v48  ;;  %v974_v47 = vsub.f32 1.0, %v973_v24  ;;  %v890_v22 = vsel %vm3976_vm14, %v889_v11, %v885_v56  ;;  %v990_v24 = vmul.f32 %v3967_v36, %v989_v1 }
 0x289   :  { %v968_v11 = vand.u32 2147483648, %v3946_v34  ;;  %v1021_v56 = vmul.f32 %v1017_v6, %v890_v22  ;;  %v960_v12 = vmul.f32 %v3972_v10, %v959_v17  ;;  %vm977_vm14 = vweird.f32 %v3950_v37 }
 0x28a   :  { %v975_v13 = vmul.f32 %v3981_v52, %v974_v47  ;;  %v991_v8 = vadd.f32 %v3967_v36, %v990_v24  ;;  %v996_v1 = vand.u32 2147483647, %v3940_v25  ;;  %vm4098_vm11 = vmor %vm977_vm14, %vm978_vm5  ;;  %v981_v22 = vand.u32 2147483647, %v3950_v37 }
 0x28b   :  { %v3986_v18 = vpop.eup %2921  ;;  %v961_v6 = vadd.f32 %v3972_v10, %v960_v12 }
 0x28c   :  { %v1003_v20 = vmul.f32 %v3986_v18, %v3958_v41  ;;  %vm1008_vm7 = vweird.f32 %v3986_v18  ;;  %v995_v25 = vsel %vm4083_vm8, %v3967_v36, %v991_v8  ;;  %vm997_vm13 = vcmp.eq.f32.partialorder %v996_v1, 8.507059e+37 }
 0x28d   :  { %vm4106_vm12 = vmor %vm1007_vm10, %vm1008_vm7  ;;  %v1000_v24 = vsel %vm997_vm13, %v999_v2, %v995_v25  ;;  %vm982_vm3 = vcmp.eq.f32.partialorder %v981_v22, 8.507059e+37 }
 0x28e   :  { %v1004_v3 = vsub.f32 1.0, %v1003_v20  ;;  %v1022_v20 = vmul.f32 %v1018_v35, %v905_v27  ;;  %v976_v35 = vadd.f32 %v3981_v52, %v975_v13  ;;  %v1035_v12 = vsub.f32 1.0, %v1000_v24 }
 0x28f   :  { %v800_v23 = vpop.f32.mrf.mxu2 }
 0x290   :  { %v1019_v46 = vadd.f32 %v800_v23, %v3479_v44  ;;  %v1005_v4 = vmul.f32 %v3986_v18, %v1004_v3  ;;  %v1026_v16 = vadd.f32 %v1022_v20, %v3571_v58  ;;  %v1025_v23 = vadd.f32 %v1021_v56, %v3569_v57 }
 0x291   :  { %v1013_v3 = vand.u32 2147483648, %v3958_v41  ;;  %v980_v38 = vsel %vm4098_vm11, %v3981_v52, %v976_v35  ;;  %v965_v56 = vsel %vm4117_vm15, %v3972_v10, %v961_v6 }
 0x292   :  { %v1023_v62 = vmul.f32 %v1019_v46, %v920_v30  ;;  %v1006_v51 = vadd.f32 %v3986_v18, %v1005_v4  ;;  %v1011_v30 = vand.u32 2147483647, %v3958_v41  ;;  %v984_v41 = vor.u32 1.1754944e-38, %v983_v59 }
 0x293   :  { %v1014_v20 = vor.u32 1.1754944e-38, %v1013_v3 }
 0x294   :  { %v1027_v39 = vadd.f32 %v1023_v62, %v3446_v9  ;;  %v1010_v27 = vsel %vm4106_vm12, %v3986_v18, %v1006_v51  ;;  %vm1012_vm14 = vcmp.eq.f32.partialorder %v1011_v30, 8.507059e+37 }
 0x295   :  { %v1015_v13 = vsel %vm1012_vm14, %v1014_v20, %v1010_v27  ;;  %v547_v20 = vsub.f32 1.0, %v3880_v7 }
 0x296   :  { %2923 = vtanh.f32 %v1027_v39  ;;  %v985_v39 = vsel %vm982_vm3, %v984_v41, %v980_v38  ;;  %v1036_v8 = vsub.f32 1.0, %v1015_v13  ;;  %v1044_v50 = vmul.f32 %v1015_v13, %v3866_v15 }
 0x297   :  { %v802_v28 = vpop.f32.mrf.mxu2  ;;  %2925 = vtanh.f32 %v1026_v16  ;;  %v1042_v3 = vmul.f32 %v985_v39, %v3872_v19 }
 0x298   :  { %v1020_v63 = vadd.f32 %v802_v28, %v3500_v0  ;;  %2927 = vtanh.f32 %v1025_v23  ;;  %v1043_v23 = vmul.f32 %v1000_v24, %v3864_v49 }
 0x29a   :  { %v1024_v46 = vmul.f32 %v1020_v63, %v935_v53  ;;  %v969_v53 = vor.u32 1.1754944e-38, %v968_v11  ;;  %v1034_v11 = vsub.f32 1.0, %v985_v39 }
 0x29c   :  { %v1028_v62 = vadd.f32 %v1024_v46, %v3452_v14  ;;  %v2924_v34 = vpop.eup %2923  ;;  %v970_v52 = vsel %vm967_vm0, %v969_v53, %v965_v56  ;;  %v832_v53 = vld [vmem:[%s5631_s1 + $0x1] sm:$0x1] }
 0x29d   :  { %v2926_v59 = vpop.eup %2925  ;;  %v1039_v16 = vmul.f32 %v2924_v34, %v1035_v12  ;;  %v1033_v1 = vsub.f32 1.0, %v970_v52  ;;  %v1041_v30 = vmul.f32 %v970_v52, %v3874_v5  ;;  %v562_v5 = vrot.slane %v3889_v60, 7 }
 0x29e   :  { %2929 = vtanh.f32 %v1028_v62  ;;  %v2928_v10 = vpop.eup %2927  ;;  %v1038_v51 = vmul.f32 %v2926_v59, %v1034_v11  ;;  %v5728_v59 = vmov 0.0  }
 0x29f   :  { %v805_v18 = vpop.f32.mrf.mxu2  ;;  %v4135_v35 = vadd.f32 %v1043_v23, %v1039_v16  ;;  %v1037_v47 = vmul.f32 %v2928_v10, %v1033_v1  ;;  %v564_v56 = vmul.f32 %v562_v5, %v3880_v7  ;;  %v5729_v7 = vsub.f32 1.0, %v3889_v60 }
 0x2a0   :  { %v4128_v4 = vadd.f32 %v805_v18, %v3858_v54  ;;  %v4143_v17 = vadd.f32 %v1042_v3, %v1038_v51 }
 0x2a1   :  { %v4145_v15 = vadd.f32 %v1041_v30, %v1037_v47  ;;  %v566_v12 = vrot.slane %v564_v56, 1 }
 0x2a2   :  { %v2680_v28 = vmul.f32 -1.442695, %v4128_v4  ;;  %842 = vst.msk [vmem:[#allocation4 + $0x1] sm:$0x1] %vm557_vm1, %v4128_v4 }
 0x2a3   :  { %v1049_v62 = vpack.c.bf16 %v4143_v17, %v4145_v15  ;;  %v568_v16 = vadd.f32 %v566_v12, %v3896_v55  ;;  %v4185_v55 = vld [vmem:[%s5634_s4 + $0x10] sm:$0xff] }
 0x2a4   :  { %v2930_v63 = vpop.eup %2929  ;;  %2931 = vpow2.f32 %v2680_v28 }
 0x2a5   :  { %v1040_v33 = vmul.f32 %v2930_v63, %v1036_v8  ;;  %v4168_v8 = vld [vmem:[%s5634_s4 + $0x8] sm:$0xff] }
 0x2a7   :  { %v4137_v46 = vadd.f32 %v1044_v50, %v1040_v33  ;;  %v807_v6 = vpop.f32.mrf.mxu2 }
 0x2a8   :  { %v4206_v6 = vld [vmem:[%s5634_s4 + $0x28] sm:$0xff] }
 0x2a9   :  { %v1050_v25 = vpack.c.bf16 %v4137_v46, %v4135_v35 }
 0x2aa   :  { %v2932_v22 = vpop.eup %2931 }
 0x2ab   :  { %v813_v49 = vadd.f32 1.0, %v2932_v22  ;;  %1057 = vmatpush.bf16.msrb.mxu3 %v1050_v25 }
 0x2ad   :  { %2933 = vrcp.f32 %v813_v49  ;;  %v825_v41 = vand.u32 2147483648, %v813_v49  ;;  %v823_v37 = vand.u32 2147483647, %v813_v49  ;;  %vm819_vm6 = vweird.f32 %v813_v49 }
 0x2af   :  { %1058 = vmatpush.bf16.msrb.mxu3 %v1049_v62  ;;  %v826_v24 = vor.u32 1.1754944e-38, %v825_v41  ;;  %vm824_vm7 = vcmp.eq.f32.partialorder %v823_v37, 8.507059e+37 }
 0x2b2   :  { %2690 = vmatmul.msk.bf16.vlgmr.msrb.gmra.mxu3 %vm462_vm2, %v3597_v29 }
 0x2b3   :  { %v2934_v19 = vpop.eup %2933 }
 0x2b4   :  { %v815_v2 = vmul.f32 %v2934_v19, %v813_v49  ;;  %vm820_vm4 = vweird.f32 %v2934_v19 }
 0x2b5   :  { %vm821_vm5 = vmor %vm819_vm6, %vm820_vm4 }
 0x2b6   :  { %v816_v36 = vsub.f32 1.0, %v815_v2 }
 0x2b8   :  { %v817_v27 = vmul.f32 %v2934_v19, %v816_v36 }
 0x2ba   :  { %v818_v38 = vadd.f32 %v2934_v19, %v817_v27 }
 0x2bc   :  { %v822_v18 = vsel %vm821_vm5, %v2934_v19, %v818_v38 }
 0x2bd   :  { %v827_v29 = vsel %vm824_vm7, %v826_v24, %v822_v18 }
 0x2be   :  { %v830_v34 = vsub.f32 1.0, %v827_v29  ;;  %v834_v13 = vrot.slane %v827_v29, 1  ;;  %v829_v39 = vmul.f32 %v827_v29, %v547_v20 }
 0x2c0   :  { %vm836_vm8 = vcmp.lt.f32.partialorder %v832_v53, %v834_v13  ;;  %841 = vst.msk [vmem:[#allocation2] sm:$0x2] %vm555_vm9, %v829_v39  ;;  %v4158_v52 = vmul.f32 %v830_v34, %v547_v20 }
 0x2c1   :  { %v2681_v28 = vsel %vm836_vm8, 1.0, %v5728_v59 }
 0x2c2   :  { %v4163_v10 = vmul.f32 %v2681_v28, %v5729_v7  ;;  %2691 = vmatmul.msk.bf16.gmra.mxu3 %vm462_vm2, %v4168_v8  ;;  %v5730_v28 = vld [vmem:[#allocation14_spill] sm:$0xff] }
 0x2c4   :  { %v843_v11 = vsub.f32 1.0, %v4163_v10  ;;  %v854_v63 = vmul.f32 %v4163_v10, %v4128_v4  ;;  %v846_v1 = vrot.slane %v4163_v10, 7  ;;  %v4192_v4 = vld [vmem:[%s5634_s4 + $0x18] sm:$0xff] }
 0x2c6   :  { %v844_v33 = vmul.f32 %v843_v11, %v568_v16  ;;  %v853_v23 = vmul.f32 %v843_v11, %v3900_v21  ;;  %v848_v50 = vmul.f32 %v846_v1, %v829_v39  ;;  %v4199_v21 = vld [vmem:[%s5634_s4 + $0x20] sm:$0xff] }
 0x2c8   :  { %v4178_v51 = vadd.f32 %v854_v63, %v853_v23  ;;  %v850_v47 = vrot.slane %v848_v50, 1 }
 0x2ca   :  { %v4180_v3 = vadd.f32 %v850_v47, %v844_v33  ;;  %v5731_v47 = vld [vmem:[#allocation17_spill] sm:$0xff] }
 0x2d2   :  { %2692 = vmatmul.msk.bf16.gmra.mxu3 %vm462_vm2, %v4185_v55 }
 0x2e2   :  { %2693 = vmatmul.msk.bf16.gmra.mxu3 %vm462_vm2, %v4192_v4 }
 0x2f2   :  { %2694 = vmatmul.msk.bf16.gmra.mxu3 %vm462_vm2, %v4199_v21 }
 0x302   :  { %2695 = vmatmul.msk.bf16.gmra.mxu3 %vm462_vm2, %v4206_v6 }
 0x312   :  { %2696 = vmatmul.msk.bf16.gmra.mxu3 %vm462_vm2, %v3639_v40 }
 0x335   :  { %v1060_v25 = vpop.f32.mrf.mxu3 }
 0x336   :  { %v1142_v62 = vadd.f32 %v1060_v25, %v3414_v31 }
 0x338   :  { %v2699_v41 = vmul.f32 -1.442695, %v1142_v62 }
 0x33a   :  { %2935 = vpow2.f32 %v2699_v41 }
 0x33d   :  { %v1062_v30 = vpop.f32.mrf.mxu3 }
 0x33e   :  { %v1143_v19 = vadd.f32 %v1062_v30, %v3422_v42 }
 0x340   :  { %v2700_v5 = vmul.f32 -1.442695, %v1143_v19  ;;  %v2936_v20 = vpop.eup %2935 }
 0x341   :  { %v4216_v29 = vadd.f32 1.0, %v2936_v20 }
 0x342   :  { %2937 = vpow2.f32 %v2700_v5 }
 0x343   :  { %vm1167_vm10 = vweird.f32 %v4216_v29 }
 0x345   :  { %v1065_v22 = vpop.f32.mrf.mxu3 }
 0x346   :  { %v1144_v2 = vadd.f32 %v1065_v22, %v3416_v32 }
 0x348   :  { %v2701_v27 = vmul.f32 -1.442695, %v1144_v2  ;;  %v2938_v56 = vpop.eup %2937 }
 0x349   :  { %v4219_v34 = vadd.f32 1.0, %v2938_v56 }
 0x34a   :  { %2939 = vpow2.f32 %v2701_v27 }
 0x34b   :  { %vm1182_vm15 = vweird.f32 %v4219_v34 }
 0x34d   :  { %v1067_v49 = vpop.f32.mrf.mxu3 }
 0x34e   :  { %v1145_v37 = vadd.f32 %v1067_v49, %v3424_v43 }
 0x350   :  { %v2702_v24 = vmul.f32 -1.442695, %v1145_v37  ;;  %v2940_v18 = vpop.eup %2939 }
 0x351   :  { %v4222_v12 = vadd.f32 1.0, %v2940_v18 }
 0x352   :  { %2941 = vpow2.f32 %v2702_v24 }
 0x353   :  { %2943 = vrcp.f32 %v4216_v29  ;;  %vm1197_vm4 = vweird.f32 %v4222_v12 }
 0x354   :  { %2945 = vrcp.f32 %v4219_v34 }
 0x355   :  { %v1070_v36 = vpop.f32.mrf.mxu3  ;;  %2947 = vrcp.f32 %v4222_v12 }
 0x356   :  { %v1222_v53 = vadd.f32 %v1070_v36, %v3437_v61 }
 0x358   :  { %v2942_v16 = vpop.eup %2941  ;;  %v2703_v11 = vmul.f32 -1.442695, %v1222_v53 }
 0x359   :  { %v4228_v33 = vadd.f32 1.0, %v2942_v16  ;;  %v4230_v50 = vpop.eup %2943 }
 0x35a   :  { %v4233_v30 = vpop.eup %2945  ;;  %v1163_v36 = vmul.f32 %v4230_v50, %v4216_v29  ;;  %vm1168_vm11 = vweird.f32 %v4230_v50 }
 0x35b   :  { %v4236_v22 = vpop.eup %2947  ;;  %v1178_v20 = vmul.f32 %v4233_v30, %v4219_v34  ;;  %vm4298_vm3 = vmor %vm1167_vm10, %vm1168_vm11  ;;  %vm1183_vm0 = vweird.f32 %v4233_v30  ;;  %v1216_v32 = vand.u32 2147483647, %v4228_v33  ;;  %v1218_v42 = vand.u32 2147483648, %v4228_v33 }
 0x35c   :  { %v1193_v5 = vmul.f32 %v4236_v22, %v4222_v12  ;;  %v1164_v56 = vsub.f32 1.0, %v1163_v36  ;;  %vm1198_vm13 = vweird.f32 %v4236_v22  ;;  %vm4331_vm8 = vmor %vm1182_vm15, %vm1183_vm0  ;;  %vm1212_vm10 = vweird.f32 %v4228_v33 }
 0x35d   :  { %v1072_v38 = vpop.f32.mrf.mxu3  ;;  %vm4314_vm6 = vmor %vm1197_vm4, %vm1198_vm13  ;;  %vm1217_vm13 = vcmp.eq.f32.partialorder %v1216_v32, 8.507059e+37 }
 0x35e   :  { %v1223_v13 = vadd.f32 %v1072_v38, %v3463_v26  ;;  %v1194_v53 = vsub.f32 1.0, %v1193_v5  ;;  %v1165_v16 = vmul.f32 %v4230_v50, %v1164_v56  ;;  %v1201_v56 = vand.u32 2147483647, %v4222_v12 }
 0x360   :  { %v2704_v1 = vmul.f32 -1.442695, %v1223_v13  ;;  %v1166_v5 = vadd.f32 %v4230_v50, %v1165_v16  ;;  %vm4318_vm5 = vcmp.eq.f32.partialorder %v1201_v56, 8.507059e+37 }
 0x365   :  { %v1075_v39 = vpop.f32.mrf.mxu3 }
 0x366   :  { %v1224_v7 = vadd.f32 %v1075_v39, %v5730_v28  ;;  %v1203_v28 = vand.u32 2147483648, %v4222_v12 }
 0x368   :  { %v2705_v63 = vmul.f32 -1.442695, %v1224_v7  ;;  %v1179_v7 = vsub.f32 1.0, %v1178_v20  ;;  %v1204_v43 = vor.u32 1.1754944e-38, %v1203_v28 }
 0x36a   :  { %2949 = vpow2.f32 %v2705_v63  ;;  %v1173_v63 = vand.u32 2147483648, %v4216_v29 }
 0x36b   :  { %2951 = vpow2.f32 %v2703_v11  ;;  %v1171_v11 = vand.u32 2147483647, %v4216_v29  ;;  %v1170_v29 = vsel %vm4298_vm3, %v4230_v50, %v1166_v5 }
 0x36c   :  { %2953 = vpow2.f32 %v2704_v1  ;;  %v1195_v1 = vmul.f32 %v4236_v22, %v1194_v53  ;;  %v1174_v53 = vor.u32 1.1754944e-38, %v1173_v63 }
 0x36d   :  { %v1077_v23 = vpop.f32.mrf.mxu3  ;;  %2955 = vrcp.f32 %v4228_v33  ;;  %vm4276_vm12 = vcmp.eq.f32.partialorder %v1171_v11, 8.507059e+37 }
 0x36e   :  { %v1225_v25 = vadd.f32 %v1077_v23, %v5731_v47 }
 0x370   :  { %v2706_v49 = vmul.f32 -1.442695, %v1225_v25  ;;  %v2950_v62 = vpop.eup %2949 }
 0x371   :  { %v2952_v19 = vpop.eup %2951  ;;  %v4240_v41 = vadd.f32 1.0, %v2950_v62 }
 0x372   :  { %2957 = vpow2.f32 %v2706_v49  ;;  %v2954_v2 = vpop.eup %2953  ;;  %v4246_v37 = vadd.f32 1.0, %v2952_v19  ;;  %v1186_v49 = vand.u32 2147483647, %v4219_v34  ;;  %v1180_v19 = vmul.f32 %v4233_v30, %v1179_v7 }
 0x373   :  { %v4244_v27 = vpop.eup %2955  ;;  %v4250_v24 = vadd.f32 1.0, %v2954_v2  ;;  %2959 = vrcp.f32 %v4240_v41  ;;  %v1188_v2 = vand.u32 2147483648, %v4219_v34  ;;  %v1283_v5 = vand.u32 2147483648, %v4240_v41 }
 0x374   :  { %v1208_v13 = vmul.f32 %v4244_v27, %v4228_v33  ;;  %2961 = vrcp.f32 %v4246_v37  ;;  %vm4291_vm14 = vcmp.eq.f32.partialorder %v1186_v49, 8.507059e+37  ;;  %vm1213_vm7 = vweird.f32 %v4244_v27 }
 0x375   :  { %v4248_v38 = vpop.f32.mrf.mxu3  ;;  %2963 = vrcp.f32 %v4250_v24  ;;  %vm4349_vm11 = vmor %vm1212_vm10, %vm1213_vm7  ;;  %vm1247_vm15 = vweird.f32 %v4246_v37  ;;  %v1251_v20 = vand.u32 2147483647, %v4246_v37  ;;  %v1268_v11 = vand.u32 2147483648, %v4250_v24 }
 0x376   :  { %v1209_v23 = vsub.f32 1.0, %v1208_v13  ;;  %v1196_v13 = vadd.f32 %v4236_v22, %v1195_v1  ;;  %v1181_v1 = vadd.f32 %v4233_v30, %v1180_v19 }
 0x378   :  { %v2958_v18 = vpop.eup %2957  ;;  %v1210_v7 = vmul.f32 %v4244_v27, %v1209_v23  ;;  %v1189_v23 = vor.u32 1.1754944e-38, %v1188_v2  ;;  %v1200_v2 = vsel %vm4314_vm6, %v4236_v22, %v1196_v13  ;;  %v1185_v61 = vsel %vm4331_vm8, %v4233_v30, %v1181_v1 }
 0x379   :  { %v4258_v39 = vadd.f32 1.0, %v2958_v18  ;;  %v4267_v62 = vpop.eup %2959  ;;  %v1205_v28 = vsel %vm4318_vm5, %v1204_v43, %v1200_v2  ;;  %v1219_v43 = vor.u32 1.1754944e-38, %v1218_v42 }
 0x37a   :  { %v4272_v36 = vpop.eup %2961  ;;  %v1273_v16 = vmul.f32 %v4267_v62, %v4240_v41  ;;  %v1211_v63 = vadd.f32 %v4244_v27, %v1210_v7  ;;  %v1190_v33 = vsel %vm4291_vm14, %v1189_v23, %v1185_v61  ;;  %vm1277_vm14 = vweird.f32 %v4240_v41 }
 0x37b   :  { %2965 = vrcp.f32 %v4258_v39  ;;  %v4281_v18 = vpop.eup %2963  ;;  %v1243_v12 = vmul.f32 %v4272_v36, %v4246_v37  ;;  %vm1248_vm3 = vweird.f32 %v4272_v36  ;;  %vm1278_vm0 = vweird.f32 %v4267_v62 }
 0x37c   :  { %v1258_v49 = vmul.f32 %v4281_v18, %v4250_v24  ;;  %v1274_v50 = vsub.f32 1.0, %v1273_v16  ;;  %v1302_v16 = vadd.f32 %v4248_v38, %v3562_v45  ;;  %vm1263_vm4 = vweird.f32 %v4281_v18  ;;  %vm4383_vm5 = vmor %vm1277_vm14, %vm1278_vm0 }
 0x37d   :  { %v1082_v25 = vpop.f32.mrf.mxu3  ;;  %v1244_v30 = vsub.f32 1.0, %v1243_v12  ;;  %vm1292_vm7 = vweird.f32 %v4258_v39 }
 0x37e   :  { %v1303_v22 = vadd.f32 %v1082_v25, %v3565_v48  ;;  %v1259_v34 = vsub.f32 1.0, %v1258_v49  ;;  %v1175_v25 = vsel %vm4276_vm12, %v1174_v53, %v1170_v29  ;;  %v1275_v38 = vmul.f32 %v4267_v62, %v1274_v50 }
 0x37f   :  { %v1253_v53 = vand.u32 2147483648, %v4246_v37  ;;  %v1306_v29 = vmul.f32 %v1302_v16, %v1175_v25  ;;  %v1245_v42 = vmul.f32 %v4272_v36, %v1244_v30  ;;  %vm1262_vm12 = vweird.f32 %v4250_v24 }
 0x380   :  { %v1307_v49 = vmul.f32 %v1303_v22, %v1190_v33  ;;  %v1276_v12 = vadd.f32 %v4267_v62, %v1275_v38  ;;  %v1281_v50 = vand.u32 2147483647, %v4240_v41  ;;  %vm4398_vm8 = vmor %vm1262_vm12, %vm1263_vm4  ;;  %v1266_v25 = vand.u32 2147483647, %v4250_v24 }
 0x381   :  { %v4286_v47 = vpop.eup %2965  ;;  %v1246_v16 = vadd.f32 %v4272_v36, %v1245_v42 }
 0x382   :  { %v1288_v26 = vmul.f32 %v4286_v47, %v4258_v39  ;;  %v1311_v2 = vadd.f32 %v1307_v49, %v3571_v58  ;;  %vm1293_vm6 = vweird.f32 %v4286_v47  ;;  %v1280_v41 = vsel %vm4383_vm5, %v4267_v62, %v1276_v12 }
 0x383   :  { %vm4406_vm10 = vmor %vm1292_vm7, %vm1293_vm6  ;;  %vm1267_vm14 = vcmp.eq.f32.partialorder %v1266_v25, 8.507059e+37 }
 0x384   :  { %v1289_v7 = vsub.f32 1.0, %v1288_v26  ;;  %v1215_v26 = vsel %vm4349_vm11, %v4244_v27, %v1211_v63  ;;  %v1260_v27 = vmul.f32 %v4281_v18, %v1259_v34  ;;  %vm1282_vm11 = vcmp.eq.f32.partialorder %v1281_v50, 8.507059e+37 }
 0x385   :  { %v1085_v56 = vpop.f32.mrf.mxu3  ;;  %v1220_v19 = vsel %vm1217_vm13, %v1219_v43, %v1215_v26  ;;  %v1284_v26 = vor.u32 1.1754944e-38, %v1283_v5  ;;  %vm4417_vm13 = vmor %vm1247_vm15, %vm1248_vm3  ;;  %vm1252_vm15 = vcmp.eq.f32.partialorder %v1251_v20, 8.507059e+37 }
 0x386   :  { %v1304_v13 = vadd.f32 %v1085_v56, %v3479_v44  ;;  %v1290_v31 = vmul.f32 %v4286_v47, %v1289_v7  ;;  %v1310_v56 = vadd.f32 %v1306_v29, %v3569_v57  ;;  %v1261_v22 = vadd.f32 %v4281_v18, %v1260_v27 }
 0x387   :  { %v1298_v7 = vand.u32 2147483648, %v4258_v39  ;;  %v1285_v38 = vsel %vm1282_vm11, %v1284_v26, %v1280_v41  ;;  %v1250_v29 = vsel %vm4417_vm13, %v4272_v36, %v1246_v16 }
 0x388   :  { %v1308_v1 = vmul.f32 %v1304_v13, %v1205_v28  ;;  %v1291_v61 = vadd.f32 %v4286_v47, %v1290_v31  ;;  %v1296_v28 = vand.u32 2147483647, %v4258_v39  ;;  %v1269_v39 = vor.u32 1.1754944e-38, %v1268_v11 }
 0x389   :  { %v1265_v43 = vsel %vm4398_vm8, %v4281_v18, %v1261_v22  ;;  %v1299_v49 = vor.u32 1.1754944e-38, %v1298_v7  ;;  %v1320_v42 = vsub.f32 1.0, %v1285_v38 }
 0x38a   :  { %v1312_v32 = vadd.f32 %v1308_v1, %v3446_v9  ;;  %v1295_v33 = vsel %vm4406_vm10, %v4286_v47, %v1291_v61  ;;  %vm1297_vm12 = vcmp.eq.f32.partialorder %v1296_v28, 8.507059e+37 }
 0x38b   :  { %v1300_v27 = vsel %vm1297_vm12, %v1299_v49, %v1295_v33  ;;  %v856_v49 = vadd.f32 %v3889_v60, %v4163_v10 }
 0x38c   :  { %2967 = vtanh.f32 %v1312_v32  ;;  %v1270_v32 = vsel %vm1267_vm14, %v1269_v39, %v1265_v43  ;;  %v1321_v12 = vsub.f32 1.0, %v1300_v27  ;;  %v1329_v20 = vmul.f32 %v1300_v27, %v4137_v46 }
 0x38d   :  { %v1087_v23 = vpop.f32.mrf.mxu3  ;;  %2969 = vtanh.f32 %v1311_v2  ;;  %v1327_v7 = vmul.f32 %v1270_v32, %v4143_v17  ;;  %v4452_v17 = vld [vmem:[%s5634_s4] sm:$0xff] }
 0x38e   :  { %v1305_v63 = vadd.f32 %v1087_v23, %v3500_v0  ;;  %2971 = vtanh.f32 %v1310_v56  ;;  %v1328_v56 = vmul.f32 %v1285_v38, %v4135_v35 }
 0x390   :  { %v1309_v13 = vmul.f32 %v1305_v63, %v1220_v19  ;;  %v1254_v19 = vor.u32 1.1754944e-38, %v1253_v53  ;;  %v1319_v53 = vsub.f32 1.0, %v1270_v32 }
 0x392   :  { %v1313_v1 = vadd.f32 %v1309_v13, %v3452_v14  ;;  %v2968_v37 = vpop.eup %2967  ;;  %v1255_v18 = vsel %vm1252_vm15, %v1254_v19, %v1250_v29  ;;  %v1117_v19 = vld [vmem:[%s5631_s1 + $0x2] sm:$0x1] }
 0x393   :  { %v2970_v11 = vpop.eup %2969  ;;  %v1324_v2 = vmul.f32 %v2968_v37, %v1320_v42  ;;  %v1318_v50 = vsub.f32 1.0, %v1255_v18  ;;  %v1326_v28 = vmul.f32 %v1255_v18, %v4145_v15  ;;  %v1124_v42 = vsub.f32 1.0, %v856_v49 }
 0x394   :  { %2973 = vtanh.f32 %v1313_v1  ;;  %v2972_v36 = vpop.eup %2971  ;;  %v1323_v61 = vmul.f32 %v2970_v11, %v1319_v53 }
 0x395   :  { %v1090_v47 = vpop.f32.mrf.mxu3  ;;  %v4435_v22 = vadd.f32 %v1328_v56, %v1324_v2  ;;  %v1322_v34 = vmul.f32 %v2972_v36, %v1318_v50  ;;  %v5754_v56 = vld [vmem:[#allocation12_spill] sm:$0xff] }
 0x396   :  { %v4428_v31 = vadd.f32 %v1090_v47, %v3858_v54  ;;  %v4443_v30 = vadd.f32 %v1327_v7, %v1323_v61  ;;  %v5755_v61 = vld [vmem:[#allocation15_spill] sm:$0xff] }
 0x397   :  { %v4445_v46 = vadd.f32 %v1326_v28, %v1322_v34  ;;  %v5756_v34 = vld [vmem:[#allocation13_spill] sm:$0xff]  ;;  %v5757_v28 = vld [vmem:[#allocation16_spill] sm:$0xff] }
 0x398   :  { %v2697_v23 = vmul.f32 -1.442695, %v4428_v31  ;;  %1127 = vst.msk [vmem:[#allocation4 + $0x2] sm:$0x1] %vm557_vm1, %v4428_v31 }
 0x399   :  { %v1334_v1 = vpack.c.bf16 %v4443_v30, %v4445_v46 }
 0x39a   :  { %v2974_v63 = vpop.eup %2973  ;;  %2975 = vpow2.f32 %v2697_v23 }
 0x39b   :  { %v1325_v5 = vmul.f32 %v2974_v63, %v1321_v12 }
 0x39d   :  { %v4437_v13 = vadd.f32 %v1329_v20, %v1325_v5  ;;  %v1092_v16 = vpop.f32.mrf.mxu3 }
 0x39f   :  { %v1335_v41 = vpack.c.bf16 %v4437_v13, %v4435_v22 }
 0x3a0   :  { %v2976_v25 = vpop.eup %2975 }
 0x3a1   :  { %v1098_v35 = vadd.f32 1.0, %v2976_v25  ;;  %1342 = vmatpush.bf16.msrb.mxu0 %v1335_v41 }
 0x3a3   :  { %2977 = vrcp.f32 %v1098_v35  ;;  %v1110_v39 = vand.u32 2147483648, %v1098_v35  ;;  %v1108_v24 = vand.u32 2147483647, %v1098_v35  ;;  %vm1104_vm0 = vweird.f32 %v1098_v35 }
 0x3a5   :  { %1343 = vmatpush.bf16.msrb.mxu0 %v1334_v1  ;;  %v1111_v38 = vor.u32 1.1754944e-38, %v1110_v39  ;;  %vm1109_vm6 = vcmp.eq.f32.partialorder %v1108_v24, 8.507059e+37  ;;  %v5758_v39 = vld [vmem:[#allocation18_spill] sm:$0xff] }
 0x3a8   :  { %2707 = vmatmul.msk.bf16.vlgmr.msrb.gmra.mxu0 %vm462_vm2, %v4452_v17 }
 0x3a9   :  { %v2978_v15 = vpop.eup %2977 }
 0x3aa   :  { %v1100_v26 = vmul.f32 %v2978_v15, %v1098_v35  ;;  %vm1105_vm3 = vweird.f32 %v2978_v15 }
 0x3ab   :  { %vm1106_vm4 = vmor %vm1104_vm0, %vm1105_vm3 }
 0x3ac   :  { %v1101_v62 = vsub.f32 1.0, %v1100_v26 }
 0x3ae   :  { %v1102_v33 = vmul.f32 %v2978_v15, %v1101_v62 }
 0x3b0   :  { %v1103_v43 = vadd.f32 %v2978_v15, %v1102_v33 }
 0x3b2   :  { %v1107_v29 = vsel %vm1106_vm4, %v2978_v15, %v1103_v43  ;;  %v5759_v43 = vld [vmem:[#allocation19_spill] sm:$0xff] }
 0x3b3   :  { %v1112_v47 = vsel %vm1109_vm6, %v1111_v38, %v1107_v29 }
 0x3b4   :  { %v1115_v37 = vsub.f32 1.0, %v1112_v47  ;;  %v1119_v27 = vrot.slane %v1112_v47, 1  ;;  %v1114_v32 = vmul.f32 %v1112_v47, %v4158_v52  ;;  %v5760_v47 = vld [vmem:[#allocation14_spill] sm:$0xff] }
 0x3b6   :  { %vm1121_vm5 = vcmp.lt.f32.partialorder %v1117_v19, %v1119_v27  ;;  %1126 = vst.msk [vmem:[#allocation2 + $0x1] sm:$0x2] %vm555_vm9, %v1114_v32  ;;  %v4464_v18 = vmul.f32 %v1115_v37, %v4158_v52 }
 0x3b7   :  { %v2698_v60 = vsel %vm1121_vm5, 1.0, %v5728_v59 }
 0x3b8   :  { %v1125_v10 = vmul.f32 %v2698_v60, %v1124_v42  ;;  %2708 = vmatmul.msk.bf16.gmra.mxu0 %vm462_vm2, %v4168_v8 }
 0x3ba   :  { %v1128_v11 = vsub.f32 1.0, %v1125_v10  ;;  %v1139_v23 = vmul.f32 %v1125_v10, %v4428_v31  ;;  %v1131_v36 = vrot.slane %v1125_v10, 7  ;;  %v4470_v12 = vadd.f32 %v1125_v10, %v856_v49 }
 0x3bc   :  { %v1129_v2 = vmul.f32 %v1128_v11, %v4180_v3  ;;  %v1138_v53 = vmul.f32 %v1128_v11, %v4178_v51  ;;  %v1133_v63 = vmul.f32 %v1131_v36, %v1114_v32 }
 0x3be   :  { %v4474_v50 = vadd.f32 %v1139_v23, %v1138_v53  ;;  %v1135_v52 = vrot.slane %v1133_v63, 1  ;;  %v5761_v23 = vld [vmem:[#allocation17_spill] sm:$0xff] }
 0x3c0   :  { %v4476_v5 = vadd.f32 %v1135_v52, %v1129_v2 }
 0x3c8   :  { %2709 = vmatmul.msk.bf16.gmra.mxu0 %vm462_vm2, %v4185_v55 }
 0x3d8   :  { %2710 = vmatmul.msk.bf16.gmra.mxu0 %vm462_vm2, %v4192_v4 }
 0x3e8   :  { %2711 = vmatmul.msk.bf16.gmra.mxu0 %vm462_vm2, %v4199_v21 }
 0x3f8   :  { %2712 = vmatmul.msk.bf16.gmra.mxu0 %vm462_vm2, %v4206_v6 }
 0x408   :  { %2713 = vmatmul.msk.bf16.gmra.mxu0 %vm462_vm2, %v3639_v40 }
 0x425   :  { %v1345_v8 = vpop.f32.mrf.mxu0 }
 0x426   :  { %v1427_v20 = vadd.f32 %v1345_v8, %v5754_v56 }
 0x428   :  { %v2716_v16 = vmul.f32 -1.442695, %v1427_v20 }
 0x42a   :  { %2979 = vpow2.f32 %v2716_v16 }
 0x42d   :  { %v1347_v51 = vpop.f32.mrf.mxu0 }
 0x42e   :  { %v1428_v55 = vadd.f32 %v1347_v51, %v5755_v61 }
 0x430   :  { %v2717_v41 = vmul.f32 -1.442695, %v1428_v55  ;;  %v2980_v1 = vpop.eup %2979 }
 0x431   :  { %v4492_v62 = vadd.f32 1.0, %v2980_v1 }
 0x432   :  { %2981 = vpow2.f32 %v2717_v41 }
 0x433   :  { %vm1452_vm7 = vweird.f32 %v4492_v62 }
 0x435   :  { %v1350_v3 = vpop.f32.mrf.mxu0 }
 0x436   :  { %v1429_v7 = vadd.f32 %v1350_v3, %v5756_v34 }
 0x438   :  { %v2718_v21 = vmul.f32 -1.442695, %v1429_v7  ;;  %v2982_v15 = vpop.eup %2981 }
 0x439   :  { %v4495_v24 = vadd.f32 1.0, %v2982_v15 }
 0x43a   :  { %2983 = vpow2.f32 %v2718_v21 }
 0x43b   :  { %vm1467_vm13 = vweird.f32 %v4495_v24 }
 0x43d   :  { %v1352_v31 = vpop.f32.mrf.mxu0 }
 0x43e   :  { %v1430_v25 = vadd.f32 %v1352_v31, %v5757_v28 }
 0x440   :  { %v2719_v35 = vmul.f32 -1.442695, %v1430_v25  ;;  %v2984_v26 = vpop.eup %2983 }
 0x441   :  { %v4498_v29 = vadd.f32 1.0, %v2984_v26 }
 0x442   :  { %2985 = vpow2.f32 %v2719_v35 }
 0x443   :  { %2987 = vrcp.f32 %v4492_v62  ;;  %vm1482_vm3 = vweird.f32 %v4498_v29 }
 0x444   :  { %2989 = vrcp.f32 %v4495_v24 }
 0x445   :  { %v1355_v4 = vpop.f32.mrf.mxu0  ;;  %2991 = vrcp.f32 %v4498_v29 }
 0x446   :  { %v1507_v33 = vadd.f32 %v1355_v4, %v5758_v39 }
 0x448   :  { %v2986_v37 = vpop.eup %2985  ;;  %v2720_v27 = vmul.f32 -1.442695, %v1507_v33  ;;  %v1456_v33 = vand.u32 2147483647, %v4492_v62 }
 0x449   :  { %v4504_v60 = vadd.f32 1.0, %v2986_v37  ;;  %v4506_v11 = vpop.eup %2987 }
 0x44a   :  { %v4509_v2 = vpop.eup %2989  ;;  %v1448_v3 = vmul.f32 %v4506_v11, %v4492_v62  ;;  %vm1453_vm8 = vweird.f32 %v4506_v11  ;;  %vm4552_vm10 = vcmp.eq.f32.partialorder %v1456_v33, 8.507059e+37 }
 0x44b   :  { %v4512_v53 = vpop.eup %2991  ;;  %v1463_v41 = vmul.f32 %v4509_v2, %v4495_v24  ;;  %vm4574_vm14 = vmor %vm1452_vm7, %vm1453_vm8  ;;  %vm1468_vm15 = vweird.f32 %v4509_v2  ;;  %vm1497_vm7 = vweird.f32 %v4504_v60 }
 0x44c   :  { %v1478_v20 = vmul.f32 %v4512_v53, %v4498_v29  ;;  %v1449_v21 = vsub.f32 1.0, %v1448_v3  ;;  %vm1483_vm11 = vweird.f32 %v4512_v53  ;;  %vm4607_vm5 = vmor %vm1467_vm13, %vm1468_vm15 }
 0x44d   :  { %v1357_v6 = vpop.f32.mrf.mxu0  ;;  %v1464_v15 = vsub.f32 1.0, %v1463_v41  ;;  %vm4590_vm0 = vmor %vm1482_vm3, %vm1483_vm11 }
 0x44e   :  { %v1508_v38 = vadd.f32 %v1357_v6, %v5759_v43  ;;  %v1479_v6 = vsub.f32 1.0, %v1478_v20  ;;  %v1450_v26 = vmul.f32 %v4506_v11, %v1449_v21 }
 0x450   :  { %v2721_v42 = vmul.f32 -1.442695, %v1508_v38  ;;  %v1458_v38 = vand.u32 2147483648, %v4492_v62 }
 0x452   :  { %v1459_v3 = vor.u32 1.1754944e-38, %v1458_v38 }
 0x455   :  { %v1360_v49 = vpop.f32.mrf.mxu0 }
 0x456   :  { %v1509_v19 = vadd.f32 %v1360_v49, %v5760_v47  ;;  %v1480_v49 = vmul.f32 %v4512_v53, %v1479_v6  ;;  %v1503_v47 = vand.u32 2147483648, %v4504_v60 }
 0x458   :  { %v2722_v32 = vmul.f32 -1.442695, %v1509_v19  ;;  %v1481_v20 = vadd.f32 %v4512_v53, %v1480_v49 }
 0x45a   :  { %2993 = vpow2.f32 %v2722_v32 }
 0x45b   :  { %2995 = vpow2.f32 %v2720_v27  ;;  %v1471_v27 = vand.u32 2147483647, %v4495_v24 }
 0x45c   :  { %2997 = vpow2.f32 %v2721_v42  ;;  %v1465_v42 = vmul.f32 %v4509_v2, %v1464_v15 }
 0x45d   :  { %v1362_v10 = vpop.f32.mrf.mxu0  ;;  %2999 = vrcp.f32 %v4504_v60  ;;  %vm4567_vm12 = vcmp.eq.f32.partialorder %v1471_v27, 8.507059e+37 }
 0x45e   :  { %v1510_v36 = vadd.f32 %v1362_v10, %v5761_v23  ;;  %v1473_v10 = vand.u32 2147483648, %v4495_v24  ;;  %v1501_v23 = vand.u32 2147483647, %v4504_v60 }
 0x460   :  { %v2723_v63 = vmul.f32 -1.442695, %v1510_v36  ;;  %v2994_v52 = vpop.eup %2993  ;;  %v1474_v33 = vor.u32 1.1754944e-38, %v1473_v10  ;;  %vm1502_vm11 = vcmp.eq.f32.partialorder %v1501_v23, 8.507059e+37 }
 0x461   :  { %v2996_v8 = vpop.eup %2995  ;;  %v4516_v31 = vadd.f32 1.0, %v2994_v52 }
 0x462   :  { %3001 = vpow2.f32 %v2723_v63  ;;  %v2998_v51 = vpop.eup %2997  ;;  %v4522_v7 = vadd.f32 1.0, %v2996_v8  ;;  %v1451_v63 = vadd.f32 %v4506_v11, %v1450_v26  ;;  %v1486_v8 = vand.u32 2147483647, %v4498_v29 }
 0x463   :  { %v4520_v55 = vpop.eup %2999  ;;  %v4526_v16 = vadd.f32 1.0, %v2998_v51  ;;  %3003 = vrcp.f32 %v4516_v31  ;;  %v1466_v26 = vadd.f32 %v4509_v2, %v1465_v42  ;;  %v1485_v42 = vsel %vm4590_vm0, %v4512_v53, %v1481_v20 }
 0x464   :  { %v1493_v35 = vmul.f32 %v4520_v55, %v4504_v60  ;;  %3005 = vrcp.f32 %v4522_v7  ;;  %v1455_v62 = vsel %vm4574_vm14, %v4506_v11, %v1451_v63  ;;  %vm4594_vm4 = vcmp.eq.f32.partialorder %v1486_v8, 8.507059e+37 }
 0x465   :  { %v4524_v4 = vpop.f32.mrf.mxu0  ;;  %3007 = vrcp.f32 %v4526_v16  ;;  %vm1498_vm6 = vweird.f32 %v4520_v55  ;;  %v1470_v53 = vsel %vm4607_vm5, %v4509_v2, %v1466_v26  ;;  %vm1532_vm13 = vweird.f32 %v4522_v7 }
 0x466   :  { %v1494_v19 = vsub.f32 1.0, %v1493_v35  ;;  %v1488_v35 = vand.u32 2147483648, %v4498_v29  ;;  %vm4625_vm8 = vmor %vm1497_vm7, %vm1498_vm6  ;;  %v1536_v52 = vand.u32 2147483647, %v4522_v7 }
 0x468   :  { %v3002_v25 = vpop.eup %3001  ;;  %v1495_v41 = vmul.f32 %v4520_v55, %v1494_v19  ;;  %v1489_v15 = vor.u32 1.1754944e-38, %v1488_v35  ;;  %v1587_v19 = vadd.f32 %v4524_v4, %v3562_v45 }
 0x469   :  { %v4534_v1 = vadd.f32 1.0, %v3002_v25  ;;  %v4543_v32 = vpop.eup %3003 }
 0x46a   :  { %v4548_v36 = vpop.eup %3005  ;;  %v1558_v25 = vmul.f32 %v4543_v32, %v4516_v31  ;;  %v1496_v10 = vadd.f32 %v4520_v55, %v1495_v41  ;;  %v1490_v35 = vsel %vm4594_vm4, %v1489_v15, %v1485_v42  ;;  %vm1563_vm15 = vweird.f32 %v4543_v32 }
 0x46b   :  { %3009 = vrcp.f32 %v4534_v1  ;;  %v4557_v51 = vpop.eup %3007  ;;  %v1528_v29 = vmul.f32 %v4548_v36, %v4522_v7  ;;  %vm1533_vm14 = vweird.f32 %v4548_v36  ;;  %vm1577_vm6 = vweird.f32 %v4534_v1 }
 0x46c   :  { %v1543_v38 = vmul.f32 %v4557_v51, %v4526_v16  ;;  %v1559_v11 = vsub.f32 1.0, %v1558_v25  ;;  %v1500_v60 = vsel %vm4625_vm8, %v4520_v55, %v1496_v10  ;;  %vm1548_vm3 = vweird.f32 %v4557_v51 }
 0x46d   :  { %v1367_v37 = vpop.f32.mrf.mxu0  ;;  %v1529_v2 = vsub.f32 1.0, %v1528_v29  ;;  %v1568_v10 = vand.u32 2147483648, %v4516_v31 }
 0x46e   :  { %v1588_v20 = vadd.f32 %v1367_v37, %v3565_v48  ;;  %v1544_v24 = vsub.f32 1.0, %v1543_v38  ;;  %v1460_v37 = vsel %vm4552_vm10, %v1459_v3, %v1455_v62  ;;  %v1560_v4 = vmul.f32 %v4543_v32, %v1559_v11 }
 0x46f   :  { %v1475_v38 = vsel %vm4567_vm12, %v1474_v33, %v1470_v53  ;;  %v1538_v3 = vand.u32 2147483648, %v4522_v7  ;;  %v1591_v43 = vmul.f32 %v1587_v19, %v1460_v37  ;;  %v1530_v23 = vmul.f32 %v4548_v36, %v1529_v2 }
 0x470   :  { %v1592_v27 = vmul.f32 %v1588_v20, %v1475_v38  ;;  %v1545_v29 = vmul.f32 %v4557_v51, %v1544_v24  ;;  %vm1547_vm10 = vweird.f32 %v4526_v16  ;;  %vm1562_vm12 = vweird.f32 %v4516_v31 }
 0x471   :  { %v4562_v21 = vpop.eup %3009  ;;  %v1561_v42 = vadd.f32 %v4543_v32, %v1560_v4  ;;  %v1595_v15 = vadd.f32 %v1591_v43, %v3569_v57  ;;  %vm4659_vm4 = vmor %vm1562_vm12, %vm1563_vm15  ;;  %v1583_v24 = vand.u32 2147483648, %v4534_v1  ;;  %v1531_v19 = vadd.f32 %v4548_v36, %v1530_v23 }
 0x472   :  { %v1573_v49 = vmul.f32 %v4562_v21, %v4534_v1  ;;  %v1596_v11 = vadd.f32 %v1592_v27, %v3571_v58  ;;  %vm1578_vm0 = vweird.f32 %v4562_v21  ;;  %v1546_v20 = vadd.f32 %v4557_v51, %v1545_v29  ;;  %vm4674_vm5 = vmor %vm1547_vm10, %vm1548_vm3 }
 0x473   :  { %v1551_v37 = vand.u32 2147483647, %v4526_v16  ;;  %vm4681_vm7 = vmor %vm1577_vm6, %vm1578_vm0  ;;  %v1539_v43 = vor.u32 1.1754944e-38, %v1538_v3 }
 0x474   :  { %v1574_v25 = vsub.f32 1.0, %v1573_v49  ;;  %v1504_v49 = vor.u32 1.1754944e-38, %v1503_v47  ;;  %v1553_v47 = vand.u32 2147483648, %v4526_v16  ;;  %v1550_v38 = vsel %vm4674_vm5, %v4557_v51, %v1546_v20 }
 0x475   :  { %v1370_v8 = vpop.f32.mrf.mxu0  ;;  %vm1552_vm12 = vcmp.eq.f32.partialorder %v1551_v37, 8.507059e+37 }
 0x476   :  { %v1589_v41 = vadd.f32 %v1370_v8, %v3479_v44  ;;  %v1575_v62 = vmul.f32 %v4562_v21, %v1574_v25  ;;  %v1505_v55 = vsel %vm1502_vm11, %v1504_v49, %v1500_v60  ;;  %v1566_v8 = vand.u32 2147483647, %v4516_v31  ;;  %vm4693_vm11 = vmor %vm1532_vm13, %vm1533_vm14 }
 0x477   :  { %v1565_v31 = vsel %vm4659_vm4, %v4543_v32, %v1561_v42  ;;  %v1554_v32 = vor.u32 1.1754944e-38, %v1553_v47  ;;  %v1584_v49 = vor.u32 1.1754944e-38, %v1583_v24  ;;  %vm1537_vm13 = vcmp.eq.f32.partialorder %v1536_v52, 8.507059e+37 }
 0x478   :  { %v1593_v26 = vmul.f32 %v1589_v41, %v1490_v35  ;;  %v1576_v53 = vadd.f32 %v4562_v21, %v1575_v62  ;;  %v1581_v35 = vand.u32 2147483647, %v4534_v1  ;;  %vm1567_vm8 = vcmp.eq.f32.partialorder %v1566_v8, 8.507059e+37 }
 0x479   :  { %v1535_v62 = vsel %vm4693_vm11, %v4548_v36, %v1531_v19 }
 0x47a   :  { %v1597_v6 = vadd.f32 %v1593_v26, %v3446_v9  ;;  %v1569_v26 = vor.u32 1.1754944e-38, %v1568_v10  ;;  %v1580_v4 = vsel %vm4681_vm7, %v4562_v21, %v1576_v53  ;;  %vm1582_vm10 = vcmp.eq.f32.partialorder %v1581_v35, 8.507059e+37 }
 0x47b   :  { %v1585_v29 = vsel %vm1582_vm10, %v1584_v49, %v1580_v4  ;;  %v1540_v51 = vsel %vm1537_vm13, %v1539_v43, %v1535_v62  ;;  %v1402_v62 = vld [vmem:[%s5631_s1 + $0x3] sm:$0x1] }
 0x47c   :  { %3011 = vtanh.f32 %v1597_v6  ;;  %v1570_v27 = vsel %vm1567_vm8, %v1569_v26, %v1565_v31  ;;  %v1555_v6 = vsel %vm1552_vm12, %v1554_v32, %v1550_v38  ;;  %v1606_v42 = vsub.f32 1.0, %v1585_v29 }
 0x47d   :  { %v1372_v33 = vpop.f32.mrf.mxu0  ;;  %3013 = vtanh.f32 %v1596_v11  ;;  %v1605_v23 = vsub.f32 1.0, %v1570_v27  ;;  %v1604_v3 = vsub.f32 1.0, %v1555_v6  ;;  %v1614_v52 = vmul.f32 %v1585_v29, %v4437_v13 }
 0x47e   :  { %v1590_v63 = vadd.f32 %v1372_v33, %v3500_v0  ;;  %3015 = vtanh.f32 %v1595_v15  ;;  %v1613_v15 = vmul.f32 %v1570_v27, %v4435_v22  ;;  %v1611_v35 = vmul.f32 %v1540_v51, %v4445_v46 }
 0x480   :  { %v1594_v25 = vmul.f32 %v1590_v63, %v1505_v55  ;;  %v1603_v63 = vsub.f32 1.0, %v1540_v51  ;;  %v4740_v51 = vld [vmem:[%s5634_s4 + $0x8] sm:$0xff] }
 0x482   :  { %v1598_v1 = vadd.f32 %v1594_v25, %v3452_v14  ;;  %v3012_v7 = vpop.eup %3011  ;;  %v1612_v25 = vmul.f32 %v1555_v6, %v4443_v30 }
 0x483   :  { %v3014_v47 = vpop.eup %3013  ;;  %v1609_v10 = vmul.f32 %v3012_v7, %v1605_v23  ;;  %v1409_v7 = vsub.f32 1.0, %v4470_v12 }
 0x484   :  { %3017 = vtanh.f32 %v1598_v1  ;;  %v3016_v36 = vpop.eup %3015  ;;  %v1608_v53 = vmul.f32 %v3014_v47, %v1604_v3 }
 0x485   :  { %v1375_v21 = vpop.f32.mrf.mxu0  ;;  %v4711_v20 = vadd.f32 %v1613_v15, %v1609_v10  ;;  %v1607_v24 = vmul.f32 %v3016_v36, %v1603_v63  ;;  %v4757_v15 = vld [vmem:[%s5634_s4 + $0x10] sm:$0xff] }
 0x486   :  { %v4704_v55 = vadd.f32 %v1375_v21, %v3858_v54  ;;  %v4719_v2 = vadd.f32 %v1612_v25, %v1608_v53 }
 0x487   :  { %v4721_v13 = vadd.f32 %v1611_v35, %v1607_v24 }
 0x488   :  { %v2714_v33 = vmul.f32 -1.442695, %v4704_v55  ;;  %1412 = vst.msk [vmem:[#allocation4 + $0x3] sm:$0x1] %vm557_vm1, %v4704_v55 }
 0x489   :  { %v1619_v26 = vpack.c.bf16 %v4719_v2, %v4721_v13 }
 0x48a   :  { %v3018_v11 = vpop.eup %3017  ;;  %3019 = vpow2.f32 %v2714_v33 }
 0x48b   :  { %v1610_v8 = vmul.f32 %v3018_v11, %v1606_v42 }
 0x48d   :  { %v4713_v41 = vadd.f32 %v1614_v52, %v1610_v8  ;;  %v1377_v19 = vpop.f32.mrf.mxu0 }
 0x48f   :  { %v1620_v31 = vpack.c.bf16 %v4713_v41, %v4711_v20 }
 0x490   :  { %v3020_v37 = vpop.eup %3019 }
 0x491   :  { %v1383_v22 = vadd.f32 1.0, %v3020_v37  ;;  %1627 = vmatpush.bf16.msra.mxu1 %v1620_v31 }
 0x493   :  { %3021 = vrcp.f32 %v1383_v22  ;;  %v1395_v32 = vand.u32 2147483648, %v1383_v22  ;;  %v1393_v4 = vand.u32 2147483647, %v1383_v22  ;;  %vm1389_vm15 = vweird.f32 %v1383_v22 }
 0x495   :  { %1628 = vmatpush.bf16.msra.mxu1 %v1619_v26  ;;  %v1396_v38 = vor.u32 1.1754944e-38, %v1395_v32  ;;  %vm1394_vm0 = vcmp.eq.f32.partialorder %v1393_v4, 8.507059e+37 }
 0x498   :  { %2724 = vmatmul.msk.bf16.vlgmr.msra.gmra.mxu1 %vm462_vm2, %v4452_v17 }
 0x499   :  { %v3022_v30 = vpop.eup %3021 }
 0x49a   :  { %v1385_v60 = vmul.f32 %v3022_v30, %v1383_v22  ;;  %vm1390_vm14 = vweird.f32 %v3022_v30 }
 0x49b   :  { %vm1391_vm3 = vmor %vm1389_vm15, %vm1390_vm14 }
 0x49c   :  { %v1386_v1 = vsub.f32 1.0, %v1385_v60 }
 0x49e   :  { %v1387_v46 = vmul.f32 %v3022_v30, %v1386_v1 }
 0x4a0   :  { %v1388_v16 = vadd.f32 %v3022_v30, %v1387_v46 }
 0x4a2   :  { %v1392_v49 = vsel %vm1391_vm3, %v3022_v30, %v1388_v16 }
 0x4a3   :  { %v1397_v27 = vsel %vm1394_vm0, %v1396_v38, %v1392_v49 }
 0x4a4   :  { %v1400_v21 = vsub.f32 1.0, %v1397_v27  ;;  %v1404_v17 = vrot.slane %v1397_v27, 1  ;;  %v1399_v43 = vmul.f32 %v1397_v27, %v4464_v18  ;;  %v5784_v27 = vld [vmem:[#allocation19_spill] sm:$0xff] }
 0x4a6   :  { %vm1406_vm4 = vcmp.lt.f32.partialorder %v1402_v62, %v1404_v17  ;;  %1411 = vst.msk [vmem:[#allocation2 + $0x2] sm:$0x2] %vm555_vm9, %v1399_v43  ;;  %v4734_v29 = vmul.f32 %v1400_v21, %v4464_v18 }
 0x4a7   :  { %v2715_v6 = vsel %vm1406_vm4, 1.0, %v5728_v59 }
 0x4a8   :  { %v1410_v23 = vmul.f32 %v2715_v6, %v1409_v7  ;;  %2725 = vmatmul.msk.bf16.gmra.mxu1 %vm462_vm2, %v4740_v51 }
 0x4aa   :  { %v1413_v47 = vsub.f32 1.0, %v1410_v23  ;;  %v1424_v33 = vmul.f32 %v1410_v23, %v4704_v55  ;;  %v1416_v36 = vrot.slane %v1410_v23, 7  ;;  %v4746_v42 = vadd.f32 %v1410_v23, %v4470_v12  ;;  %v4764_v12 = vld [vmem:[%s5634_s4 + $0x18] sm:$0xff] }
 0x4ac   :  { %v1414_v18 = vmul.f32 %v1413_v47, %v4476_v5  ;;  %v1423_v10 = vmul.f32 %v1413_v47, %v4474_v50  ;;  %v1418_v3 = vmul.f32 %v1416_v36, %v1399_v43  ;;  %v4771_v50 = vld [vmem:[%s5634_s4 + $0x20] sm:$0xff]  ;;  %v4778_v5 = vld [vmem:[%s5634_s4 + $0x28] sm:$0xff] }
 0x4ad   :  { %v5785_v43 = vld [vmem:[#allocation14_spill] sm:$0xff] }
 0x4ae   :  { %v4750_v11 = vadd.f32 %v1424_v33, %v1423_v10  ;;  %v1420_v63 = vrot.slane %v1418_v3, 1  ;;  %v5786_v3 = vld [vmem:[#allocation17_spill] sm:$0xff] }
 0x4b0   :  { %v4752_v8 = vadd.f32 %v1420_v63, %v1414_v18 }
 0x4b8   :  { %2726 = vmatmul.msk.bf16.gmra.mxu1 %vm462_vm2, %v4757_v15 }
 0x4c8   :  { %2727 = vmatmul.msk.bf16.gmra.mxu1 %vm462_vm2, %v4764_v12 }
 0x4d8   :  { %2728 = vmatmul.msk.bf16.gmra.mxu1 %vm462_vm2, %v4771_v50 }
 0x4e8   :  { %2729 = vmatmul.msk.bf16.gmra.mxu1 %vm462_vm2, %v4778_v5 }
 0x4f8   :  { %2730 = vmatmul.msk.bf16.gmra.mxu1 %vm462_vm2, %v3639_v40 }
 0x515   :  { %v1630_v55 = vpop.f32.mrf.mxu1 }
 0x516   :  { %v1712_v25 = vadd.f32 %v1630_v55, %v5754_v56 }
 0x518   :  { %v2733_v37 = vmul.f32 -1.442695, %v1712_v25 }
 0x51a   :  { %3023 = vpow2.f32 %v2733_v37 }
 0x51d   :  { %v1632_v52 = vpop.f32.mrf.mxu1 }
 0x51e   :  { %v1713_v19 = vadd.f32 %v1632_v52, %v5755_v61 }
 0x520   :  { %v2734_v22 = vmul.f32 -1.442695, %v1713_v19  ;;  %v3024_v32 = vpop.eup %3023 }
 0x521   :  { %v4788_v16 = vadd.f32 1.0, %v3024_v32 }
 0x522   :  { %3025 = vpow2.f32 %v2734_v22 }
 0x523   :  { %vm1737_vm6 = vweird.f32 %v4788_v16 }
 0x525   :  { %v1635_v53 = vpop.f32.mrf.mxu1 }
 0x526   :  { %v1714_v31 = vadd.f32 %v1635_v53, %v5756_v34 }
 0x528   :  { %v2735_v26 = vmul.f32 -1.442695, %v1714_v31  ;;  %v3026_v46 = vpop.eup %3025 }
 0x529   :  { %v4791_v49 = vadd.f32 1.0, %v3026_v46 }
 0x52a   :  { %3027 = vpow2.f32 %v2735_v26 }
 0x52b   :  { %vm1752_vm11 = vweird.f32 %v4791_v49 }
 0x52d   :  { %v1637_v24 = vpop.f32.mrf.mxu1 }
 0x52e   :  { %v1715_v30 = vadd.f32 %v1637_v24, %v5757_v28 }
 0x530   :  { %v2736_v1 = vmul.f32 -1.442695, %v1715_v30  ;;  %v3028_v4 = vpop.eup %3027 }
 0x531   :  { %v4794_v17 = vadd.f32 1.0, %v3028_v4 }
 0x532   :  { %3029 = vpow2.f32 %v2736_v1 }
 0x533   :  { %3031 = vrcp.f32 %v4788_v16  ;;  %vm1767_vm14 = vweird.f32 %v4794_v17 }
 0x534   :  { %3033 = vrcp.f32 %v4791_v49 }
 0x535   :  { %v1640_v35 = vpop.f32.mrf.mxu1  ;;  %3035 = vrcp.f32 %v4794_v17 }
 0x536   :  { %v1792_v38 = vadd.f32 %v1640_v35, %v5758_v39 }
 0x538   :  { %v3030_v6 = vpop.eup %3029  ;;  %v2737_v23 = vmul.f32 -1.442695, %v1792_v38 }
 0x539   :  { %v4800_v36 = vadd.f32 1.0, %v3030_v6  ;;  %v4802_v10 = vpop.eup %3031  ;;  %v1741_v6 = vand.u32 2147483647, %v4788_v16 }
 0x53a   :  { %v4805_v55 = vpop.eup %3033  ;;  %v1733_v31 = vmul.f32 %v4802_v10, %v4788_v16  ;;  %vm1738_vm5 = vweird.f32 %v4802_v10 }
 0x53b   :  { %v4808_v52 = vpop.eup %3035  ;;  %v1748_v1 = vmul.f32 %v4805_v55, %v4791_v49  ;;  %vm4848_vm7 = vcmp.eq.f32.partialorder %v1741_v6, 8.507059e+37  ;;  %vm4870_vm12 = vmor %vm1737_vm6, %vm1738_vm5  ;;  %vm1753_vm13 = vweird.f32 %v4805_v55  ;;  %v1786_v28 = vand.u32 2147483647, %v4800_v36 }
 0x53c   :  { %v1763_v37 = vmul.f32 %v4808_v52, %v4794_v17  ;;  %v1734_v32 = vsub.f32 1.0, %v1733_v31  ;;  %vm1768_vm8 = vweird.f32 %v4808_v52  ;;  %vm4903_vm4 = vmor %vm1752_vm11, %vm1753_vm13  ;;  %v1788_v34 = vand.u32 2147483648, %v4800_v36 }
 0x53d   :  { %v1642_v60 = vpop.f32.mrf.mxu1  ;;  %vm4886_vm15 = vmor %vm1767_vm14, %vm1768_vm8  ;;  %vm1782_vm6 = vweird.f32 %v4800_v36  ;;  %vm1787_vm8 = vcmp.eq.f32.partialorder %v1786_v28, 8.507059e+37 }
 0x53e   :  { %v1793_v62 = vadd.f32 %v1642_v60, %v5784_v27  ;;  %v1764_v4 = vsub.f32 1.0, %v1763_v37 }
 0x540   :  { %v2738_v33 = vmul.f32 -1.442695, %v1793_v62 }
 0x545   :  { %v1645_v21 = vpop.f32.mrf.mxu1 }
 0x546   :  { %v1794_v7 = vadd.f32 %v1645_v21, %v5785_v43  ;;  %v1749_v21 = vsub.f32 1.0, %v1748_v1  ;;  %v1771_v1 = vand.u32 2147483647, %v4794_v17 }
 0x548   :  { %v2739_v47 = vmul.f32 -1.442695, %v1794_v7  ;;  %v1735_v7 = vmul.f32 %v4802_v10, %v1734_v32  ;;  %vm4890_vm3 = vcmp.eq.f32.partialorder %v1771_v1, 8.507059e+37 }
 0x54a   :  { %3037 = vpow2.f32 %v2739_v47  ;;  %v1765_v47 = vmul.f32 %v4808_v52, %v1764_v4  ;;  %v1736_v31 = vadd.f32 %v4802_v10, %v1735_v7 }
 0x54b   :  { %3039 = vpow2.f32 %v2737_v23  ;;  %v1743_v23 = vand.u32 2147483648, %v4788_v16 }
 0x54c   :  { %3041 = vpow2.f32 %v2738_v33  ;;  %v1766_v4 = vadd.f32 %v4808_v52, %v1765_v47  ;;  %v1740_v16 = vsel %vm4870_vm12, %v4802_v10, %v1736_v31 }
 0x54d   :  { %v1647_v18 = vpop.f32.mrf.mxu1  ;;  %3043 = vrcp.f32 %v4800_v36 }
 0x54e   :  { %v1795_v63 = vadd.f32 %v1647_v18, %v5786_v3  ;;  %v1773_v3 = vand.u32 2147483648, %v4794_v17 }
 0x550   :  { %v2740_v53 = vmul.f32 -1.442695, %v1795_v63  ;;  %v3038_v24 = vpop.eup %3037  ;;  %v1756_v63 = vand.u32 2147483647, %v4791_v49  ;;  %v1774_v39 = vor.u32 1.1754944e-38, %v1773_v3 }
 0x551   :  { %v3040_v25 = vpop.eup %3039  ;;  %v4812_v35 = vadd.f32 1.0, %v3038_v24  ;;  %v1750_v24 = vmul.f32 %v4805_v55, %v1749_v21 }
 0x552   :  { %3045 = vpow2.f32 %v2740_v53  ;;  %v3042_v19 = vpop.eup %3041  ;;  %v4818_v26 = vadd.f32 1.0, %v3040_v25  ;;  %v1758_v25 = vand.u32 2147483648, %v4791_v49  ;;  %vm4863_vm10 = vcmp.eq.f32.partialorder %v1756_v63, 8.507059e+37 }
 0x553   :  { %v4816_v22 = vpop.eup %3043  ;;  %v4822_v60 = vadd.f32 1.0, %v3042_v19  ;;  %3047 = vrcp.f32 %v4812_v35  ;;  %v1751_v47 = vadd.f32 %v4805_v55, %v1750_v24  ;;  %v1851_v31 = vand.u32 2147483647, %v4812_v35 }
 0x554   :  { %v1778_v38 = vmul.f32 %v4816_v22, %v4800_v36  ;;  %3049 = vrcp.f32 %v4818_v26  ;;  %vm1783_vm0 = vweird.f32 %v4816_v22  ;;  %vm1817_vm11 = vweird.f32 %v4818_v26 }
 0x555   :  { %v4820_v30 = vpop.f32.mrf.mxu1  ;;  %3051 = vrcp.f32 %v4822_v60  ;;  %v1755_v27 = vsel %vm4903_vm4, %v4805_v55, %v1751_v47  ;;  %vm4921_vm5 = vmor %vm1782_vm6, %vm1783_vm0  ;;  %v1821_v37 = vand.u32 2147483647, %v4818_v26 }
 0x556   :  { %v1779_v33 = vsub.f32 1.0, %v1778_v38 }
 0x558   :  { %v3046_v46 = vpop.eup %3045  ;;  %v1780_v38 = vmul.f32 %v4816_v22, %v1779_v33  ;;  %v1759_v33 = vor.u32 1.1754944e-38, %v1758_v25  ;;  %v1770_v25 = vsel %vm4886_vm15, %v4808_v52, %v1766_v4 }
 0x559   :  { %v4830_v62 = vadd.f32 1.0, %v3046_v46  ;;  %v4839_v53 = vpop.eup %3047  ;;  %v1744_v46 = vor.u32 1.1754944e-38, %v1743_v23  ;;  %v1775_v3 = vsel %vm4890_vm3, %v1774_v39, %v1770_v25  ;;  %v1853_v25 = vand.u32 2147483648, %v4812_v35 }
 0x55a   :  { %v4844_v19 = vpop.eup %3049  ;;  %v1843_v7 = vmul.f32 %v4839_v53, %v4812_v35  ;;  %v1781_v23 = vadd.f32 %v4816_v22, %v1780_v38  ;;  %v1760_v39 = vsel %vm4863_vm10, %v1759_v33, %v1755_v27  ;;  %vm1847_vm10 = vweird.f32 %v4812_v35 }
 0x55b   :  { %3053 = vrcp.f32 %v4830_v62  ;;  %v4853_v32 = vpop.eup %3051  ;;  %v1813_v17 = vmul.f32 %v4844_v19, %v4818_v26  ;;  %vm1818_vm12 = vweird.f32 %v4844_v19  ;;  %vm1848_vm13 = vweird.f32 %v4839_v53 }
 0x55c   :  { %v1828_v63 = vmul.f32 %v4853_v32, %v4822_v60  ;;  %v1844_v10 = vsub.f32 1.0, %v1843_v7  ;;  %v1872_v7 = vadd.f32 %v4820_v30, %v3562_v45  ;;  %v1789_v30 = vor.u32 1.1754944e-38, %v1788_v34  ;;  %vm4955_vm3 = vmor %vm1847_vm10, %vm1848_vm13 }
 0x55d   :  { %v1652_v18 = vpop.f32.mrf.mxu1  ;;  %v1814_v55 = vsub.f32 1.0, %v1813_v17  ;;  %v1838_v34 = vand.u32 2147483648, %v4822_v60  ;;  %vm1833_vm14 = vweird.f32 %v4853_v32  ;;  %vm1862_vm0 = vweird.f32 %v4830_v62 }
 0x55e   :  { %v1873_v52 = vadd.f32 %v1652_v18, %v3565_v48  ;;  %v1829_v49 = vsub.f32 1.0, %v1828_v63  ;;  %v1745_v18 = vsel %vm4848_vm7, %v1744_v46, %v1740_v16  ;;  %v1845_v36 = vmul.f32 %v4839_v53, %v1844_v10 }
 0x55f   :  { %v1823_v46 = vand.u32 2147483648, %v4818_v26  ;;  %v1876_v61 = vmul.f32 %v1872_v7, %v1745_v18  ;;  %v1815_v28 = vmul.f32 %v4844_v19, %v1814_v55  ;;  %vm1832_vm7 = vweird.f32 %v4822_v60 }
 0x560   :  { %v1877_v63 = vmul.f32 %v1873_v52, %v1760_v39  ;;  %v1830_v24 = vmul.f32 %v4853_v32, %v1829_v49  ;;  %v1846_v17 = vadd.f32 %v4839_v53, %v1845_v36  ;;  %v1868_v49 = vand.u32 2147483648, %v4830_v62  ;;  %vm4970_vm4 = vmor %vm1832_vm7, %vm1833_vm14 }
 0x561   :  { %v4858_v21 = vpop.eup %3053  ;;  %v1816_v7 = vadd.f32 %v4844_v19, %v1815_v28  ;;  %v1836_v18 = vand.u32 2147483647, %v4822_v60 }
 0x562   :  { %v1858_v43 = vmul.f32 %v4858_v21, %v4830_v62  ;;  %vm1863_vm15 = vweird.f32 %v4858_v21  ;;  %v1831_v52 = vadd.f32 %v4853_v32, %v1830_v24  ;;  %v1850_v35 = vsel %vm4955_vm3, %v4839_v53, %v1846_v17 }
 0x563   :  { %vm4977_vm6 = vmor %vm1862_vm0, %vm1863_vm15  ;;  %v1839_v53 = vor.u32 1.1754944e-38, %v1838_v34  ;;  %vm1837_vm10 = vcmp.eq.f32.partialorder %v1836_v18, 8.507059e+37 }
 0x564   :  { %v1859_v38 = vsub.f32 1.0, %v1858_v43  ;;  %v1785_v43 = vsel %vm4921_vm5, %v4816_v22, %v1781_v23  ;;  %v1881_v23 = vadd.f32 %v1877_v63, %v3571_v58  ;;  %vm1852_vm5 = vcmp.eq.f32.partialorder %v1851_v31, 8.507059e+37 }
 0x565   :  { %v1655_v1 = vpop.f32.mrf.mxu1  ;;  %v1790_v22 = vsel %vm1787_vm8, %v1789_v30, %v1785_v43  ;;  %vm4989_vm8 = vmor %vm1817_vm11, %vm1818_vm12  ;;  %v1835_v39 = vsel %vm4970_vm4, %v4853_v32, %v1831_v52  ;;  %v1869_v30 = vor.u32 1.1754944e-38, %v1868_v49  ;;  %vm1822_vm11 = vcmp.eq.f32.partialorder %v1821_v37, 8.507059e+37 }
 0x566   :  { %v1874_v4 = vadd.f32 %v1655_v1, %v3479_v44  ;;  %v1860_v16 = vmul.f32 %v4858_v21, %v1859_v38  ;;  %v1880_v1 = vadd.f32 %v1876_v61, %v3569_v57  ;;  %v1824_v61 = vor.u32 1.1754944e-38, %v1823_v46 }
 0x568   :  { %v1878_v47 = vmul.f32 %v1874_v4, %v1775_v3  ;;  %v1861_v27 = vadd.f32 %v4858_v21, %v1860_v16  ;;  %v1866_v3 = vand.u32 2147483647, %v4830_v62  ;;  %v1820_v16 = vsel %vm4989_vm8, %v4844_v19, %v1816_v7 }
 0x569   :  { %v1825_v32 = vsel %vm1822_vm11, %v1824_v61, %v1820_v16 }
 0x56a   :  { %v1882_v6 = vadd.f32 %v1878_v47, %v3446_v9  ;;  %v1854_v47 = vor.u32 1.1754944e-38, %v1853_v25  ;;  %v1865_v36 = vsel %vm4977_vm6, %v4858_v21, %v1861_v27  ;;  %vm1867_vm7 = vcmp.eq.f32.partialorder %v1866_v3, 8.507059e+37 }
 0x56b   :  { %v1870_v24 = vsel %vm1867_vm7, %v1869_v30, %v1865_v36  ;;  %v1896_v3 = vmul.f32 %v1825_v32, %v4721_v13 }
 0x56c   :  { %3055 = vtanh.f32 %v1882_v6  ;;  %v1855_v63 = vsel %vm1852_vm5, %v1854_v47, %v1850_v35  ;;  %v1840_v6 = vsel %vm1837_vm10, %v1839_v53, %v1835_v39  ;;  %v1891_v17 = vsub.f32 1.0, %v1870_v24 }
 0x56d   :  { %v1657_v33 = vpop.f32.mrf.mxu1  ;;  %3057 = vtanh.f32 %v1881_v23  ;;  %v1890_v28 = vsub.f32 1.0, %v1855_v63  ;;  %v1889_v46 = vsub.f32 1.0, %v1840_v6  ;;  %v1899_v37 = vmul.f32 %v1870_v24, %v4713_v41 }
 0x56e   :  { %v1875_v10 = vadd.f32 %v1657_v33, %v3500_v0  ;;  %3059 = vtanh.f32 %v1880_v1  ;;  %v1898_v1 = vmul.f32 %v1855_v63, %v4711_v20 }
 0x570   :  { %v1879_v38 = vmul.f32 %v1875_v10, %v1790_v22  ;;  %v1888_v10 = vsub.f32 1.0, %v1825_v32 }
 0x572   :  { %v1883_v62 = vadd.f32 %v1879_v38, %v3452_v14  ;;  %v3056_v26 = vpop.eup %3055  ;;  %v1897_v38 = vmul.f32 %v1840_v6, %v4719_v2  ;;  %v5024_v2 = vld [vmem:[%s5634_s4] sm:$0xff]  ;;  %v1694_v6 = vsub.f32 1.0, %v4746_v42 }
 0x573   :  { %v3058_v34 = vpop.eup %3057  ;;  %v1894_v25 = vmul.f32 %v3056_v26, %v1890_v28 }
 0x574   :  { %3061 = vtanh.f32 %v1883_v62  ;;  %v3060_v19 = vpop.eup %3059  ;;  %v1893_v27 = vmul.f32 %v3058_v34, %v1889_v46 }
 0x575   :  { %v1660_v21 = vpop.f32.mrf.mxu1  ;;  %v5007_v52 = vadd.f32 %v1898_v1, %v1894_v25  ;;  %v1892_v49 = vmul.f32 %v3060_v19, %v1888_v10 }
 0x576   :  { %v5000_v22 = vadd.f32 %v1660_v21, %v3858_v54  ;;  %v5015_v55 = vadd.f32 %v1897_v38, %v1893_v27  ;;  %v1687_v21 = vld [vmem:[%s5631_s1 + $0x4] sm:$0x1]  ;;  %v5810_v27 = vld [vmem:[#allocation13_spill] sm:$0xff] }
 0x577   :  { %v5017_v41 = vadd.f32 %v1896_v3, %v1892_v49 }
 0x578   :  { %v2731_v33 = vmul.f32 -1.442695, %v5000_v22  ;;  %1697 = vst.msk [vmem:[#allocation4 + $0x4] sm:$0x1] %vm557_vm1, %v5000_v22 }
 0x579   :  { %v1904_v47 = vpack.c.bf16 %v5015_v55, %v5017_v41 }
 0x57a   :  { %v3062_v23 = vpop.eup %3061  ;;  %3063 = vpow2.f32 %v2731_v33 }
 0x57b   :  { %v1895_v31 = vmul.f32 %v3062_v23, %v1891_v17 }
 0x57d   :  { %v5009_v4 = vadd.f32 %v1899_v37, %v1895_v31  ;;  %v1662_v7 = vpop.f32.mrf.mxu1  ;;  %v5809_v37 = vld [vmem:[#allocation15_spill] sm:$0xff] }
 0x57f   :  { %v1905_v35 = vpack.c.bf16 %v5009_v4, %v5007_v52 }
 0x580   :  { %v3064_v18 = vpop.eup %3063 }
 0x581   :  { %v1668_v20 = vadd.f32 1.0, %v3064_v18  ;;  %1912 = vmatpush.bf16.msra.mxu2 %v1905_v35  ;;  %v5811_v35 = vld [vmem:[#allocation16_spill] sm:$0xff] }
 0x583   :  { %3065 = vrcp.f32 %v1668_v20  ;;  %v1680_v53 = vand.u32 2147483648, %v1668_v20  ;;  %v1678_v60 = vand.u32 2147483647, %v1668_v20  ;;  %vm1674_vm13 = vweird.f32 %v1668_v20 }
 0x585   :  { %1913 = vmatpush.bf16.msra.mxu2 %v1904_v47  ;;  %v1681_v30 = vor.u32 1.1754944e-38, %v1680_v53  ;;  %vm1679_vm15 = vcmp.eq.f32.partialorder %v1678_v60, 8.507059e+37  ;;  %v5813_v60 = vld [vmem:[#allocation19_spill] sm:$0xff] }
 0x588   :  { %2741 = vmatmul.msk.bf16.vlgmr.msra.gmra.mxu2 %vm462_vm2, %v5024_v2 }
 0x589   :  { %v3066_v13 = vpop.eup %3065 }
 0x58a   :  { %v1670_v43 = vmul.f32 %v3066_v13, %v1668_v20  ;;  %vm1675_vm12 = vweird.f32 %v3066_v13 }
 0x58b   :  { %vm1676_vm14 = vmor %vm1674_vm13, %vm1675_vm12 }
 0x58c   :  { %v1671_v62 = vsub.f32 1.0, %v1670_v43 }
 0x58e   :  { %v1672_v36 = vmul.f32 %v3066_v13, %v1671_v62  ;;  %v5812_v62 = vld [vmem:[#allocation18_spill] sm:$0xff] }
 0x590   :  { %v1673_v39 = vadd.f32 %v3066_v13, %v1672_v36 }
 0x592   :  { %v1677_v63 = vsel %vm1676_vm14, %v3066_v13, %v1673_v39 }
 0x593   :  { %v1682_v16 = vsel %vm1679_vm15, %v1681_v30, %v1677_v63 }
 0x594   :  { %v1685_v61 = vsub.f32 1.0, %v1682_v16  ;;  %v1689_v26 = vrot.slane %v1682_v16, 1  ;;  %v1684_v24 = vmul.f32 %v1682_v16, %v4734_v29  ;;  %v5814_v16 = vld [vmem:[#allocation14_spill] sm:$0xff] }
 0x596   :  { %vm1691_vm3 = vcmp.lt.f32.partialorder %v1687_v21, %v1689_v26  ;;  %v5034_v28 = vmul.f32 %v1685_v61, %v4734_v29  ;;  %1696 = vst.msk [vmem:[#allocation2 + $0x3] sm:$0x2] %vm555_vm9, %v1684_v24 }
 0x597   :  { %v2732_v32 = vsel %vm1691_vm3, 1.0, %v5728_v59 }
 0x598   :  { %v1695_v34 = vmul.f32 %v2732_v32, %v1694_v6  ;;  %2742 = vmatmul.msk.bf16.gmra.mxu2 %vm462_vm2, %v4740_v51 }
 0x59a   :  { %v1698_v33 = vsub.f32 1.0, %v1695_v34  ;;  %v1709_v19 = vmul.f32 %v1695_v34, %v5000_v22  ;;  %v1701_v17 = vrot.slane %v1695_v34, 7  ;;  %v5042_v25 = vadd.f32 %v1695_v34, %v4746_v42 }
 0x59c   :  { %v1699_v46 = vmul.f32 %v1698_v33, %v4752_v8  ;;  %v1708_v29 = vmul.f32 %v1698_v33, %v4750_v11  ;;  %v1703_v23 = vmul.f32 %v1701_v17, %v1684_v24 }
 0x59e   :  { %v5046_v10 = vadd.f32 %v1709_v19, %v1708_v29  ;;  %v1705_v31 = vrot.slane %v1703_v23, 1  ;;  %v5815_v19 = vld [vmem:[#allocation17_spill] sm:$0xff] }
 0x5a0   :  { %v5048_v1 = vadd.f32 %v1705_v31, %v1699_v46 }
 0x5a8   :  { %2743 = vmatmul.msk.bf16.gmra.mxu2 %vm462_vm2, %v4757_v15 }
 0x5b8   :  { %2744 = vmatmul.msk.bf16.gmra.mxu2 %vm462_vm2, %v4764_v12 }
 0x5c8   :  { %2745 = vmatmul.msk.bf16.gmra.mxu2 %vm462_vm2, %v4771_v50 }
 0x5d8   :  { %2746 = vmatmul.msk.bf16.gmra.mxu2 %vm462_vm2, %v4778_v5 }
 0x5e8   :  { %2747 = vmatmul.msk.bf16.gmra.mxu2 %vm462_vm2, %v3639_v40 }
 0x60b   :  { %v1915_v51 = vpop.f32.mrf.mxu2 }
 0x60c   :  { %v1997_v22 = vadd.f32 %v1915_v51, %v5754_v56 }
 0x60e   :  { %v2750_v38 = vmul.f32 -1.442695, %v1997_v22 }
 0x610   :  { %3067 = vpow2.f32 %v2750_v38 }
 0x613   :  { %v1917_v42 = vpop.f32.mrf.mxu2 }
 0x614   :  { %v1998_v15 = vadd.f32 %v1917_v42, %v5809_v37 }
 0x616   :  { %v2751_v7 = vmul.f32 -1.442695, %v1998_v15  ;;  %v3068_v20 = vpop.eup %3067 }
 0x617   :  { %v5064_v43 = vadd.f32 1.0, %v3068_v20 }
 0x618   :  { %3069 = vpow2.f32 %v2751_v7 }
 0x619   :  { %vm2022_vm0 = vweird.f32 %v5064_v43 }
 0x61b   :  { %v1920_v11 = vpop.f32.mrf.mxu2 }
 0x61c   :  { %v1999_v49 = vadd.f32 %v1920_v11, %v5810_v27 }
 0x61e   :  { %v2752_v50 = vmul.f32 -1.442695, %v1999_v49  ;;  %v3070_v47 = vpop.eup %3069 }
 0x61f   :  { %v5067_v36 = vadd.f32 1.0, %v3070_v47 }
 0x620   :  { %3071 = vpow2.f32 %v2752_v50 }
 0x621   :  { %vm2037_vm8 = vweird.f32 %v5067_v36 }
 0x623   :  { %v1922_v8 = vpop.f32.mrf.mxu2 }
 0x624   :  { %v2000_v3 = vadd.f32 %v1922_v8, %v5811_v35 }
 0x626   :  { %v2753_v18 = vmul.f32 -1.442695, %v2000_v3  ;;  %v3072_v13 = vpop.eup %3071 }
 0x627   :  { %v5070_v63 = vadd.f32 1.0, %v3072_v13 }
 0x628   :  { %3073 = vpow2.f32 %v2753_v18 }
 0x629   :  { %3075 = vrcp.f32 %v5064_v43  ;;  %vm2052_vm12 = vweird.f32 %v5070_v63 }
 0x62a   :  { %3077 = vrcp.f32 %v5067_v36 }
 0x62b   :  { %v1925_v12 = vpop.f32.mrf.mxu2  ;;  %3079 = vrcp.f32 %v5070_v63 }
 0x62c   :  { %v2077_v53 = vadd.f32 %v1925_v12, %v5812_v62 }
 0x62e   :  { %v3074_v61 = vpop.eup %3073  ;;  %v2754_v26 = vmul.f32 -1.442695, %v2077_v53  ;;  %v2026_v53 = vand.u32 2147483647, %v5064_v43 }
 0x62f   :  { %v5076_v32 = vadd.f32 1.0, %v3074_v61  ;;  %v5078_v33 = vpop.eup %3075 }
 0x630   :  { %v5081_v46 = vpop.eup %3077  ;;  %v2018_v11 = vmul.f32 %v5078_v33, %v5064_v43  ;;  %vm2023_vm4 = vweird.f32 %v5078_v33  ;;  %vm5124_vm6 = vcmp.eq.f32.partialorder %v2026_v53, 8.507059e+37 }
 0x631   :  { %v5084_v29 = vpop.eup %3079  ;;  %v2033_v7 = vmul.f32 %v5081_v46, %v5067_v36  ;;  %vm5146_vm10 = vmor %vm2022_vm0, %vm2023_vm4  ;;  %vm2038_vm11 = vweird.f32 %v5081_v46  ;;  %vm2067_vm0 = vweird.f32 %v5076_v32 }
 0x632   :  { %v2048_v22 = vmul.f32 %v5084_v29, %v5070_v63  ;;  %v2019_v50 = vsub.f32 1.0, %v2018_v11  ;;  %vm2053_vm5 = vweird.f32 %v5084_v29  ;;  %vm5179_vm3 = vmor %vm2037_vm8, %vm2038_vm11 }
 0x633   :  { %v1927_v5 = vpop.f32.mrf.mxu2  ;;  %v2034_v47 = vsub.f32 1.0, %v2033_v7  ;;  %vm5162_vm13 = vmor %vm2052_vm12, %vm2053_vm5 }
 0x634   :  { %v2078_v39 = vadd.f32 %v1927_v5, %v5813_v60  ;;  %v2049_v5 = vsub.f32 1.0, %v2048_v22  ;;  %v2020_v13 = vmul.f32 %v5078_v33, %v2019_v50 }
 0x636   :  { %v2755_v6 = vmul.f32 -1.442695, %v2078_v39  ;;  %v2028_v39 = vand.u32 2147483648, %v5064_v43 }
 0x638   :  { %v2029_v11 = vor.u32 1.1754944e-38, %v2028_v39 }
 0x63b   :  { %v1930_v30 = vpop.f32.mrf.mxu2 }
 0x63c   :  { %v2079_v21 = vadd.f32 %v1930_v30, %v5814_v16  ;;  %v2050_v30 = vmul.f32 %v5084_v29, %v2049_v5  ;;  %v2073_v16 = vand.u32 2147483648, %v5076_v32 }
 0x63e   :  { %v2756_v24 = vmul.f32 -1.442695, %v2079_v21  ;;  %v2051_v22 = vadd.f32 %v5084_v29, %v2050_v30 }
 0x640   :  { %3081 = vpow2.f32 %v2756_v24 }
 0x641   :  { %3083 = vpow2.f32 %v2754_v26  ;;  %v2041_v26 = vand.u32 2147483647, %v5067_v36 }
 0x642   :  { %3085 = vpow2.f32 %v2755_v6  ;;  %v2035_v6 = vmul.f32 %v5081_v46, %v2034_v47 }
 0x643   :  { %v1932_v34 = vpop.f32.mrf.mxu2  ;;  %3087 = vrcp.f32 %v5076_v32  ;;  %vm5139_vm7 = vcmp.eq.f32.partialorder %v2041_v26, 8.507059e+37 }
 0x644   :  { %v2080_v17 = vadd.f32 %v1932_v34, %v5815_v19  ;;  %v2043_v34 = vand.u32 2147483648, %v5067_v36  ;;  %v2071_v19 = vand.u32 2147483647, %v5076_v32 }
 0x646   :  { %v2757_v23 = vmul.f32 -1.442695, %v2080_v17  ;;  %v3082_v31 = vpop.eup %3081  ;;  %v2044_v53 = vor.u32 1.1754944e-38, %v2043_v34  ;;  %vm2072_vm5 = vcmp.eq.f32.partialorder %v2071_v19, 8.507059e+37 }
 0x647   :  { %v3084_v51 = vpop.eup %3083  ;;  %v5088_v8 = vadd.f32 1.0, %v3082_v31 }
 0x648   :  { %3089 = vpow2.f32 %v2757_v23  ;;  %v3086_v42 = vpop.eup %3085  ;;  %v5094_v49 = vadd.f32 1.0, %v3084_v51  ;;  %v2021_v23 = vadd.f32 %v5078_v33, %v2020_v13  ;;  %v2056_v51 = vand.u32 2147483647, %v5070_v63 }
 0x649   :  { %v5092_v15 = vpop.eup %3087  ;;  %v5098_v38 = vadd.f32 1.0, %v3086_v42  ;;  %3091 = vrcp.f32 %v5088_v8  ;;  %v2036_v13 = vadd.f32 %v5081_v46, %v2035_v6  ;;  %v2055_v6 = vsel %vm5162_vm13, %v5084_v29, %v2051_v22 }
 0x64a   :  { %v2063_v18 = vmul.f32 %v5092_v15, %v5076_v32  ;;  %3093 = vrcp.f32 %v5094_v49  ;;  %v2025_v43 = vsel %vm5146_vm10, %v5078_v33, %v2021_v23  ;;  %vm5166_vm14 = vcmp.eq.f32.partialorder %v2056_v51, 8.507059e+37 }
 0x64b   :  { %v5096_v12 = vpop.f32.mrf.mxu2  ;;  %3095 = vrcp.f32 %v5098_v38  ;;  %vm2068_vm15 = vweird.f32 %v5092_v15  ;;  %v2040_v29 = vsel %vm5179_vm3, %v5081_v46, %v2036_v13  ;;  %vm2102_vm8 = vweird.f32 %v5094_v49 }
 0x64c   :  { %v2064_v21 = vsub.f32 1.0, %v2063_v18  ;;  %v2058_v18 = vand.u32 2147483648, %v5070_v63  ;;  %vm5197_vm4 = vmor %vm2067_vm0, %vm2068_vm15  ;;  %v2106_v31 = vand.u32 2147483647, %v5094_v49 }
 0x64e   :  { %v3090_v3 = vpop.eup %3089  ;;  %v2065_v7 = vmul.f32 %v5092_v15, %v2064_v21  ;;  %v2059_v47 = vor.u32 1.1754944e-38, %v2058_v18  ;;  %v2157_v21 = vadd.f32 %v5096_v12, %v3562_v45 }
 0x64f   :  { %v5106_v20 = vadd.f32 1.0, %v3090_v3  ;;  %v5115_v24 = vpop.eup %3091 }
 0x650   :  { %v5120_v17 = vpop.eup %3093  ;;  %v2128_v3 = vmul.f32 %v5115_v24, %v5088_v8  ;;  %v2066_v34 = vadd.f32 %v5092_v15, %v2065_v7  ;;  %v2060_v18 = vsel %vm5166_vm14, %v2059_v47, %v2055_v6  ;;  %vm2133_vm11 = vweird.f32 %v5115_v24 }
 0x651   :  { %3097 = vrcp.f32 %v5106_v20  ;;  %v5129_v42 = vpop.eup %3095  ;;  %v2098_v63 = vmul.f32 %v5120_v17, %v5094_v49  ;;  %vm2103_vm10 = vweird.f32 %v5120_v17  ;;  %vm2147_vm15 = vweird.f32 %v5106_v20 }
 0x652   :  { %v2113_v39 = vmul.f32 %v5129_v42, %v5098_v38  ;;  %v2129_v33 = vsub.f32 1.0, %v2128_v3  ;;  %v2070_v32 = vsel %vm5197_vm4, %v5092_v15, %v2066_v34  ;;  %vm2118_vm12 = vweird.f32 %v5129_v42 }
 0x653   :  { %v1937_v61 = vpop.f32.mrf.mxu2  ;;  %v2099_v46 = vsub.f32 1.0, %v2098_v63  ;;  %v2138_v34 = vand.u32 2147483648, %v5088_v8 }
 0x654   :  { %v2158_v22 = vadd.f32 %v1937_v61, %v3565_v48  ;;  %v2114_v36 = vsub.f32 1.0, %v2113_v39  ;;  %v2030_v61 = vsel %vm5124_vm6, %v2029_v11, %v2025_v43  ;;  %v2130_v12 = vmul.f32 %v5115_v24, %v2129_v33 }
 0x655   :  { %v2045_v39 = vsel %vm5139_vm7, %v2044_v53, %v2040_v29  ;;  %v2108_v11 = vand.u32 2147483648, %v5094_v49  ;;  %v2161_v60 = vmul.f32 %v2157_v21, %v2030_v61  ;;  %v2100_v19 = vmul.f32 %v5120_v17, %v2099_v46 }
 0x656   :  { %v2162_v26 = vmul.f32 %v2158_v22, %v2045_v39  ;;  %v2115_v63 = vmul.f32 %v5129_v42, %v2114_v36  ;;  %vm2117_vm6 = vweird.f32 %v5098_v38  ;;  %vm2132_vm7 = vweird.f32 %v5088_v8 }
 0x657   :  { %v5134_v50 = vpop.eup %3097  ;;  %v2131_v6 = vadd.f32 %v5115_v24, %v2130_v12  ;;  %v2165_v47 = vadd.f32 %v2161_v60, %v3569_v57  ;;  %vm5231_vm14 = vmor %vm2132_vm7, %vm2133_vm11  ;;  %v2153_v36 = vand.u32 2147483648, %v5106_v20  ;;  %v2101_v21 = vadd.f32 %v5120_v17, %v2100_v19 }
 0x658   :  { %v2143_v30 = vmul.f32 %v5134_v50, %v5106_v20  ;;  %v2166_v33 = vadd.f32 %v2162_v26, %v3571_v58  ;;  %vm2148_vm13 = vweird.f32 %v5134_v50  ;;  %v2116_v22 = vadd.f32 %v5129_v42, %v2115_v63  ;;  %vm5246_vm3 = vmor %vm2117_vm6, %vm2118_vm12 }
 0x659   :  { %v2121_v61 = vand.u32 2147483647, %v5098_v38  ;;  %vm5253_vm0 = vmor %vm2147_vm15, %vm2148_vm13  ;;  %v2109_v60 = vor.u32 1.1754944e-38, %v2108_v11 }
 0x65a   :  { %v2144_v3 = vsub.f32 1.0, %v2143_v30  ;;  %v2074_v30 = vor.u32 1.1754944e-38, %v2073_v16  ;;  %v2123_v16 = vand.u32 2147483648, %v5098_v38  ;;  %v2120_v39 = vsel %vm5246_vm3, %v5129_v42, %v2116_v22 }
 0x65b   :  { %v1940_v51 = vpop.f32.mrf.mxu2  ;;  %vm2122_vm7 = vcmp.eq.f32.partialorder %v2121_v61, 8.507059e+37 }
 0x65c   :  { %v2159_v7 = vadd.f32 %v1940_v51, %v3479_v44  ;;  %v2145_v43 = vmul.f32 %v5134_v50, %v2144_v3  ;;  %v2075_v15 = vsel %vm2072_vm5, %v2074_v30, %v2070_v32  ;;  %v2136_v51 = vand.u32 2147483647, %v5088_v8  ;;  %vm5265_vm5 = vmor %vm2102_vm8, %vm2103_vm10 }
 0x65d   :  { %v2135_v8 = vsel %vm5231_vm14, %v5115_v24, %v2131_v6  ;;  %v2124_v24 = vor.u32 1.1754944e-38, %v2123_v16  ;;  %v2154_v30 = vor.u32 1.1754944e-38, %v2153_v36  ;;  %vm2107_vm8 = vcmp.eq.f32.partialorder %v2106_v31, 8.507059e+37 }
 0x65e   :  { %v2163_v13 = vmul.f32 %v2159_v7, %v2060_v18  ;;  %v2146_v29 = vadd.f32 %v5134_v50, %v2145_v43  ;;  %v2151_v18 = vand.u32 2147483647, %v5106_v20  ;;  %vm2137_vm4 = vcmp.eq.f32.partialorder %v2136_v51, 8.507059e+37 }
 0x65f   :  { %v2105_v43 = vsel %vm5265_vm5, %v5120_v17, %v2101_v21 }
 0x660   :  { %v2167_v5 = vadd.f32 %v2163_v13, %v3446_v9  ;;  %v2139_v13 = vor.u32 1.1754944e-38, %v2138_v34  ;;  %v2150_v12 = vsel %vm5253_vm0, %v5134_v50, %v2146_v29  ;;  %vm2152_vm6 = vcmp.eq.f32.partialorder %v2151_v18, 8.507059e+37 }
 0x661   :  { %v2155_v63 = vsel %vm2152_vm6, %v2154_v30, %v2150_v12  ;;  %v2110_v42 = vsel %vm2107_vm8, %v2109_v60, %v2105_v43  ;;  %v1972_v43 = vld [vmem:[%s5631_s1 + $0x5] sm:$0x1] }
 0x662   :  { %3099 = vtanh.f32 %v2167_v5  ;;  %v2140_v26 = vsel %vm2137_vm4, %v2139_v13, %v2135_v8  ;;  %v2125_v5 = vsel %vm2122_vm7, %v2124_v24, %v2120_v39  ;;  %v2176_v6 = vsub.f32 1.0, %v2155_v63 }
 0x663   :  { %v1942_v53 = vpop.f32.mrf.mxu2  ;;  %3101 = vtanh.f32 %v2166_v33  ;;  %v2175_v19 = vsub.f32 1.0, %v2140_v26  ;;  %v2174_v11 = vsub.f32 1.0, %v2125_v5  ;;  %v2184_v31 = vmul.f32 %v2155_v63, %v5009_v4 }
 0x664   :  { %v2160_v23 = vadd.f32 %v1942_v53, %v3500_v0  ;;  %3103 = vtanh.f32 %v2165_v47  ;;  %v2183_v47 = vmul.f32 %v2140_v26, %v5007_v52  ;;  %v2181_v18 = vmul.f32 %v2110_v42, %v5017_v41 }
 0x666   :  { %v2164_v3 = vmul.f32 %v2160_v23, %v2075_v15  ;;  %v2173_v23 = vsub.f32 1.0, %v2110_v42  ;;  %v5312_v42 = vld [vmem:[%s5634_s4 + $0x8] sm:$0xff] }
 0x668   :  { %v2168_v20 = vadd.f32 %v2164_v3, %v3452_v14  ;;  %v3100_v49 = vpop.eup %3099  ;;  %v2182_v3 = vmul.f32 %v2125_v5, %v5015_v55 }
 0x669   :  { %v3102_v16 = vpop.eup %3101  ;;  %v2179_v34 = vmul.f32 %v3100_v49, %v2175_v19  ;;  %v1979_v49 = vsub.f32 1.0, %v5042_v25 }
 0x66a   :  { %3105 = vtanh.f32 %v2168_v20  ;;  %v3104_v17 = vpop.eup %3103  ;;  %v2178_v29 = vmul.f32 %v3102_v16, %v2174_v11 }
 0x66b   :  { %v1945_v50 = vpop.f32.mrf.mxu2  ;;  %v5283_v22 = vadd.f32 %v2183_v47, %v2179_v34  ;;  %v2177_v36 = vmul.f32 %v3104_v17, %v2173_v23  ;;  %v5329_v47 = vld [vmem:[%s5634_s4 + $0x10] sm:$0xff] }
 0x66c   :  { %v5276_v15 = vadd.f32 %v1945_v50, %v3858_v54  ;;  %v5291_v46 = vadd.f32 %v2182_v3, %v2178_v29 }
 0x66d   :  { %v5293_v4 = vadd.f32 %v2181_v18, %v2177_v36 }
 0x66e   :  { %v2748_v53 = vmul.f32 -1.442695, %v5276_v15  ;;  %1982 = vst.msk [vmem:[#allocation4 + $0x5] sm:$0x1] %vm557_vm1, %v5276_v15 }
 0x66f   :  { %v2189_v13 = vpack.c.bf16 %v5291_v46, %v5293_v4 }
 0x670   :  { %v3106_v33 = vpop.eup %3105  ;;  %3107 = vpow2.f32 %v2748_v53 }
 0x671   :  { %v2180_v51 = vmul.f32 %v3106_v33, %v2176_v6 }
 0x673   :  { %v5285_v7 = vadd.f32 %v2184_v31, %v2180_v51  ;;  %v1947_v21 = vpop.f32.mrf.mxu2 }
 0x675   :  { %v2190_v8 = vpack.c.bf16 %v5285_v7, %v5283_v22 }
 0x676   :  { %v3108_v61 = vpop.eup %3107 }
 0x677   :  { %v1953_v52 = vadd.f32 1.0, %v3108_v61  ;;  %2197 = vmatpush.bf16.msra.mxu3 %v2190_v8 }
 0x679   :  { %3109 = vrcp.f32 %v1953_v52  ;;  %v1965_v24 = vand.u32 2147483648, %v1953_v52  ;;  %v1963_v12 = vand.u32 2147483647, %v1953_v52  ;;  %vm1959_vm11 = vweird.f32 %v1953_v52 }
 0x67b   :  { %2198 = vmatpush.bf16.msra.mxu3 %v2189_v13  ;;  %v1966_v39 = vor.u32 1.1754944e-38, %v1965_v24  ;;  %vm1964_vm13 = vcmp.eq.f32.partialorder %v1963_v12, 8.507059e+37 }
 0x67e   :  { %2758 = vmatmul.msk.bf16.vlgmr.msra.gmra.mxu3 %vm462_vm2, %v5024_v2 }
 0x67f   :  { %v3110_v55 = vpop.eup %3109 }
 0x680   :  { %v1955_v32 = vmul.f32 %v3110_v55, %v1953_v52  ;;  %vm1960_vm10 = vweird.f32 %v3110_v55 }
 0x681   :  { %vm1961_vm12 = vmor %vm1959_vm11, %vm1960_vm10 }
 0x682   :  { %v1956_v20 = vsub.f32 1.0, %v1955_v32 }
 0x684   :  { %v1957_v41 = vmul.f32 %v3110_v55, %v1956_v20 }
 0x686   :  { %v1958_v38 = vadd.f32 %v3110_v55, %v1957_v41 }
 0x688   :  { %v1962_v30 = vsel %vm1961_vm12, %v3110_v55, %v1958_v38  ;;  %v5838_v38 = vld [vmem:[#allocation19_spill] sm:$0xff] }
 0x689   :  { %v1967_v26 = vsel %vm1964_vm13, %v1966_v39, %v1962_v30 }
 0x68a   :  { %v1969_v2 = vmul.f32 %v1967_v26, %v5034_v28  ;;  %v1970_v50 = vsub.f32 1.0, %v1967_v26  ;;  %v1974_v60 = vrot.slane %v1967_v26, 1 }
 0x68c   :  { %vm1976_vm14 = vcmp.lt.f32.partialorder %v1972_v43, %v1974_v60  ;;  %1981 = vst.msk [vmem:[#allocation2 + $0x4] sm:$0x2] %vm555_vm9, %v1969_v2  ;;  %v5306_v63 = vmul.f32 %v1970_v50, %v5034_v28 }
 0x68d   :  { %v2749_v5 = vsel %vm1976_vm14, 1.0, %v5728_v59 }
 0x68e   :  { %v1980_v19 = vmul.f32 %v2749_v5, %v1979_v49  ;;  %2759 = vmatmul.msk.bf16.gmra.mxu3 %vm462_vm2, %v5312_v42 }
 0x690   :  { %v1983_v16 = vsub.f32 1.0, %v1980_v19  ;;  %v1994_v53 = vmul.f32 %v1980_v19, %v5276_v15  ;;  %v5318_v17 = vadd.f32 %v1980_v19, %v5042_v25  ;;  %v1986_v6 = vrot.slane %v1980_v19, 7  ;;  %v5336_v25 = vld [vmem:[%s5634_s4 + $0x18] sm:$0xff] }
 0x692   :  { %v1984_v28 = vmul.f32 %v1983_v16, %v5048_v1  ;;  %v1993_v34 = vmul.f32 %v1983_v16, %v5046_v10  ;;  %v1988_v11 = vmul.f32 %v1986_v6, %v1969_v2  ;;  %v5343_v10 = vld [vmem:[%s5634_s4 + $0x20] sm:$0xff]  ;;  %v5350_v1 = vld [vmem:[%s5634_s4 + $0x28] sm:$0xff] }
 0x693   :  { %v5840_v16 = vld [vmem:[#allocation17_spill] sm:$0xff] }
 0x694   :  { %v5322_v33 = vadd.f32 %v1994_v53, %v1993_v34  ;;  %v1990_v23 = vrot.slane %v1988_v11, 1 }
 0x696   :  { %v5324_v51 = vadd.f32 %v1990_v23, %v1984_v28 }
 0x69e   :  { %2760 = vmatmul.msk.bf16.gmra.mxu3 %vm462_vm2, %v5329_v47 }
 0x6ae   :  { %2761 = vmatmul.msk.bf16.gmra.mxu3 %vm462_vm2, %v5336_v25 }
 0x6be   :  { %2762 = vmatmul.msk.bf16.gmra.mxu3 %vm462_vm2, %v5343_v10 }
 0x6ce   :  { %2763 = vmatmul.msk.bf16.gmra.mxu3 %vm462_vm2, %v5350_v1 }
 0x6de   :  { %2764 = vmatmul.msk.bf16.gmra.mxu3 %vm462_vm2, %v3639_v40 }
 0x701   :  { %v2200_v15 = vpop.f32.mrf.mxu3 }
 0x702   :  { %v2282_v3 = vadd.f32 %v2200_v15, %v5754_v56 }
 0x704   :  { %v2767_v61 = vmul.f32 -1.442695, %v2282_v3 }
 0x706   :  { %3111 = vpow2.f32 %v2767_v61 }
 0x709   :  { %v2202_v31 = vpop.f32.mrf.mxu3 }
 0x70a   :  { %v2283_v21 = vadd.f32 %v2202_v31, %v5809_v37 }
 0x70c   :  { %v2768_v52 = vmul.f32 -1.442695, %v2283_v21  ;;  %v3112_v24 = vpop.eup %3111 }
 0x70d   :  { %v5360_v56 = vadd.f32 1.0, %v3112_v24 }
 0x70e   :  { %3113 = vpow2.f32 %v2768_v52 }
 0x70f   :  { %vm2307_vm15 = vweird.f32 %v5360_v56 }
 0x711   :  { %v2205_v29 = vpop.f32.mrf.mxu3 }
 0x712   :  { %v2284_v8 = vadd.f32 %v2205_v29, %v5810_v27 }
 0x714   :  { %v2769_v13 = vmul.f32 -1.442695, %v2284_v8  ;;  %v3114_v41 = vpop.eup %3113 }
 0x715   :  { %v5363_v27 = vadd.f32 1.0, %v3114_v41 }
 0x716   :  { %3115 = vpow2.f32 %v2769_v13 }
 0x717   :  { %vm2322_vm5 = vweird.f32 %v5363_v27 }
 0x719   :  { %v2207_v36 = vpop.f32.mrf.mxu3 }
 0x71a   :  { %v2285_v55 = vadd.f32 %v2207_v36, %v5811_v35  ;;  %v5839_v35 = vld [vmem:[#allocation14_spill] sm:$0xff] }
 0x71c   :  { %v2770_v20 = vmul.f32 -1.442695, %v2285_v55  ;;  %v3116_v12 = vpop.eup %3115 }
 0x71d   :  { %v5366_v26 = vadd.f32 1.0, %v3116_v12  ;;  %v2311_v12 = vand.u32 2147483647, %v5360_v56 }
 0x71e   :  { %3117 = vpow2.f32 %v2770_v20 }
 0x71f   :  { %3119 = vrcp.f32 %v5360_v56  ;;  %vm5420_vm0 = vcmp.eq.f32.partialorder %v2311_v12, 8.507059e+37  ;;  %vm2337_vm10 = vweird.f32 %v5366_v26 }
 0x720   :  { %3121 = vrcp.f32 %v5363_v27 }
 0x721   :  { %v2210_v18 = vpop.f32.mrf.mxu3  ;;  %3123 = vrcp.f32 %v5366_v26 }
 0x722   :  { %v2362_v37 = vadd.f32 %v2210_v18, %v5812_v62 }
 0x724   :  { %v3118_v2 = vpop.eup %3117  ;;  %v2771_v50 = vmul.f32 -1.442695, %v2362_v37  ;;  %v2313_v37 = vand.u32 2147483648, %v5360_v56 }
 0x725   :  { %v5372_v62 = vadd.f32 1.0, %v3118_v2  ;;  %v5374_v19 = vpop.eup %3119 }
 0x726   :  { %v5377_v6 = vpop.eup %3121  ;;  %v2303_v31 = vmul.f32 %v5374_v19, %v5360_v56  ;;  %vm2308_vm3 = vweird.f32 %v5374_v19 }
 0x727   :  { %v5380_v28 = vpop.eup %3123  ;;  %v2318_v61 = vmul.f32 %v5377_v6, %v5363_v27  ;;  %vm5442_vm7 = vmor %vm2307_vm15, %vm2308_vm3  ;;  %vm2323_vm8 = vweird.f32 %v5377_v6  ;;  %vm2352_vm15 = vweird.f32 %v5372_v62 }
 0x728   :  { %v2333_v36 = vmul.f32 %v5380_v28, %v5366_v26  ;;  %v2304_v52 = vsub.f32 1.0, %v2303_v31  ;;  %vm2338_vm4 = vweird.f32 %v5380_v28  ;;  %vm5475_vm14 = vmor %vm2322_vm5, %vm2323_vm8 }
 0x729   :  { %v2212_v32 = vpop.f32.mrf.mxu3  ;;  %v2319_v24 = vsub.f32 1.0, %v2318_v61  ;;  %v2343_v61 = vand.u32 2147483648, %v5366_v26  ;;  %vm5458_vm11 = vmor %vm2337_vm10, %vm2338_vm4 }
 0x72a   :  { %v2363_v39 = vadd.f32 %v2212_v32, %v5838_v38  ;;  %v2334_v55 = vsub.f32 1.0, %v2333_v36  ;;  %v2305_v41 = vmul.f32 %v5374_v19, %v2304_v52 }
 0x72b   :  { %v2320_v2 = vmul.f32 %v5377_v6, %v2319_v24 }
 0x72c   :  { %v2772_v49 = vmul.f32 -1.442695, %v2363_v39  ;;  %v2335_v38 = vmul.f32 %v5380_v28, %v2334_v55 }
 0x731   :  { %v2215_v30 = vpop.f32.mrf.mxu3 }
 0x732   :  { %v2364_v43 = vadd.f32 %v2215_v30, %v5839_v35  ;;  %v2326_v35 = vand.u32 2147483647, %v5363_v27 }
 0x734   :  { %v2773_v60 = vmul.f32 -1.442695, %v2364_v43  ;;  %vm5435_vm6 = vcmp.eq.f32.partialorder %v2326_v35, 8.507059e+37 }
 0x736   :  { %3125 = vpow2.f32 %v2773_v60 }
 0x737   :  { %3127 = vpow2.f32 %v2771_v50  ;;  %v2328_v50 = vand.u32 2147483648, %v5363_v27 }
 0x738   :  { %3129 = vpow2.f32 %v2772_v49  ;;  %v2306_v49 = vadd.f32 %v5374_v19, %v2305_v41 }
 0x739   :  { %v2217_v5 = vpop.f32.mrf.mxu3  ;;  %3131 = vrcp.f32 %v5372_v62  ;;  %v2329_v55 = vor.u32 1.1754944e-38, %v2328_v50  ;;  %v2356_v50 = vand.u32 2147483647, %v5372_v62 }
 0x73a   :  { %v2365_v53 = vadd.f32 %v2217_v5, %v5840_v16  ;;  %v2341_v16 = vand.u32 2147483647, %v5366_v26  ;;  %v2310_v56 = vsel %vm5442_vm7, %v5374_v19, %v2306_v49  ;;  %v2358_v49 = vand.u32 2147483648, %v5372_v62 }
 0x73b   :  { %vm2357_vm4 = vcmp.eq.f32.partialorder %v2356_v50, 8.507059e+37 }
 0x73c   :  { %v2774_v34 = vmul.f32 -1.442695, %v2365_v53  ;;  %v3126_v11 = vpop.eup %3125  ;;  %vm5462_vm12 = vcmp.eq.f32.partialorder %v2341_v16, 8.507059e+37 }
 0x73d   :  { %v3128_v23 = vpop.eup %3127  ;;  %v5384_v29 = vadd.f32 1.0, %v3126_v11  ;;  %v2336_v11 = vadd.f32 %v5380_v28, %v2335_v38 }
 0x73e   :  { %3133 = vpow2.f32 %v2774_v34  ;;  %v3130_v15 = vpop.eup %3129  ;;  %v5390_v21 = vadd.f32 1.0, %v3128_v23  ;;  %v2314_v34 = vor.u32 1.1754944e-38, %v2313_v37 }
 0x73f   :  { %v5388_v3 = vpop.eup %3131  ;;  %v5394_v18 = vadd.f32 1.0, %v3130_v15  ;;  %3135 = vrcp.f32 %v5384_v29  ;;  %v2340_v37 = vsel %vm5458_vm11, %v5380_v28, %v2336_v11 }
 0x740   :  { %v2348_v32 = vmul.f32 %v5388_v3, %v5372_v62  ;;  %3137 = vrcp.f32 %v5390_v21  ;;  %vm2353_vm13 = vweird.f32 %v5388_v3  ;;  %vm2387_vm5 = vweird.f32 %v5390_v21 }
 0x741   :  { %v5392_v8 = vpop.f32.mrf.mxu3  ;;  %3139 = vrcp.f32 %v5394_v18  ;;  %vm5493_vm3 = vmor %vm2352_vm15, %vm2353_vm13  ;;  %v2391_v5 = vand.u32 2147483647, %v5390_v21  ;;  %v2408_v41 = vand.u32 2147483648, %v5394_v18 }
 0x742   :  { %v2349_v39 = vsub.f32 1.0, %v2348_v32 }
 0x744   :  { %v3134_v13 = vpop.eup %3133  ;;  %v2350_v23 = vmul.f32 %v5388_v3, %v2349_v39 }
 0x745   :  { %v5402_v20 = vadd.f32 1.0, %v3134_v13  ;;  %v5411_v43 = vpop.eup %3135  ;;  %v2321_v13 = vadd.f32 %v5377_v6, %v2320_v2  ;;  %v2344_v2 = vor.u32 1.1754944e-38, %v2343_v61 }
 0x746   :  { %v5416_v60 = vpop.eup %3137  ;;  %v2413_v31 = vmul.f32 %v5411_v43, %v5384_v29  ;;  %v2351_v38 = vadd.f32 %v5388_v3, %v2350_v23  ;;  %vm2418_vm8 = vweird.f32 %v5411_v43 }
 0x747   :  { %3141 = vrcp.f32 %v5402_v20  ;;  %v5425_v53 = vpop.eup %3139  ;;  %v2383_v26 = vmul.f32 %v5416_v60, %v5390_v21  ;;  %v2325_v28 = vsel %vm5475_vm14, %v5377_v6, %v2321_v13  ;;  %v2345_v61 = vsel %vm5462_vm12, %v2344_v2, %v2340_v37 }
 0x748   :  { %v2398_v32 = vmul.f32 %v5425_v53, %v5394_v18  ;;  %v2414_v19 = vsub.f32 1.0, %v2413_v31  ;;  %v2442_v31 = vadd.f32 %v5392_v8, %v3562_v45  ;;  %v2355_v62 = vsel %vm5493_vm3, %v5388_v3, %v2351_v38 }
 0x749   :  { %v2222_v30 = vpop.f32.mrf.mxu3  ;;  %v2384_v6 = vsub.f32 1.0, %v2383_v26  ;;  %v2330_v8 = vsel %vm5435_vm6, %v2329_v55, %v2325_v28  ;;  %vm2388_vm7 = vweird.f32 %v5416_v60  ;;  %vm2417_vm6 = vweird.f32 %v5384_v29 }
 0x74a   :  { %v2443_v16 = vadd.f32 %v2222_v30, %v3565_v48  ;;  %v2399_v27 = vsub.f32 1.0, %v2398_v32  ;;  %v2415_v45 = vmul.f32 %v5411_v43, %v2414_v19  ;;  %v2359_v30 = vor.u32 1.1754944e-38, %v2358_v49  ;;  %vm5527_vm12 = vmor %vm2417_vm6, %vm2418_vm8 }
 0x74b   :  { %v2385_v55 = vmul.f32 %v5416_v60, %v2384_v6  ;;  %vm2403_vm10 = vweird.f32 %v5425_v53  ;;  %v2423_v37 = vand.u32 2147483648, %v5384_v29  ;;  %v2421_v19 = vand.u32 2147483647, %v5384_v29 }
 0x74c   :  { %v2447_v13 = vmul.f32 %v2443_v16, %v2330_v8  ;;  %v2360_v3 = vsel %vm2357_vm4, %v2359_v30, %v2355_v62  ;;  %v2416_v26 = vadd.f32 %v5411_v43, %v2415_v45  ;;  %v2438_v49 = vand.u32 2147483648, %v5402_v20  ;;  %vm5561_vm4 = vmor %vm2387_vm5, %vm2388_vm7 }
 0x74d   :  { %v5430_v15 = vpop.eup %3141  ;;  %vm2432_vm13 = vweird.f32 %v5402_v20  ;;  %v2436_v29 = vand.u32 2147483647, %v5402_v20  ;;  %v2406_v16 = vand.u32 2147483647, %v5394_v18  ;;  %vm2422_vm3 = vcmp.eq.f32.partialorder %v2421_v19, 8.507059e+37 }
 0x74e   :  { %v2428_v24 = vmul.f32 %v5430_v15, %v5402_v20  ;;  %v2451_v38 = vadd.f32 %v2447_v13, %v3571_v58  ;;  %vm2433_vm11 = vweird.f32 %v5430_v15  ;;  %vm2392_vm5 = vcmp.eq.f32.partialorder %v2391_v5, 8.507059e+37 }
 0x74f   :  { %vm5549_vm15 = vmor %vm2432_vm13, %vm2433_vm11  ;;  %vm2407_vm6 = vcmp.eq.f32.partialorder %v2406_v16, 8.507059e+37 }
 0x750   :  { %v2429_v23 = vsub.f32 1.0, %v2428_v24 }
 0x751   :  { %v2225_v35 = vpop.f32.mrf.mxu3 }
 0x752   :  { %v2444_v11 = vadd.f32 %v2225_v35, %v3479_v44  ;;  %v2315_v44 = vsel %vm5420_vm0, %v2314_v34, %v2310_v56  ;;  %v2393_v34 = vand.u32 2147483648, %v5390_v21  ;;  %v2430_v32 = vmul.f32 %v5430_v15, %v2429_v23 }
 0x753   :  { %v2446_v24 = vmul.f32 %v2442_v31, %v2315_v44  ;;  %v2400_v56 = vmul.f32 %v5425_v53, %v2399_v27  ;;  %vm2402_vm0 = vweird.f32 %v5394_v18  ;;  %v2257_v27 = vld [vmem:[%s5631_s1 + $0x6] sm:$0x1]  ;;  %v2508_v18 = vld [vmem:[%s5631_s1 + $0x7] sm:$0x1]  ;;  %s3277_s1 = smov [#allocation2]  }
 0x754   :  { %v2448_v48 = vmul.f32 %v2444_v11, %v2345_v61  ;;  %v2431_v35 = vadd.f32 %v5430_v15, %v2430_v32  ;;  %vm5542_vm14 = vmor %vm2402_vm0, %vm2403_vm10  ;;  %v2424_v11 = vor.u32 1.1754944e-38, %v2423_v37  ;;  %vm2437_vm0 = vcmp.eq.f32.partialorder %v2436_v29, 8.507059e+37  ;;  %s2536_s2 = sshll.u32 %s3277_s1, 4  ;;  %s2537_s2 = int_to_ptr.vmem [resolvable:$true] %s2536_s2 }
 0x755   :  { %v2450_v39 = vadd.f32 %v2446_v24, %v3569_v57  ;;  %v2401_v2 = vadd.f32 %v5425_v53, %v2400_v56  ;;  %v2420_v57 = vsel %vm5527_vm12, %v5411_v43, %v2416_v26  ;;  %v2409_v43 = vor.u32 1.1754944e-38, %v2408_v41 }
 0x756   :  { %v2452_v36 = vadd.f32 %v2448_v48, %v3446_v9  ;;  %v2435_v23 = vsel %vm5549_vm15, %v5430_v15, %v2431_v35  ;;  %v2425_v61 = vsel %vm2422_vm3, %v2424_v11, %v2420_v57  ;;  %v2394_v6 = vor.u32 1.1754944e-38, %v2393_v34 }
 0x757   :  { %v2405_v31 = vsel %vm5542_vm14, %v5425_v53, %v2401_v2  ;;  %v2460_v45 = vsub.f32 1.0, %v2425_v61  ;;  %vm2509_vm13 = vcmp.lt.f32.partialorder %v2508_v18, 1.0 }
 0x758   :  { %3143 = vtanh.f32 %v2452_v36  ;;  %v2410_v62 = vsel %vm2407_vm6, %v2409_v43, %v2405_v31  ;;  %v2468_v36 = vmul.f32 %v2425_v61, %v5283_v22  ;;  %v3172_v22 = vld [vmem:[%s5634_s4] sm:$0xff] }
 0x759   :  { %v2227_v12 = vpop.f32.mrf.mxu3  ;;  %3145 = vtanh.f32 %v2451_v38  ;;  %v2459_v34 = vsub.f32 1.0, %v2410_v62  ;;  %v2467_v37 = vmul.f32 %v2410_v62, %v5291_v46 }
 0x75a   :  { %v2445_v9 = vadd.f32 %v2227_v12, %v3500_v0  ;;  %v2386_v0 = vadd.f32 %v5416_v60, %v2385_v55  ;;  %3147 = vtanh.f32 %v2450_v39 }
 0x75c   :  { %v2449_v58 = vmul.f32 %v2445_v9, %v2360_v3  ;;  %v2390_v52 = vsel %vm5561_vm4, %v5416_v60, %v2386_v0 }
 0x75d   :  { %v2395_v53 = vsel %vm2392_vm5, %v2394_v6, %v2390_v52 }
 0x75e   :  { %v2453_v20 = vadd.f32 %v2449_v58, %v3452_v14  ;;  %v2439_v14 = vor.u32 1.1754944e-38, %v2438_v49  ;;  %v3144_v21 = vpop.eup %3143  ;;  %v2458_v3 = vsub.f32 1.0, %v2395_v53  ;;  %v2466_v19 = vmul.f32 %v2395_v53, %v5293_v4 }
 0x75f   :  { %v3146_v8 = vpop.eup %3145  ;;  %v2464_v32 = vmul.f32 %v3144_v21, %v2460_v45 }
 0x760   :  { %3149 = vtanh.f32 %v2453_v20  ;;  %v2440_v48 = vsel %vm2437_vm0, %v2439_v14, %v2435_v23  ;;  %v3148_v60 = vpop.eup %3147  ;;  %v2463_v55 = vmul.f32 %v3146_v8, %v2459_v34  ;;  %v2264_v14 = vsub.f32 1.0, %v5318_v17 }
 0x761   :  { %v2230_v15 = vpop.f32.mrf.mxu3  ;;  %v2461_v13 = vsub.f32 1.0, %v2440_v48  ;;  %v2469_v5 = vmul.f32 %v2440_v48, %v5285_v7  ;;  %v2472_v41 = vadd.f32 %v2468_v36, %v2464_v32  ;;  %v2462_v26 = vmul.f32 %v3148_v60, %v2458_v3 }
 0x762   :  { %v5572_v44 = vadd.f32 %v2230_v15, %v3858_v54  ;;  %v2471_v39 = vadd.f32 %v2467_v37, %v2463_v55  ;;  %v2782_v48 = vsel %vm2509_vm13, 1.0, %v5728_v59 }
 0x763   :  { %v2470_v50 = vadd.f32 %v2466_v19, %v2462_v26 }
 0x764   :  { %v2765_v30 = vmul.f32 -1.442695, %v5572_v44  ;;  %2267 = vst.msk [vmem:[#allocation4 + $0x6] sm:$0x1] %vm557_vm1, %v5572_v44 }
 0x765   :  { %v2474_v49 = vpack.c.bf16 %v2471_v39, %v2470_v50 }
 0x766   :  { %v3150_v24 = vpop.eup %3149  ;;  %3151 = vpow2.f32 %v2765_v30 }
 0x767   :  { %v2465_v56 = vmul.f32 %v3150_v24, %v2461_v13 }
 0x769   :  { %v2473_v12 = vadd.f32 %v2469_v5, %v2465_v56  ;;  %v2232_v38 = vpop.f32.mrf.mxu3 }
 0x76b   :  { %v2475_v9 = vpack.c.bf16 %v2473_v12, %v2472_v41 }
 0x76c   :  { %v3152_v35 = vpop.eup %3151 }
 0x76d   :  { %v2238_v2 = vadd.f32 1.0, %v3152_v35  ;;  %2482 = vmatpush.bf16.msra.mxu0 %v2475_v9 }
 0x76f   :  { %3153 = vrcp.f32 %v2238_v2  ;;  %v2250_v0 = vand.u32 2147483648, %v2238_v2  ;;  %v2248_v4 = vand.u32 2147483647, %v2238_v2  ;;  %vm2244_vm8 = vweird.f32 %v2238_v2 }
 0x771   :  { %2483 = vmatpush.bf16.msra.mxu0 %v2474_v49  ;;  %v2251_v28 = vor.u32 1.1754944e-38, %v2250_v0  ;;  %vm2249_vm11 = vcmp.eq.f32.partialorder %v2248_v4, 8.507059e+37 }
 0x774   :  { %2775 = vmatmul.msk.bf16.vlgmr.msra.gmra.mxu0 %vm462_vm2, %v3172_v22 }
 0x775   :  { %v3154_v7 = vpop.eup %3153 }
 0x776   :  { %v2240_v46 = vmul.f32 %v3154_v7, %v2238_v2  ;;  %vm2245_vm7 = vweird.f32 %v3154_v7 }
 0x777   :  { %vm2246_vm10 = vmor %vm2244_vm8, %vm2245_vm7 }
 0x778   :  { %v2241_v58 = vsub.f32 1.0, %v2240_v46 }
 0x77a   :  { %v2242_v57 = vmul.f32 %v3154_v7, %v2241_v58 }
 0x77c   :  { %v2243_v29 = vadd.f32 %v3154_v7, %v2242_v57 }
 0x77e   :  { %v2247_v16 = vsel %vm2246_vm10, %v3154_v7, %v2243_v29 }
 0x77f   :  { %v2252_v11 = vsel %vm2249_vm11, %v2251_v28, %v2247_v16 }
 0x780   :  { %v2254_v20 = vmul.f32 %v2252_v11, %v5306_v63  ;;  %v2255_v43 = vsub.f32 1.0, %v2252_v11  ;;  %v2259_v23 = vrot.slane %v2252_v11, 1 }
 0x782   :  { %v2256_v31 = vmul.f32 %v2255_v43, %v5306_v63  ;;  %vm2261_vm12 = vcmp.lt.f32.partialorder %v2257_v27, %v2259_v23  ;;  %2266 = vst.msk [vmem:[#allocation2 + $0x5] sm:$0x2] %vm555_vm9, %v2254_v20 }
 0x783   :  { %v2766_v61 = vsel %vm2261_vm12, 1.0, %v5728_v59 }
 0x784   :  { %v2265_v52 = vmul.f32 %v2766_v61, %v2264_v14  ;;  %2514 = vst.msk [vmem:[#allocation2 + $0x6] sm:$0x2] %vm555_vm9, %v2256_v31  ;;  %2776 = vmatmul.msk.bf16.gmra.mxu0 %vm462_vm2, %v5312_v42 }
 0x785   :  { %2541 = dma.vmem_to_hbm [thread:$0]  %s2537_s2, 128, %s2539_s11, [#allocation3]  }
 0x786   :  { %v2268_v15 = vsub.f32 1.0, %v2265_v52  ;;  %v2279_v6 = vmul.f32 %v2265_v52, %v5572_v44  ;;  %v2281_v21 = vadd.f32 %v2265_v52, %v5318_v17  ;;  %v2271_v63 = vrot.slane %v2265_v52, 7 }
 0x788   :  { %v2278_v62 = vmul.f32 %v2268_v15, %v5322_v33  ;;  %v2512_v45 = vsub.f32 1.0, %v2281_v21  ;;  %v2269_v53 = vmul.f32 %v2268_v15, %v5324_v51  ;;  %v2273_v8 = vmul.f32 %v2271_v63, %v2254_v20 }
 0x78a   :  { %v2280_v30 = vadd.f32 %v2279_v6, %v2278_v62  ;;  %v2513_v60 = vmul.f32 %v2782_v48, %v2512_v45  ;;  %v2275_v13 = vrot.slane %v2273_v8, 1 }
 0x78c   :  { %v2516_v32 = vsub.f32 1.0, %v2513_v60  ;;  %v2277_v42 = vadd.f32 %v2275_v13, %v2269_v53  ;;  %v2519_v34 = vrot.slane %v2513_v60, 7 }
 0x78e   :  { %v2526_v24 = vmul.f32 %v2516_v32, %v2280_v30  ;;  %v2521_v3 = vmul.f32 %v2519_v34, %v2256_v31  ;;  %v2517_v44 = vmul.f32 %v2516_v32, %v2277_v42 }
 0x790   :  { %v2523_v56 = vrot.slane %v2521_v3, 1 }
 0x792   :  { %v2525_v17 = vadd.f32 %v2523_v56, %v2517_v44 }
 0x794   :  { %2777 = vmatmul.msk.bf16.gmra.mxu0 %vm462_vm2, %v5329_v47  ;;  %2529 = vst.msk [vmem:[#allocation6] sm:$0x1] %vm557_vm1, %v2525_v17 }
 0x7a4   :  { %2778 = vmatmul.msk.bf16.gmra.mxu0 %vm462_vm2, %v5336_v25 }
 0x7b4   :  { %2779 = vmatmul.msk.bf16.gmra.mxu0 %vm462_vm2, %v5343_v10 }
 0x7c4   :  { %2780 = vmatmul.msk.bf16.gmra.mxu0 %vm462_vm2, %v5350_v1 }
 0x7d4   :  { %2781 = vmatmul.msk.bf16.gmra.mxu0 %vm462_vm2, %v3639_v40 }
 0x7f1   :  { %v2485_v59 = vpop.f32.mrf.mxu0 }
 0x7f9   :  { %v2486_v33 = vpop.f32.mrf.mxu0 }
 0x801   :  { %v2488_v51 = vpop.f32.mrf.mxu0 }
 0x809   :  { %v2489_v47 = vpop.f32.mrf.mxu0 }
 0x811   :  { %v2491_v25 = vpop.f32.mrf.mxu0 }
 0x819   :  { %v2492_v10 = vpop.f32.mrf.mxu0 }
 0x821   :  { %v2494_v36 = vpop.f32.mrf.mxu0 }
 0x829   :  { %v2495_v1 = vpop.f32.mrf.mxu0 }
 0x831   :  { %v2497_v5 = vpop.f32.mrf.mxu0 }
 0x839   :  { %v2498_v55 = vpop.f32.mrf.mxu0 }
 0x841   :  { %v2500_v40 = vpop.f32.mrf.mxu0 }
 0x849   :  { %v2501_v41 = vpop.f32.mrf.mxu0 }
 0x851   :  { %v2503_v12 = vpop.f32.mrf.mxu0 }
 0x852   :  { %v2507_v26 = vadd.f32 %v2503_v12, %v3858_v54 }
 0x854   :  { %2515 = vst.msk [vmem:[#allocation4 + $0x7] sm:$0x1] %vm557_vm1, %v2507_v26  ;;  %v2527_v37 = vmul.f32 %v2513_v60, %v2507_v26 }
 0x855   :  { %2552 = dma.vmem_to_hbm [thread:$0]  %s2548_s13, 128, %s2550_s7, [#allocation5]  }
 0x856   :  { %v2528_v38 = vadd.f32 %v2527_v37, %v2526_v24  ;;  %2563 = dma.vmem_to_hbm [thread:$0]  %s2559_s17, 16, %s2561_s6, [#allocation5]  }
 0x858   :  { %2530 = vst.msk [vmem:[#allocation7] sm:$0x1] %vm557_vm1, %v2528_v38 }
 0x859   :  { %v2505_v9 = vpop.f32.mrf.mxu0  ;;  %2574 = dma.vmem_to_hbm [thread:$0]  %s2570_s19, 16, %s2572_s22, [#allocation8]  }
 0x85a   :  { %3269 = dma.done.wait [#allocation3], 128  }
 0x85b   :  { %3270 = vsyncadd [#allocation3], 4294967168 }
 0x85c   :  { %3271 = dma.done.wait [#allocation5], 144  }
 0x85d   :  { %3272 = vsyncadd [#allocation5], 4294967152 }
 0x85e   :  { %3273 = dma.done.wait [#allocation8], 16  }
 0x85f   :  { %3274 = vsyncadd [#allocation8], 4294967280 }
 0x860   :  { %2591 = vsyncpa [#allocation3], 1 }
 0x861   :  { %2592 = vsyncpa [#allocation5], 1 }
 0x862   :  { %2593 = vsyncpa [#allocation8], 1 }

</bundles_post_ra>
